<compile_context>
chip_gen: v5e
topology: v5e:2x2
jax: 0.10.0
libtpu: 0.0.40
codegen_flags: <defaults>
</compile_context>

<pallas_src>
import functools

import jax
import jax.numpy as jnp
import numpy as np
from jax import lax
from jax.experimental import pallas as pl
from jax.experimental.pallas import tpu as pltpu

_LN_EPS = 1e-5  # torch.nn.LayerNorm default


# ----------------------------- Pallas kernel -------------------------------

def _quantile_mlp_kernel(
    h_ref, tau_ref, cvpi_ref,                 # per-tile activations + const_vec*pi
    w1_ref, wt_ref, wm_ref, wl_ref,           # bf16 weights (base / tau / merge / last-row)
    ln1_ref, ln2_ref,                         # packed f32 biases + LN params
    out_ref,                                  # (1, 1, B*T) lane-dense output row
    h1_sc,                                    # VMEM scratch (B, H1)
    *, B, T,
):
    bf16, f32 = jnp.bfloat16, jnp.float32

    def layernorm(x, g, b):
        # fused single-pass LN: var = E[x^2] - mu^2
        mu = jnp.mean(x, axis=-1, keepdims=True)
        ms = jnp.mean(x * x, axis=-1, keepdims=True)
        var = jnp.maximum(ms - mu * mu, 0.0)
        return (x - mu) * lax.rsqrt(var + _LN_EPS) * g + b

    # unpack constants (static sublane slices of VMEM-resident packs)
    b1, g1, be1 = ln1_ref[0:1, :], ln1_ref[1:2, :], ln1_ref[2:3, :]
    bt, gt, bet = ln1_ref[3:4, :], ln1_ref[4:5, :], ln1_ref[5:6, :]
    bm, gm, bem = ln2_ref[0:1, :], ln2_ref[1:2, :], ln2_ref[2:3, :]
    bl = ln2_ref[3:4, 0:1]                                            # (1, 1) last_fc bias

    # ---- base_fc for the whole batch tile: relu(LN((B,D_in) @ W1 + b1)) -- (B, H1)
    h = h_ref[0]                                                      # (B, D_in) f32
    h1 = jnp.dot(h.astype(bf16), w1_ref[...],
                 preferred_element_type=f32) + b1
    h1 = jnp.maximum(layernorm(h1, g1, be1), 0.0)                     # (B, H1)
    h1_sc[...] = h1

    # ---- tau embedding: sigmoid(LN(cos(tau * k*pi) @ Wt + bt)) ----------- (B*T, H1)
    tau_col = tau_ref[0]                                              # (B*T, 1) f32
    x = jnp.cos(tau_col * cvpi_ref[...])                              # (B*T, E)  (pi folded)
    x = jnp.dot(x.astype(bf16), wt_ref[...],
                preferred_element_type=f32) + bt
    x = jax.nn.sigmoid(layernorm(x, gt, bet))                         # (B*T, H1)

    # ---- broadcast each base-feature row across its T quantiles --------- (B*T, H1)
    h1_parts = [jnp.broadcast_to(h1_sc[b:b + 1, :], (T, h1.shape[-1]))
                for b in range(B)]
    h1b = h1_parts[0] if B == 1 else jnp.concatenate(h1_parts, axis=0)

    # ---- merge_fc: relu(LN((x * h1) @ Wm + bm)) -------------------------- (B*T, H2)
    m = x * h1b
    m = jnp.dot(m.astype(bf16), wm_ref[...],
                preferred_element_type=f32) + bm
    m = jnp.maximum(layernorm(m, gm, bem), 0.0)                       # (B*T, H2)

    # ---- last_fc, trans_b bf16 contraction, lane-dense: (1,H2)·(B*T,H2)^T -> (1, B*T)
    out = lax.dot_general(
        wl_ref[...], m.astype(bf16),
        dimension_numbers=(((1,), (1,)), ((), ())),
        preferred_element_type=f32,
    ) + bl
    out_ref[0] = out                                                  # (1, B*T)


# ------------------------------ JAX wrapper ---------------------------------

def _pick_batch_tile(N, T):
    """B rows per grid step: target B*T ~ 128-512, keep >=2 steps for v7x megacore."""
    B = max(1, min(N, 256 // max(T, 1)))
    if N >= 2 and -(-N // B) < 2:
        B = -(-N // 2)
    return B


@jax.jit
def quantile_mlp_forward(state, action, tau, params):
    """state: (N, S), action: (N, A), tau: (N, T)  ->  (N, T) quantile values."""
    (w1, b1, g1, be1, wt, bt, gt, bet, wm, bm, gm, bem, wl_row, bl, cv_pi) = params
    f32 = jnp.float32

    h_in = jnp.concatenate([state, action], axis=1).astype(f32)       # (N, D_in)
    N, T = tau.shape
    D_in = h_in.shape[1]
    H1 = w1.shape[1]
    H2 = wm.shape[1]
    E = wt.shape[0]

    B = _pick_batch_tile(N, T)
    G = -(-N // B)
    N_pad = G * B
    tau_f = tau.astype(f32)
    if N_pad != N:                                                    # zero-pad is numerically safe
        h_in = jnp.pad(h_in, ((0, N_pad - N), (0, 0)))
        tau_f = jnp.pad(tau_f, ((0, N_pad - N), (0, 0)))

    h3 = h_in.reshape(G, B, D_in)                                     # one batch tile per grid step
    tau3 = tau_f.reshape(G, B * T, 1)                                 # batch-major (b*T + t) rows

    # pack the small f32 constants into two VMEM-resident arrays
    ln1_pack = jnp.concatenate([b1, g1, be1, bt, gt, bet], axis=0)    # (6, H1)
    ln2_pack = jnp.concatenate(
        [bm, gm, bem, jnp.full((1, H2), bl[0, 0], f32)], axis=0)      # (4, H2)
    wl_bf = wl_row.astype(jnp.bfloat16)                               # (1, H2)

    def const_spec(p):
        nd = p.ndim
        return pl.BlockSpec(p.shape, lambda g, _nd=nd: (0,) * _nd)

    consts = (cv_pi, w1, wt, wm, wl_bf, ln1_pack, ln2_pack)

    in_specs = [
        pl.BlockSpec((1, B, D_in), lambda g: (g, 0, 0)),              # batch tile of [state,action]
        pl.BlockSpec((1, B * T, 1), lambda g: (g, 0, 0)),             # batch tile of tau
    ] + [const_spec(p) for p in consts]

    out_specs = pl.BlockSpec((1, 1, B * T), lambda g: (g, 0, 0))      # lane-dense (1, B*T) row

    flops = 2 * N_pad * D_in * H1 + 2 * N_pad * T * (E * H1 + H1 * H2 + H2)
    transcendentals = N_pad * T * (E + H1)                            # cos + sigmoid
    bytes_accessed = int(
        sum(int(np.prod(a.shape)) * a.dtype.itemsize for a in (h3, tau3) + consts)
        + 4 * N_pad * T                                               # output writeback
    )

    kernel = functools.partial(_quantile_mlp_kernel, B=B, T=T)

    out3 = pl.pallas_call(
        kernel,
        out_shape=jax.ShapeDtypeStruct((G, 1, B * T), f32),
        grid=(G,),
        in_specs=in_specs,
        out_specs=out_specs,
        scratch_shapes=[pltpu.VMEM((B, H1), f32)],
        compiler_params=pltpu.CompilerParams(dimension_semantics=("parallel",)),
        cost_estimate=pl.CostEstimate(
            flops=flops, transcendentals=transcendentals, bytes_accessed=bytes_accessed
        ),
    )(h3, tau3, *consts)

    return out3.reshape(N_pad, T)[:N]


# --------------------------- Pure-JAX reference ------------------------------
# Matches the kernel's numeric contract: bf16 MXU operands with f32 accumulation,
# f32 element-wise math (same as the PyTorch module up to bf16 weight rounding).

def quantile_mlp_reference(state, action, tau, params):
    (w1, b1, g1, be1, wt, bt, gt, bet, wm, bm, gm, bem, wl_row, bl, cv_pi) = params
    bf16, f32 = jnp.bfloat16, jnp.float32

    def ln(x, g, b):
        mu = jnp.mean(x, axis=-1, keepdims=True)
        var = jnp.mean(jnp.square(x - mu), axis=-1, keepdims=True)
        return (x - mu) * lax.rsqrt(var + _LN_EPS) * g + b

    h = jnp.concatenate([state, action], axis=1).astype(f32)
    h = jnp.maximum(ln(jnp.dot(h.astype(bf16), w1, preferred_element_type=f32) + b1,
                       g1, be1), 0.0)                                   # (N, H1)
    x = jnp.cos(tau[:, :, None].astype(f32) * cv_pi[0][None, None, :])  # (N, T, E)
    x = jax.nn.sigmoid(ln(jnp.dot(x.astype(bf16), wt, preferred_element_type=f32) + bt,
                          gt, bet))                                     # (N, T, H1)
    h = x * h[:, None, :]
    h = jnp.maximum(ln(jnp.dot(h.astype(bf16), wm, preferred_element_type=f32) + bm,
                       gm, bem), 0.0)                                   # (N, T, H2)
    out = jnp.einsum('nth,h->nt', h.astype(bf16), wl_row[0].astype(bf16),
                     preferred_element_type=f32) + bl[0, 0]
    return out                                                          # (N, T)


# ------------------------------ Param init -----------------------------------

def init_params(key, input_size, hidden_sizes, embedding_size):
    H1, H2 = hidden_sizes

    def linear(key, fan_in, fan_out):
        k1, k2 = jax.random.split(key)
        bound = 1.0 / np.sqrt(fan_in)
        w = jax.random.uniform(k1, (fan_in, fan_out), jnp.float32, -bound, bound)
        b = jax.random.uniform(k2, (1, fan_out), jnp.float32, -bound, bound)
        return w, b

    k1, k2, k3, k4 = jax.random.split(key, 4)
    w1, b1 = linear(k1, input_size, H1)
    wt, bt = linear(k2, embedding_size, H1)
    wm, bm = linear(k3, H1, H2)
    wl, bl = linear(k4, H2, 1)            # wl: (H2, 1), bl: (1, 1)

    # bf16 weights (MXU-native); biases / LN params stay f32.
    w1 = w1.astype(jnp.bfloat16)
    wt = wt.astype(jnp.bfloat16)
    wm = wm.astype(jnp.bfloat16)
    wl_row = wl.T.astype(jnp.float32)     # (1, H2) row for the trans_b last_fc

    g1, be1 = jnp.ones((1, H1), jnp.float32), jnp.zeros((1, H1), jnp.float32)
    gt, bet = jnp.ones((1, H1), jnp.float32), jnp.zeros((1, H1), jnp.float32)
    gm, bem = jnp.ones((1, H2), jnp.float32), jnp.zeros((1, H2), jnp.float32)

    # const_vec = arange(1, 1+E) with pi folded in on the host.
    cv_pi = (jnp.arange(1, 1 + embedding_size, dtype=jnp.float32) * np.pi)[None, :]

    return (w1, b1, g1, be1, wt, bt, gt, bet, wm, bm, gm, bem, wl_row, bl, cv_pi)


# --------------------------------- Main ---------------------------------------

if __name__ == "__main__":
    N = 8              # batch
    S, A = 12, 4       # state / action dims -> input_size = 16
    hidden_sizes = (64, 64)
    E = 64             # embedding_size
    T = 32             # num_quantiles

    key = jax.random.PRNGKey(0)
    kp, ks, ka, kt = jax.random.split(key, 4)

    params = init_params(kp, S + A, hidden_sizes, E)
    state = jax.random.normal(ks, (N, S), jnp.float32)
    action = jax.random.normal(ka, (N, A), jnp.float32)
    tau = jax.random.uniform(kt, (N, T), jnp.float32)

    out = quantile_mlp_forward(state, action, tau, params)
    out = jax.block_until_ready(out)

    ref = quantile_mlp_reference(state, action, tau, params)
    assert out.shape == (N, T), out.shape
    max_err = float(jnp.max(jnp.abs(out - ref)))
    assert jnp.allclose(out, ref, atol=1e-2, rtol=1e-2), max_err
    print("KERNEL_OK")
</pallas_src>

<mosaic_0001>
module attributes {stable_mosaic.version = 11 : i64} {
  func.func @_quantile_mlp_kernel(%arg0: i32, %arg1: memref<1x4x16xf32, #tpu.memory_space<vmem>>, %arg2: memref<1x128x1xf32, #tpu.memory_space<vmem>>, %arg3: memref<1x64xf32, #tpu.memory_space<vmem>>, %arg4: memref<16x64xbf16, #tpu.memory_space<vmem>>, %arg5: memref<64x64xbf16, #tpu.memory_space<vmem>>, %arg6: memref<64x64xbf16, #tpu.memory_space<vmem>>, %arg7: memref<1x64xbf16, #tpu.memory_space<vmem>>, %arg8: memref<6x64xf32, #tpu.memory_space<vmem>>, %arg9: memref<4x64xf32, #tpu.memory_space<vmem>>, %arg10: memref<1x1x128xf32, #tpu.memory_space<vmem>>, %arg11: memref<4x64xf32, #tpu.memory_space<vmem>>) attributes {dimension_semantics = [#tpu.dimension_semantics<parallel>], iteration_bounds = array<i64: 2>, scalar_prefetch = 0 : i64, scratch_operands = 1 : i64, tpu.core_type = #tpu.core_type<tc>, window_params = [{transform_indices = @transform_0, window_bounds = array<i64: 1, 4, 16>}, {transform_indices = @transform_1, window_bounds = array<i64: 1, 128, 1>}, {pipeline_mode = #tpu.pipeline_mode<synchronous>, transform_indices = @transform_2, window_bounds = array<i64: 1, 64>}, {pipeline_mode = #tpu.pipeline_mode<synchronous>, transform_indices = @transform_3, window_bounds = array<i64: 16, 64>}, {pipeline_mode = #tpu.pipeline_mode<synchronous>, transform_indices = @transform_4, window_bounds = array<i64: 64, 64>}, {pipeline_mode = #tpu.pipeline_mode<synchronous>, transform_indices = @transform_5, window_bounds = array<i64: 64, 64>}, {pipeline_mode = #tpu.pipeline_mode<synchronous>, transform_indices = @transform_6, window_bounds = array<i64: 1, 64>}, {pipeline_mode = #tpu.pipeline_mode<synchronous>, transform_indices = @transform_7, window_bounds = array<i64: 6, 64>}, {pipeline_mode = #tpu.pipeline_mode<synchronous>, transform_indices = @transform_8, window_bounds = array<i64: 4, 64>}, {transform_indices = @transform_9, window_bounds = array<i64: 1, 1, 128>}]} {
    %c0 = arith.constant 0 : index
    %c0_0 = arith.constant 0 : index
    %0 = vector.load %arg8[%c0, %c0_0] : memref<6x64xf32, #tpu.memory_space<vmem>>, vector<1x64xf32>
    %c1 = arith.constant 1 : index
    %c0_1 = arith.constant 0 : index
    %1 = vector.load %arg8[%c1, %c0_1] : memref<6x64xf32, #tpu.memory_space<vmem>>, vector<1x64xf32>
    %c2 = arith.constant 2 : index
    %c0_2 = arith.constant 0 : index
    %2 = vector.load %arg8[%c2, %c0_2] : memref<6x64xf32, #tpu.memory_space<vmem>>, vector<1x64xf32>
    %c3 = arith.constant 3 : index
    %c0_3 = arith.constant 0 : index
    %3 = vector.load %arg8[%c3, %c0_3] : memref<6x64xf32, #tpu.memory_space<vmem>>, vector<1x64xf32>
    %c4 = arith.constant 4 : index
    %c0_4 = arith.constant 0 : index
    %4 = vector.load %arg8[%c4, %c0_4] : memref<6x64xf32, #tpu.memory_space<vmem>>, vector<1x64xf32>
    %c5 = arith.constant 5 : index
    %c0_5 = arith.constant 0 : index
    %5 = vector.load %arg8[%c5, %c0_5] : memref<6x64xf32, #tpu.memory_space<vmem>>, vector<1x64xf32>
    %c0_6 = arith.constant 0 : index
    %c0_7 = arith.constant 0 : index
    %6 = vector.load %arg9[%c0_6, %c0_7] : memref<4x64xf32, #tpu.memory_space<vmem>>, vector<1x64xf32>
    %c1_8 = arith.constant 1 : index
    %c0_9 = arith.constant 0 : index
    %7 = vector.load %arg9[%c1_8, %c0_9] : memref<4x64xf32, #tpu.memory_space<vmem>>, vector<1x64xf32>
    %c2_10 = arith.constant 2 : index
    %c0_11 = arith.constant 0 : index
    %8 = vector.load %arg9[%c2_10, %c0_11] : memref<4x64xf32, #tpu.memory_space<vmem>>, vector<1x64xf32>
    %c3_12 = arith.constant 3 : index
    %c0_13 = arith.constant 0 : index
    %9 = vector.load %arg9[%c3_12, %c0_13] : memref<4x64xf32, #tpu.memory_space<vmem>>, vector<1x1xf32>
    %c0_14 = arith.constant 0 : index
    %c0_15 = arith.constant 0 : index
    %c0_16 = arith.constant 0 : index
    %10 = vector.load %arg1[%c0_14, %c0_15, %c0_16] : memref<1x4x16xf32, #tpu.memory_space<vmem>>, vector<1x4x16xf32>
    %11 = vector.shape_cast %10 : vector<1x4x16xf32> to vector<4x16xf32>
    %12 = arith.truncf %11 : vector<4x16xf32> to vector<4x16xbf16>
    %c0_17 = arith.constant 0 : index
    %c0_18 = arith.constant 0 : index
    %13 = vector.load %arg4[%c0_17, %c0_18] : memref<16x64xbf16, #tpu.memory_space<vmem>>, vector<16x64xbf16>
    %cst = arith.constant dense<0.000000e+00> : vector<4x64xf32>
    %14 = tpu.matmul %12, %13, %cst {dimension_numbers = #tpu.dot_dimension_numbers<[1], [0], [0], [1], [0, 0, 1, 1], [], []>} : vector<4x16xbf16>, vector<16x64xbf16>, vector<4x64xf32> -> vector<4x64xf32>
    %15 = vector.broadcast %0 : vector<1x64xf32> to vector<4x64xf32>
    %16 = arith.addf %14, %15 : vector<4x64xf32>
    %cst_19 = arith.constant dense<0.000000e+00> : vector<4xf32>
    %17 = vector.multi_reduction <add>, %16, %cst_19 [1] : vector<4x64xf32> to vector<4xf32>
    %18 = vector.shape_cast %17 : vector<4xf32> to vector<4x1xf32>
    %cst_20 = arith.constant 6.400000e+01 : f32
    %19 = vector.broadcast %cst_20 : f32 to vector<4x1xf32>
    %20 = arith.divf %18, %19 : vector<4x1xf32>
    %21 = arith.mulf %16, %16 : vector<4x64xf32>
    %cst_21 = arith.constant dense<0.000000e+00> : vector<4xf32>
    %22 = vector.multi_reduction <add>, %21, %cst_21 [1] : vector<4x64xf32> to vector<4xf32>
    %23 = vector.shape_cast %22 : vector<4xf32> to vector<4x1xf32>
    %cst_22 = arith.constant 6.400000e+01 : f32
    %24 = vector.broadcast %cst_22 : f32 to vector<4x1xf32>
    %25 = arith.divf %23, %24 : vector<4x1xf32>
    %26 = arith.mulf %20, %20 : vector<4x1xf32>
    %27 = arith.subf %25, %26 : vector<4x1xf32>
    %cst_23 = arith.constant 0.000000e+00 : f32
    %28 = vector.broadcast %cst_23 : f32 to vector<4x1xf32>
    %29 = arith.maximumf %27, %28 : vector<4x1xf32>
    %30 = vector.broadcast %20 : vector<4x1xf32> to vector<4x64xf32>
    %31 = arith.subf %16, %30 : vector<4x64xf32>
    %cst_24 = arith.constant 9.99999974E-6 : f32
    %32 = vector.broadcast %cst_24 : f32 to vector<4x1xf32>
    %33 = arith.addf %29, %32 : vector<4x1xf32>
    %34 = math.rsqrt %33 : vector<4x1xf32>
    %35 = vector.broadcast %34 : vector<4x1xf32> to vector<4x64xf32>
    %36 = arith.mulf %31, %35 : vector<4x64xf32>
    %37 = vector.broadcast %1 : vector<1x64xf32> to vector<4x64xf32>
    %38 = arith.mulf %36, %37 : vector<4x64xf32>
    %39 = vector.broadcast %2 : vector<1x64xf32> to vector<4x64xf32>
    %40 = arith.addf %38, %39 : vector<4x64xf32>
    %cst_25 = arith.constant 0.000000e+00 : f32
    %41 = vector.broadcast %cst_25 : f32 to vector<4x64xf32>
    %42 = arith.maximumf %40, %41 : vector<4x64xf32>
    %c0_26 = arith.constant 0 : index
    %c0_27 = arith.constant 0 : index
    %43 = vector.load %arg11[%c0_26, %c0_27] : memref<4x64xf32, #tpu.memory_space<vmem>>, vector<4x64xf32>
    tpu.vector_store %arg11[%c0_26, %c0_27], %42 {strides = array<i32>} : memref<4x64xf32, #tpu.memory_space<vmem>>, vector<4x64xf32>,
    %c0_28 = arith.constant 0 : index
    %c0_29 = arith.constant 0 : index
    %c0_30 = arith.constant 0 : index
    %44 = vector.load %arg2[%c0_28, %c0_29, %c0_30] : memref<1x128x1xf32, #tpu.memory_space<vmem>>, vector<1x128x1xf32>
    %45 = vector.shape_cast %44 : vector<1x128x1xf32> to vector<128x1xf32>
    %c0_31 = arith.constant 0 : index
    %c0_32 = arith.constant 0 : index
    %46 = vector.load %arg3[%c0_31, %c0_32] : memref<1x64xf32, #tpu.memory_space<vmem>>, vector<1x64xf32>
    %47 = vector.broadcast %45 : vector<128x1xf32> to vector<128x64xf32>
    %48 = vector.broadcast %46 : vector<1x64xf32> to vector<128x64xf32>
    %49 = arith.mulf %47, %48 : vector<128x64xf32>
    %50 = math.cos %49 : vector<128x64xf32>
    %51 = arith.truncf %50 : vector<128x64xf32> to vector<128x64xbf16>
    %c0_33 = arith.constant 0 : index
    %c0_34 = arith.constant 0 : index
    %52 = vector.load %arg5[%c0_33, %c0_34] : memref<64x64xbf16, #tpu.memory_space<vmem>>, vector<64x64xbf16>
    %cst_35 = arith.constant dense<0.000000e+00> : vector<128x64xf32>
    %53 = tpu.matmul %51, %52, %cst_35 {dimension_numbers = #tpu.dot_dimension_numbers<[1], [0], [0], [1], [0, 0, 1, 1], [], []>} : vector<128x64xbf16>, vector<64x64xbf16>, vector<128x64xf32> -> vector<128x64xf32>
    %54 = vector.broadcast %3 : vector<1x64xf32> to vector<128x64xf32>
    %55 = arith.addf %53, %54 : vector<128x64xf32>
    %cst_36 = arith.constant dense<0.000000e+00> : vector<128xf32>
    %56 = vector.multi_reduction <add>, %55, %cst_36 [1] : vector<128x64xf32> to vector<128xf32>
    %57 = vector.shape_cast %56 : vector<128xf32> to vector<128x1xf32>
    %cst_37 = arith.constant 6.400000e+01 : f32
    %58 = vector.broadcast %cst_37 : f32 to vector<128x1xf32>
    %59 = arith.divf %57, %58 : vector<128x1xf32>
    %60 = arith.mulf %55, %55 : vector<128x64xf32>
    %cst_38 = arith.constant dense<0.000000e+00> : vector<128xf32>
    %61 = vector.multi_reduction <add>, %60, %cst_38 [1] : vector<128x64xf32> to vector<128xf32>
    %62 = vector.shape_cast %61 : vector<128xf32> to vector<128x1xf32>
    %cst_39 = arith.constant 6.400000e+01 : f32
    %63 = vector.broadcast %cst_39 : f32 to vector<128x1xf32>
    %64 = arith.divf %62, %63 : vector<128x1xf32>
    %65 = arith.mulf %59, %59 : vector<128x1xf32>
    %66 = arith.subf %64, %65 : vector<128x1xf32>
    %cst_40 = arith.constant 0.000000e+00 : f32
    %67 = vector.broadcast %cst_40 : f32 to vector<128x1xf32>
    %68 = arith.maximumf %66, %67 : vector<128x1xf32>
    %69 = vector.broadcast %59 : vector<128x1xf32> to vector<128x64xf32>
    %70 = arith.subf %55, %69 : vector<128x64xf32>
    %cst_41 = arith.constant 9.99999974E-6 : f32
    %71 = vector.broadcast %cst_41 : f32 to vector<128x1xf32>
    %72 = arith.addf %68, %71 : vector<128x1xf32>
    %73 = math.rsqrt %72 : vector<128x1xf32>
    %74 = vector.broadcast %73 : vector<128x1xf32> to vector<128x64xf32>
    %75 = arith.mulf %70, %74 : vector<128x64xf32>
    %76 = vector.broadcast %4 : vector<1x64xf32> to vector<128x64xf32>
    %77 = arith.mulf %75, %76 : vector<128x64xf32>
    %78 = vector.broadcast %5 : vector<1x64xf32> to vector<128x64xf32>
    %79 = arith.addf %77, %78 : vector<128x64xf32>
    %80 = arith.negf %79 : vector<128x64xf32>
    %81 = math.exp %80 : vector<128x64xf32>
    %cst_42 = arith.constant 1.000000e+00 : f32
    %82 = vector.broadcast %cst_42 : f32 to vector<128x64xf32>
    %83 = arith.addf %82, %81 : vector<128x64xf32>
    %84 = arith.divf %82, %83 : vector<128x64xf32>
    %c0_43 = arith.constant 0 : index
    %c0_44 = arith.constant 0 : index
    %85 = vector.load %arg11[%c0_43, %c0_44] : memref<4x64xf32, #tpu.memory_space<vmem>>, vector<1x64xf32>
    %86 = vector.shape_cast %85 : vector<1x64xf32> to vector<1x64xf32>
    %87 = vector.broadcast %86 : vector<1x64xf32> to vector<32x64xf32>
    %c1_45 = arith.constant 1 : index
    %c0_46 = arith.constant 0 : index
    %88 = vector.load %arg11[%c1_45, %c0_46] : memref<4x64xf32, #tpu.memory_space<vmem>>, vector<1x64xf32>
    %89 = vector.shape_cast %88 : vector<1x64xf32> to vector<1x64xf32>
    %90 = vector.broadcast %89 : vector<1x64xf32> to vector<32x64xf32>
    %c2_47 = arith.constant 2 : index
    %c0_48 = arith.constant 0 : index
    %91 = vector.load %arg11[%c2_47, %c0_48] : memref<4x64xf32, #tpu.memory_space<vmem>>, vector<1x64xf32>
    %92 = vector.shape_cast %91 : vector<1x64xf32> to vector<1x64xf32>
    %93 = vector.broadcast %92 : vector<1x64xf32> to vector<32x64xf32>
    %c3_49 = arith.constant 3 : index
    %c0_50 = arith.constant 0 : index
    %94 = vector.load %arg11[%c3_49, %c0_50] : memref<4x64xf32, #tpu.memory_space<vmem>>, vector<1x64xf32>
    %95 = vector.shape_cast %94 : vector<1x64xf32> to vector<1x64xf32>
    %96 = vector.broadcast %95 : vector<1x64xf32> to vector<32x64xf32>
    %97 = tpu.concatenate %87, %90, %93, %96 in 0 : vector<32x64xf32>, vector<32x64xf32>, vector<32x64xf32>, vector<32x64xf32> -> vector<128x64xf32>
    %98 = arith.mulf %84, %97 : vector<128x64xf32>
    %99 = arith.truncf %98 : vector<128x64xf32> to vector<128x64xbf16>
    %c0_51 = arith.constant 0 : index
    %c0_52 = arith.constant 0 : index
    %100 = vector.load %arg6[%c0_51, %c0_52] : memref<64x64xbf16, #tpu.memory_space<vmem>>, vector<64x64xbf16>
    %cst_53 = arith.constant dense<0.000000e+00> : vector<128x64xf32>
    %101 = tpu.matmul %99, %100, %cst_53 {dimension_numbers = #tpu.dot_dimension_numbers<[1], [0], [0], [1], [0, 0, 1, 1], [], []>} : vector<128x64xbf16>, vector<64x64xbf16>, vector<128x64xf32> -> vector<128x64xf32>
    %102 = vector.broadcast %6 : vector<1x64xf32> to vector<128x64xf32>
    %103 = arith.addf %101, %102 : vector<128x64xf32>
    %cst_54 = arith.constant dense<0.000000e+00> : vector<128xf32>
    %104 = vector.multi_reduction <add>, %103, %cst_54 [1] : vector<128x64xf32> to vector<128xf32>
    %105 = vector.shape_cast %104 : vector<128xf32> to vector<128x1xf32>
    %cst_55 = arith.constant 6.400000e+01 : f32
    %106 = vector.broadcast %cst_55 : f32 to vector<128x1xf32>
    %107 = arith.divf %105, %106 : vector<128x1xf32>
    %108 = arith.mulf %103, %103 : vector<128x64xf32>
    %cst_56 = arith.constant dense<0.000000e+00> : vector<128xf32>
    %109 = vector.multi_reduction <add>, %108, %cst_56 [1] : vector<128x64xf32> to vector<128xf32>
    %110 = vector.shape_cast %109 : vector<128xf32> to vector<128x1xf32>
    %cst_57 = arith.constant 6.400000e+01 : f32
    %111 = vector.broadcast %cst_57 : f32 to vector<128x1xf32>
    %112 = arith.divf %110, %111 : vector<128x1xf32>
    %113 = arith.mulf %107, %107 : vector<128x1xf32>
    %114 = arith.subf %112, %113 : vector<128x1xf32>
    %cst_58 = arith.constant 0.000000e+00 : f32
    %115 = vector.broadcast %cst_58 : f32 to vector<128x1xf32>
    %116 = arith.maximumf %114, %115 : vector<128x1xf32>
    %117 = vector.broadcast %107 : vector<128x1xf32> to vector<128x64xf32>
    %118 = arith.subf %103, %117 : vector<128x64xf32>
    %cst_59 = arith.constant 9.99999974E-6 : f32
    %119 = vector.broadcast %cst_59 : f32 to vector<128x1xf32>
    %120 = arith.addf %116, %119 : vector<128x1xf32>
    %121 = math.rsqrt %120 : vector<128x1xf32>
    %122 = vector.broadcast %121 : vector<128x1xf32> to vector<128x64xf32>
    %123 = arith.mulf %118, %122 : vector<128x64xf32>
    %124 = vector.broadcast %7 : vector<1x64xf32> to vector<128x64xf32>
    %125 = arith.mulf %123, %124 : vector<128x64xf32>
    %126 = vector.broadcast %8 : vector<1x64xf32> to vector<128x64xf32>
    %127 = arith.addf %125, %126 : vector<128x64xf32>
    %cst_60 = arith.constant 0.000000e+00 : f32
    %128 = vector.broadcast %cst_60 : f32 to vector<128x64xf32>
    %129 = arith.maximumf %127, %128 : vector<128x64xf32>
    %c0_61 = arith.constant 0 : index
    %c0_62 = arith.constant 0 : index
    %130 = vector.load %arg7[%c0_61, %c0_62] : memref<1x64xbf16, #tpu.memory_space<vmem>>, vector<1x64xbf16>
    %131 = arith.truncf %129 : vector<128x64xf32> to vector<128x64xbf16>
    %cst_63 = arith.constant dense<0.000000e+00> : vector<1x128xf32>
    %132 = tpu.matmul %130, %131, %cst_63 {dimension_numbers = #tpu.dot_dimension_numbers<[1], [1], [0], [0], [0, 0, 1, 0], [], []>} : vector<1x64xbf16>, vector<128x64xbf16>, vector<1x128xf32> -> vector<1x128xf32>
    %133 = vector.broadcast %9 : vector<1x1xf32> to vector<1x128xf32>
    %134 = arith.addf %132, %133 : vector<1x128xf32>
    %c0_64 = arith.constant 0 : index
    %c0_65 = arith.constant 0 : index
    %c0_66 = arith.constant 0 : index
    %135 = vector.load %arg10[%c0_64, %c0_65, %c0_66] : memref<1x1x128xf32, #tpu.memory_space<vmem>>, vector<1x1x128xf32>
    %136 = vector.shape_cast %135 : vector<1x1x128xf32> to vector<1x128xf32>
    %137 = vector.shape_cast %134 : vector<1x128xf32> to vector<1x1x128xf32>
    tpu.vector_store %arg10[%c0_64, %c0_65, %c0_66], %137 {strides = array<i32>} : memref<1x1x128xf32, #tpu.memory_space<vmem>>, vector<1x1x128xf32>,
    return
  }
  func.func @transform_0(%arg0: i32) -> (i32, i32, i32) {
    %c0_i32 = arith.constant 0 : i32
    %c0_i32_0 = arith.constant 0 : i32
    %c0_i32_1 = arith.constant 0 : i32
    return %arg0, %c0_i32, %c0_i32_0 : i32, i32, i32
  }
  func.func @transform_1(%arg0: i32) -> (i32, i32, i32) {
    %c0_i32 = arith.constant 0 : i32
    %c0_i32_0 = arith.constant 0 : i32
    %c0_i32_1 = arith.constant 0 : i32
    return %arg0, %c0_i32, %c0_i32_0 : i32, i32, i32
  }
  func.func @transform_2(%arg0: i32) -> (i32, i32) {
    %c0_i32 = arith.constant 0 : i32
    %c0_i32_0 = arith.constant 0 : i32
    %c0_i32_1 = arith.constant 0 : i32
    return %c0_i32, %c0_i32_0 : i32, i32
  }
  func.func @transform_3(%arg0: i32) -> (i32, i32) {
    %c0_i32 = arith.constant 0 : i32
    %c0_i32_0 = arith.constant 0 : i32
    %c0_i32_1 = arith.constant 0 : i32
    return %c0_i32, %c0_i32_0 : i32, i32
  }
  func.func @transform_4(%arg0: i32) -> (i32, i32) {
    %c0_i32 = arith.constant 0 : i32
    %c0_i32_0 = arith.constant 0 : i32
    %c0_i32_1 = arith.constant 0 : i32
    return %c0_i32, %c0_i32_0 : i32, i32
  }
  func.func @transform_5(%arg0: i32) -> (i32, i32) {
    %c0_i32 = arith.constant 0 : i32
    %c0_i32_0 = arith.constant 0 : i32
    %c0_i32_1 = arith.constant 0 : i32
    return %c0_i32, %c0_i32_0 : i32, i32
  }
  func.func @transform_6(%arg0: i32) -> (i32, i32) {
    %c0_i32 = arith.constant 0 : i32
    %c0_i32_0 = arith.constant 0 : i32
    %c0_i32_1 = arith.constant 0 : i32
    return %c0_i32, %c0_i32_0 : i32, i32
  }
  func.func @transform_7(%arg0: i32) -> (i32, i32) {
    %c0_i32 = arith.constant 0 : i32
    %c0_i32_0 = arith.constant 0 : i32
    %c0_i32_1 = arith.constant 0 : i32
    return %c0_i32, %c0_i32_0 : i32, i32
  }
  func.func @transform_8(%arg0: i32) -> (i32, i32) {
    %c0_i32 = arith.constant 0 : i32
    %c0_i32_0 = arith.constant 0 : i32
    %c0_i32_1 = arith.constant 0 : i32
    return %c0_i32, %c0_i32_0 : i32, i32
  }
  func.func @transform_9(%arg0: i32) -> (i32, i32, i32) {
    %c0_i32 = arith.constant 0 : i32
    %c0_i32_0 = arith.constant 0 : i32
    %c0_i32_1 = arith.constant 0 : i32
    return %arg0, %c0_i32, %c0_i32_0 : i32, i32, i32
  }
}

</mosaic_0001>

<bundles_post_ra>
// kernel: quantile_mlp_forward.1
= control target key start
LH: loop header
LB: loop body
LE: loop exit
PB: predicated region body
PF: predicated region fallthrough
CT: control target
= control target key end

     0   :  { %s4940_s30 = smov 0   ;;  %s8533_s0 = inlined_call_operand.vmem [shape: f32[2,4,16], index: 0, kind: input, shape index: {}]   ;;  %s8534_s1 = inlined_call_operand.vmem [shape: f32[2,128,1], index: 1, kind: input, shape index: {}]   ;;  %s8535_s2 = inlined_call_operand.vmem [shape: f32[1,64], index: 2, kind: input, shape index: {}]   ;;  %s8536_s3 = inlined_call_operand.vmem [shape: bf16[16,64], index: 3, kind: input, shape index: {}]   ;;  %s8537_s4 = inlined_call_operand.vmem [shape: bf16[64,64], index: 4, kind: input, shape index: {}]   ;;  %s8538_s5 = inlined_call_operand.vmem [shape: bf16[64,64], index: 5, kind: input, shape index: {}]   ;;  %s8539_s6 = inlined_call_operand.vmem [shape: bf16[1,64], index: 6, kind: input, shape index: {}]   ;;  %s8540_s7 = inlined_call_operand.vmem [shape: f32[6,64], index: 7, kind: input, shape index: {}]   ;;  %s8541_s8 = inlined_call_operand.vmem [shape: f32[4,64], index: 8, kind: input, shape index: {}]   ;;  %s8542_s9 = inlined_call_operand.vmem [shape: f32[2,1,128], index: 9, kind: output, shape index: {}]  }
   0x1 LB: > { %s4559_s10 = sadd.s32 4294967295, %s4880_s30   ;;  %p4563_p0 = scmp.ge.s32.totalorder %s4880_s30, 1  ;;  %s4880_s30 = sphi %s4940_s30, %s19_s30  }
   0x2   : > { %p296_p1 = scmp.lt.s32.totalorder %s4880_s30, 3 }
   0x4   : > { %p297_p2 = pnand %p4563_p0, %p296_p1 }
   0x6   : > { %300 = sbr.rel (%p297_p2) target bundleno = 1590 (0x636), region = 56 }
   0xb   : > { %p334_p3 = scmp.lt.s32.totalorder %s4559_s10, 1  ;;  %v8557_v0 = vmov 0   ;;  %v4978_v17 = vld [vmem:[%s8535_s2] ss:$0 sm:$0xff]  ;;  %v8559_v35 = vmov 683565275  }
   0xc   : > { %4723 = vset.pattern.permute.xlu2 %v8557_v0  ;;  %4722 = vset.pattern.permute.xlu1 %v8557_v0  ;;  %v8555_v37 = vmov 2475754826   ;;  %v8553_v39 = vmov 2131351028   ;;  %v8551_v41 = vmov 2102212464  }
   0xd   : > { %4721 = vset.pattern.permute.xlu0 %v8557_v0  ;;  %s8863_s10 = smov (!%p334_p3, %s4559_s10), 1  ;;  %v8549_v43 = vmov 920167782   ;;  %v8547_v51 = vmov 1326507024  }
   0xe   : > { %s4687_s11 = sshll.u32 %s8863_s10, 7  ;;  %s4564_s29 = sshll.u32 %s8863_s10, 2 }
   0xf   : > { %s4957_s14 = scalar_lea.vmem %s8534_s1, %s4687_s11  ;;  %s337_s13 = scalar_lea.vmem %s8533_s0, %s4564_s29 }
  0x10   : > { %v432_v1 = vld [vmem:[%s4957_s14 + $0x40] sm:$0xff]  ;;  %v430_v2 = vld [vmem:[%s4957_s14 + $0x30] sm:$0xff]  ;;  %v433_v4 = vld [vmem:[%s4957_s14 + $0x48] sm:$0xff] }
  0x11   : > { %v428_v3 = vld [vmem:[%s4957_s14 + $0x20] sm:$0xff]  ;;  %483 = vperm.xlu2 %4723, %v432_v1   ;;  %473 = vperm.xlu1 %4722, %v430_v2   ;;  %v431_v5 = vld [vmem:[%s4957_s14 + $0x38] sm:$0xff]  ;;  %v429_v6 = vld [vmem:[%s4957_s14 + $0x28] sm:$0xff] }
  0x12   : > { %463 = vperm.xlu0 %4721, %v428_v3   ;;  %v436_v7 = vld [vmem:[%s4957_s14 + $0x60] sm:$0xff]  ;;  %v435_v8 = vld [vmem:[%s4957_s14 + $0x58] sm:$0xff]  ;;  %v434_v9 = vld [vmem:[%s4957_s14 + $0x50] sm:$0xff] }
  0x13   : > { %v439_v10 = vld [vmem:[%s4957_s14 + $0x78] sm:$0xff]  ;;  %v438_v11 = vld [vmem:[%s4957_s14 + $0x70] sm:$0xff]  ;;  %v437_v12 = vld [vmem:[%s4957_s14 + $0x68] sm:$0xff] }
  0x14   : > { %v426_v13 = vld [vmem:[%s4957_s14 + $0x10] sm:$0xff]  ;;  %v425_v14 = vld [vmem:[%s4957_s14 + $0x8] sm:$0xff]  ;;  %v424_v15 = vld [vmem:[%s4957_s14] sm:$0xff] }
  0x15   : > { %v427_v16 = vld [vmem:[%s4957_s14 + $0x18] sm:$0xff]  ;;  %s345_s14 = scalar_lea.vmem %s8542_s9, %s8863_s10 }
  0x19   : > { %488 = vperm.xlu2 %4723, %v433_v4   ;;  %478 = vperm.xlu1 %4722, %v431_v5  }
  0x1a   : > { %468 = vperm.xlu0 %4721, %v429_v6  }
  0x21   : > { %503 = vperm.xlu2 %4723, %v436_v7   ;;  %498 = vperm.xlu1 %4722, %v435_v8  }
  0x22   : > { %493 = vperm.xlu0 %4721, %v434_v9  }
  0x29   : > { %518 = vperm.xlu2 %4723, %v439_v10   ;;  %513 = vperm.xlu1 %4722, %v438_v11  }
  0x2a   : > { %508 = vperm.xlu0 %4721, %v437_v12  }
  0x31   : > { %453 = vperm.xlu2 %4723, %v426_v13   ;;  %448 = vperm.xlu1 %4722, %v425_v14  }
  0x32   : > { %443 = vperm.xlu0 %4721, %v424_v15  }
  0x3a   : > { %458 = vperm.xlu0 %4721, %v427_v16  }
  0x6b   : > { %v484_v18 = vpop.permute.xlu2 %483 }
  0x6c   : > { %v4981_v19 = vmul.f32 %v4978_v17, %v484_v18 }
  0x6e   : > { %8644 = vst [vmem:[#allocation3_spill] sm:$0xff] %v4981_v19  ;;  %v1775_v20 = vand.u32 2139095040, %v4981_v19  ;;  %v1772_v21 = vand.u32 2147483647, %v4981_v19 }
  0x70   : > { %v1776_v22 = vshrl.u32 %v1775_v20, 23  ;;  %v1779_v24 = vand.u32 8388607, %v1772_v21 }
  0x72   : > { %v4596_v23 = vadd.s32 4294967169, %v1776_v22  ;;  %v1780_v28 = vor.u32 8388608, %v1779_v24 }
  0x73   : > { %v489_v25 = vpop.permute.xlu2 %488 }
  0x74   : > { %v1782_v26 = vadd.s32 1, %v4596_v23  ;;  %v4988_v27 = vmul.f32 %v4978_v17, %v489_v25  ;;  %v4996_v45 = vshll.u32 %v1780_v28, 8 }
  0x76   : > { %8645 = vst [vmem:[#allocation4_spill] sm:$0xff] %v4988_v27  ;;  %vm1783_vm0 = vcmp.gt.s32.totalorder %v1782_v26, 0  ;;  %v1929_v30 = vand.u32 2139095040, %v4988_v27  ;;  %v1926_v49 = vand.u32 2147483647, %v4988_v27  ;;  %v1821_v59 = vand.u32 65535, %v4996_v45 }
  0x77   : > { %v1784_v29 = vsel %vm1783_vm0, %v1782_v26, 0  ;;  %v1822_v7 = vshrl.u32 %v4996_v45, 16 }
  0x78   : > { %v1786_v31 = vand.u32 31, %v1784_v29  ;;  %v1785_v32 = vshrl.u32 %v1784_v29, 5  ;;  %v1930_v33 = vshrl.u32 %v1929_v30, 23  ;;  %v1933_v62 = vand.u32 8388607, %v1926_v49 }
  0x7a   : > { %v1787_v34 = vsub.s32 32, %v1786_v31  ;;  %v1789_v36 = vshll.u32 %v8559_v35, %v1786_v31  ;;  %v1792_v38 = vshll.u32 %v8555_v37, %v1786_v31  ;;  %v1795_v40 = vshll.u32 %v8553_v39, %v1786_v31 }
  0x7b   : > { %v1798_v42 = vshll.u32 %v8551_v41, %v1786_v31  ;;  %v1801_v44 = vshll.u32 %v8549_v43, %v1786_v31  ;;  %vm1804_vm1 = vcmp.lt.s32.totalorder %v1785_v32, 1  ;;  %vm1807_vm2 = vcmp.lt.s32.totalorder %v1785_v32, 4 }
  0x7c   : > { %v1790_v46 = vshrl.u32 %v8555_v37, %v1787_v34  ;;  %v1793_v47 = vshrl.u32 %v8553_v39, %v1787_v34  ;;  %v1796_v48 = vshrl.u32 %v8551_v41, %v1787_v34  ;;  %v1799_v50 = vshrl.u32 %v8549_v43, %v1787_v34 }
  0x7d   : > { %v1802_v52 = vshrl.u32 %v8547_v51, %v1787_v34  ;;  %v4599_v56 = vadd.s32 4294967169, %v1930_v33  ;;  %vm1806_vm3 = vcmp.lt.s32.totalorder %v1785_v32, 3  ;;  %vm1805_vm4 = vcmp.lt.s32.totalorder %v1785_v32, 2 }
  0x7e   : > { %v1791_v53 = vor.u32 %v1790_v46, %v1789_v36  ;;  %v1794_v54 = vor.u32 %v1793_v47, %v1792_v38  ;;  %v1797_v55 = vor.u32 %v1796_v48, %v1795_v40  ;;  %v1800_v57 = vor.u32 %v1799_v50, %v1798_v42 }
  0x7f   : > { %v1803_v58 = vor.u32 %v1802_v52, %v1801_v44  ;;  %v1788_v63 = vshrl.u32 %v8559_v35, %v1787_v34  ;;  %v1936_v3 = vadd.s32 1, %v4599_v56  ;;  %v1934_v16 = vor.u32 8388608, %v1933_v62 }
  0x80   : > { %v1812_v60 = vsel %vm1804_vm1, %v1791_v53, %v1794_v54  ;;  %v1816_v61 = vsel %vm1804_vm1, %v1794_v54, %v1797_v55  ;;  %v1813_v1 = vsel %vm1807_vm2, %v1800_v57, 920167782  ;;  %v1809_v4 = vsel %vm1807_vm2, %v1797_v55, 2102212464 }
  0x81   : > { %v1817_v2 = vsel %vm1807_vm2, %v1803_v58, 1326507024  ;;  %v1814_v5 = vsel %vm1806_vm3, %v1797_v55, %v1813_v1  ;;  %vm1937_vm5 = vcmp.gt.s32.totalorder %v1936_v3, 0  ;;  %v1808_v14 = vsel %vm1804_vm1, %v1788_v63, %v1791_v53 }
  0x82   : > { %v1818_v6 = vsel %vm1806_vm3, %v1800_v57, %v1817_v2  ;;  %v1815_v8 = vsel %vm1805_vm4, %v1812_v60, %v1814_v5  ;;  %v1810_v15 = vsel %vm1806_vm3, %v1794_v54, %v1809_v4  ;;  %v1938_v26 = vsel %vm1937_vm5, %v1936_v3, 0 }
  0x83   : > { %v1819_v9 = vsel %vm1805_vm4, %v1816_v61, %v1818_v6  ;;  %v1845_v12 = vand.u32 65535, %v1815_v8  ;;  %v1846_v13 = vshrl.u32 %v1815_v8, 16  ;;  %v5021_v28 = vsel %vm1805_vm4, %v1808_v14, %v1810_v15 }
  0x84   : > { %v1823_v10 = vand.u32 65535, %v1819_v9  ;;  %v1824_v11 = vshrl.u32 %v1819_v9, 16  ;;  %v5023_v38 = vshll.u32 %v1934_v16, 8  ;;  %v1940_v44 = vand.u32 31, %v1938_v26  ;;  %v504_v16 = vpop.permute.xlu2 %503 }
  0x85   : > { %v1847_v23 = vmul.u32 %v1845_v12, %v1821_v59  ;;  %v1848_v24 = vmul.u32 %v1846_v13, %v1821_v59  ;;  %v1849_v25 = vmul.u32 %v1845_v12, %v1822_v7  ;;  %v1850_v33 = vmul.u32 %v1846_v13, %v1822_v7 }
  0x86   : > { %v1825_v18 = vmul.u32 %v1823_v10, %v1821_v59  ;;  %v1826_v20 = vmul.u32 %v1824_v11, %v1821_v59  ;;  %v1827_v22 = vmul.u32 %v1823_v10, %v1822_v7  ;;  %v1828_v29 = vmul.u32 %v1824_v11, %v1822_v7 }
  0x87   : > { %v1851_v34 = vshll.u32 %v1848_v24, 16  ;;  %v1853_v36 = vshll.u32 %v1849_v25, 16  ;;  %v1941_v52 = vsub.s32 32, %v1940_v44  ;;  %v1852_v54 = vshrl.u32 %v1848_v24, 16 }
  0x88   : > { %v1829_v30 = vshll.u32 %v1826_v20, 16  ;;  %v1831_v31 = vshll.u32 %v1827_v22, 16  ;;  %v1830_v40 = vshrl.u32 %v1826_v20, 16  ;;  %v1832_v46 = vshrl.u32 %v1827_v22, 16 }
  0x89   : > { %vm1855_vm7 = vc.u32 %v1847_v23, %v1851_v34  ;;  %v1857_v48 = vadd.s32 %v1851_v34, %v1847_v23  ;;  %v1854_v57 = vshrl.u32 %v1849_v25, 16  ;;  %v5029_v59 = vshrl.u32 %v1938_v26, 5 }
  0x8a   : > { %vm1833_vm6 = vc.u32 %v1825_v18, %v1829_v30  ;;  %v1835_v42 = vadd.s32 %v1829_v30, %v1825_v18  ;;  %v1856_v50 = vsel %vm1855_vm7, 1, %v8557_v0  ;;  %v1943_v62 = vshll.u32 %v8559_v35, %v1940_v44 }
  0x8b   : > { %v1834_v47 = vsel %vm1833_vm6, 1, %v8557_v0  ;;  %v1858_v55 = vadd.s32 %v1856_v50, %v1850_v33  ;;  %vm1859_vm9 = vc.u32 %v1857_v48, %v1853_v36  ;;  %v5031_v60 = vadd.s32 %v1857_v48, %v1853_v36 }
  0x8c   : > { %v1836_v32 = vadd.s32 %v1834_v47, %v1828_v29  ;;  %vm1837_vm8 = vc.u32 %v1835_v42, %v1831_v31  ;;  %v1860_v58 = vsel %vm1859_vm9, 1, %v8557_v0  ;;  %v1944_v63 = vshrl.u32 %v8555_v37, %v1941_v52 }
  0x8d   : > { %v1838_v53 = vsel %vm1837_vm8, 1, %v8557_v0  ;;  %v1862_v61 = vadd.s32 %v1860_v58, %v1858_v55  ;;  %v1946_v2 = vshll.u32 %v8555_v37, %v1940_v44  ;;  %v1947_v3 = vshrl.u32 %v8553_v39, %v1941_v52 }
  0x8e   : > { %v1840_v56 = vadd.s32 %v1838_v53, %v1836_v32  ;;  %v1949_v4 = vshll.u32 %v8553_v39, %v1940_v44  ;;  %v1945_v6 = vor.u32 %v1944_v63, %v1943_v62  ;;  %v1950_v7 = vshrl.u32 %v8551_v41, %v1941_v52 }
  0x8f   : > { %v1863_v5 = vadd.s32 %v1862_v61, %v1852_v54  ;;  %v1952_v8 = vshll.u32 %v8551_v41, %v1940_v44  ;;  %v5042_v10 = vor.u32 %v1947_v3, %v1946_v2  ;;  %v1953_v11 = vshrl.u32 %v8549_v43, %v1941_v52 }
  0x90   : > { %v1841_v1 = vadd.s32 %v1840_v56, %v1830_v40  ;;  %v1955_v12 = vshll.u32 %v8549_v43, %v1940_v44  ;;  %v1951_v14 = vor.u32 %v1950_v7, %v1949_v4  ;;  %v1956_v15 = vshrl.u32 %v8547_v51, %v1941_v52 }
  0x91   : > { %v1864_v13 = vadd.s32 %v1863_v5, %v1854_v57  ;;  %vm1958_vm10 = vcmp.lt.s32.totalorder %v5029_v59, 1  ;;  %v1865_v18 = vmul.u32 %v4996_v45, %v5021_v28  ;;  %v1954_v20 = vor.u32 %v1953_v11, %v1952_v8 }
  0x92   : > { %v5040_v9 = vadd.s32 %v1841_v1, %v1832_v46  ;;  %vm1959_vm12 = vcmp.lt.s32.totalorder %v5029_v59, 2  ;;  %v1957_v23 = vor.u32 %v1956_v15, %v1955_v12  ;;  %vm1960_vm13 = vcmp.lt.s32.totalorder %v5029_v59, 3 }
  0x93   : > { %v1868_v22 = vadd.s32 1, %v1864_v13  ;;  %vm1961_vm14 = vcmp.lt.s32.totalorder %v5029_v59, 4  ;;  %v1966_v24 = vsel %vm1958_vm10, %v1945_v6, %v5042_v10  ;;  %v5061_v45 = vmul.f32 %v4978_v17, %v504_v16 }
  0x94   : > { %vm1867_vm11 = vc.u32 %v5040_v9, %v5031_v60  ;;  %v1967_v25 = vsel %vm1961_vm14, %v1954_v20, 920167782  ;;  %v1970_v29 = vsel %vm1958_vm10, %v5042_v10, %v1951_v14  ;;  %v1975_v30 = vand.u32 65535, %v5023_v38 }
  0x95   : > { %8646 = vst [vmem:[#allocation5_spill] sm:$0xff] %v5061_v45  ;;  %v1869_v26 = vsel %vm1867_vm11, %v1868_v22, %v1864_v13  ;;  %v1968_v28 = vsel %vm1960_vm13, %v1951_v14, %v1967_v25  ;;  %v1971_v34 = vsel %vm1961_vm14, %v1957_v23, 1326507024  ;;  %v1976_v36 = vshrl.u32 %v5023_v38, 16 }
  0x96   : > { %v1870_v31 = vadd.s32 %v1869_v26, %v1865_v18  ;;  %v1969_v33 = vsel %vm1959_vm12, %v1966_v24, %v1968_v28  ;;  %v1972_v40 = vsel %vm1960_vm13, %v1954_v20, %v1971_v34  ;;  %v2391_v47 = vand.u32 2139095040, %v5061_v45 }
  0x97   : > { %v1999_v42 = vand.u32 65535, %v1969_v33  ;;  %v2000_v44 = vshrl.u32 %v1969_v33, 16  ;;  %v1973_v46 = vsel %vm1959_vm12, %v1970_v29, %v1972_v40  ;;  %v1942_v54 = vshrl.u32 %v8559_v35, %v1941_v52 }
  0x98   : > { %v1977_v48 = vand.u32 65535, %v1973_v46  ;;  %v1978_v32 = vshrl.u32 %v1973_v46, 16  ;;  %v1871_v53 = vadd.s32 536870912, %v1870_v31  ;;  %v2392_v1 = vshrl.u32 %v2391_v47, 23 }
  0x99   : > { %v2002_v50 = vmul.u32 %v2000_v44, %v1975_v30  ;;  %v2001_v55 = vmul.u32 %v1999_v42, %v1975_v30  ;;  %v2003_v56 = vmul.u32 %v1999_v42, %v1976_v36  ;;  %v2004_v62 = vmul.u32 %v2000_v44, %v1976_v36 }
  0x9a   : > { %v1979_v57 = vmul.u32 %v1977_v48, %v1975_v30  ;;  %v1980_v58 = vmul.u32 %v1978_v32, %v1975_v30  ;;  %v1981_v61 = vmul.u32 %v1977_v48, %v1976_v36  ;;  %v1982_v2 = vmul.u32 %v1978_v32, %v1976_v36 }
  0x9b   : > { %v2005_v63 = vshll.u32 %v2002_v50, 16  ;;  %v2007_v5 = vshll.u32 %v2003_v56, 16  ;;  %v5080_v7 = vshrl.u32 %v1871_v53, 30  ;;  %v1962_v8 = vsel %vm1958_vm10, %v1942_v54, %v1945_v6 }
  0x9c   : > { %v1983_v3 = vshll.u32 %v1980_v58, 16  ;;  %v1985_v4 = vshll.u32 %v1981_v61, 16  ;;  %v1963_v52 = vsel %vm1961_vm14, %v1951_v14, 2102212464  ;;  %v2006_v16 = vshrl.u32 %v2002_v50, 16 }
  0x9d   : > { %8647 = vst [vmem:[#allocation6_spill] sm:$0xff] %v5080_v7  ;;  %vm2009_vm15 = vc.u32 %v2001_v55, %v2005_v63  ;;  %v2011_v11 = vadd.s32 %v2005_v63, %v2001_v55  ;;  %v4608_v20 = vadd.s32 4294967169, %v2392_v1  ;;  %v1984_v22 = vshrl.u32 %v1980_v58, 16 }
  0x9e   : > { %vm1987_vm0 = vc.u32 %v1979_v57, %v1983_v3  ;;  %v1989_v12 = vadd.s32 %v1983_v3, %v1979_v57  ;;  %v2010_v13 = vsel %vm2009_vm15, 1, %v8557_v0  ;;  %v1873_v6 = vshll.u32 %v5080_v7, 30 }
  0x9f   : > { %v1988_v15 = vsel %vm1987_vm0, 1, %v8557_v0  ;;  %v2012_v18 = vadd.s32 %v2010_v13, %v2004_v62  ;;  %vm2013_vm2 = vc.u32 %v2011_v11, %v2007_v5  ;;  %v1964_v24 = vsel %vm1960_vm13, %v5042_v10, %v1963_v52 }
  0xa0   : > { %v1990_v23 = vadd.s32 %v1988_v15, %v1982_v2  ;;  %vm1991_vm1 = vc.u32 %v1989_v12, %v1985_v4  ;;  %v2014_v25 = vsel %vm2013_vm2, 1, %v8557_v0  ;;  %v1986_v26 = vshrl.u32 %v1981_v61, 16 }
  0xa1   : > { %v1992_v14 = vsel %vm1991_vm1, 1, %v8557_v0  ;;  %v2008_v29 = vshrl.u32 %v2003_v56, 16  ;;  %v2016_v30 = vadd.s32 %v2014_v25, %v2012_v18  ;;  %v2398_v33 = vadd.s32 1, %v4608_v20 }
  0xa2   : > { %v1994_v28 = vadd.s32 %v1992_v14, %v1990_v23  ;;  %v8546_v40 = vand.u32 2147483647, %v5061_v45  ;;  %v1965_v42 = vsel %vm1959_vm12, %v1962_v8, %v1964_v24  ;;  %v5097_v44 = vadd.s32 %v2011_v11, %v2007_v5 }
  0xa3   : > { %v2017_v36 = vadd.s32 %v2016_v30, %v2006_v16  ;;  %vm2399_vm3 = vcmp.gt.s32.totalorder %v2398_v33, 0  ;;  %v5099_v10 = vsub.s32 %v1870_v31, %v1873_v6  ;;  %v2019_v50 = vmul.u32 %v5023_v38, %v1965_v42 }
  0xa4   : > { %v1995_v34 = vadd.s32 %v1994_v28, %v1984_v22  ;;  %v2400_v48 = vsel %vm2399_vm3, %v2398_v33, 0  ;;  %v2395_v53 = vand.u32 8388607, %v8546_v40 }
  0xa5   : > { %v2018_v47 = vadd.s32 %v2017_v36, %v2008_v29  ;;  %v2402_v32 = vand.u32 31, %v2400_v48  ;;  %vm1875_vm5 = vcmp.lt.s32.totalorder %v5099_v10, 0  ;;  %v5114_v58 = vshrl.u32 %v2400_v48, 5 }
  0xa6   : > { %v5101_v46 = vadd.s32 %v1995_v34, %v1986_v26  ;;  %v1876_v62 = vsub.s32 0, %v5099_v10  ;;  %v2396_v1 = vor.u32 8388608, %v2395_v53 }
  0xa7   : > { %v2022_v59 = vadd.s32 1, %v2018_v47  ;;  %v5108_v54 = vsub.s32 32, %v2402_v32  ;;  %v2405_v55 = vshll.u32 %v8559_v35, %v2402_v32  ;;  %v2408_v31 = vshll.u32 %v8555_v37, %v2402_v32 }
  0xa8   : > { %vm2021_vm4 = vc.u32 %v5101_v46, %v5097_v44  ;;  %v2411_v56 = vshll.u32 %v8553_v39, %v2402_v32  ;;  %v2414_v5 = vshll.u32 %v8551_v41, %v2402_v32  ;;  %v2417_v13 = vshll.u32 %v8549_v43, %v2402_v32 }
  0xa9   : > { %v2023_v57 = vsel %vm2021_vm4, %v2022_v59, %v2018_v47  ;;  %v2406_v38 = vshrl.u32 %v8555_v37, %v5108_v54  ;;  %v2409_v61 = vshrl.u32 %v8553_v39, %v5108_v54  ;;  %v2412_v2 = vshrl.u32 %v8551_v41, %v5108_v54 }
  0xaa   : > { %v2024_v63 = vadd.s32 %v2023_v57, %v2019_v50  ;;  %v2415_v8 = vshrl.u32 %v8549_v43, %v5108_v54  ;;  %v2418_v15 = vshrl.u32 %v8547_v51, %v5108_v54  ;;  %vm2420_vm6 = vcmp.lt.s32.totalorder %v5114_v58, 1 }
  0xab   : > { %v5123_v3 = vor.u32 %v2406_v38, %v2405_v55  ;;  %v5125_v4 = vor.u32 %v2409_v61, %v2408_v31  ;;  %v5130_v52 = vor.u32 %v2412_v2, %v2411_v56  ;;  %v1877_v16 = vsel %vm1875_vm5, %v1876_v62, %v5099_v10  ;;  %v519_v31 = vpop.permute.xlu2 %518 }
  0xac   : > { %v2025_v11 = vadd.s32 536870912, %v2024_v63  ;;  %v2416_v12 = vor.u32 %v2415_v8, %v2414_v5  ;;  %vm2422_vm7 = vcmp.lt.s32.totalorder %v5114_v58, 3  ;;  %v5142_v20 = vshll.u32 %v2396_v1, 8 }
  0xad   : > { %v2419_v22 = vor.u32 %v2418_v15, %v2417_v13  ;;  %vm2421_vm8 = vcmp.lt.s32.totalorder %v5114_v58, 2  ;;  %vm2423_vm9 = vcmp.lt.s32.totalorder %v5114_v58, 4  ;;  %v2428_v23 = vsel %vm2420_vm6, %v5123_v3, %v5125_v4 }
  0xae   : > { %v5139_v18 = vshrl.u32 %v2025_v11, 30  ;;  %v2429_v24 = vsel %vm2423_vm9, %v2416_v12, 920167782  ;;  %v2432_v25 = vsel %vm2420_vm6, %v5125_v4, %v5130_v52  ;;  %v1878_v28 = vclz %v1877_v16 }
  0xaf   : > { %v2430_v14 = vsel %vm2422_vm7, %v5130_v52, %v2429_v24  ;;  %v2433_v26 = vsel %vm2423_vm9, %v2419_v22, 1326507024  ;;  %v2437_v30 = vand.u32 65535, %v5142_v20  ;;  %v2438_v34 = vshrl.u32 %v5142_v20, 16 }
  0xb0   : > { %8648 = vst [vmem:[#allocation7_spill] sm:$0xff] %v5139_v18  ;;  %v2027_v6 = vshll.u32 %v5139_v18, 30  ;;  %v2431_v29 = vsel %vm2421_vm8, %v2428_v23, %v2430_v14  ;;  %v2434_v33 = vsel %vm2422_vm7, %v2416_v12, %v2433_v26  ;;  %v4597_v56 = vadd.s32 4294967294, %v1878_v28 }
  0xb1   : > { %v2461_v36 = vand.u32 65535, %v2431_v29  ;;  %v2462_v42 = vshrl.u32 %v2431_v29, 16  ;;  %v2435_v48 = vsel %vm2421_vm8, %v2432_v25, %v2434_v33  ;;  %v5177_v8 = vmul.f32 %v4978_v17, %v519_v31  ;;  %v474_v31 = vpop.permute.xlu1 %473 }
  0xb2   : > { %v5168_v47 = vsub.s32 %v2024_v63, %v2027_v6  ;;  %v2439_v32 = vand.u32 65535, %v2435_v48  ;;  %v2440_v50 = vshrl.u32 %v2435_v48, 16  ;;  %vm4598_vm12 = vcmp.lt.s32.totalorder %v4597_v56, 0 }
  0xb3   : > { %v2463_v53 = vmul.u32 %v2461_v36, %v2437_v30  ;;  %v2464_v59 = vmul.u32 %v2462_v42, %v2437_v30  ;;  %v5172_v55 = vmul.u32 %v2461_v36, %v2438_v34  ;;  %v2466_v1 = vmul.u32 %v2462_v42, %v2438_v34  ;;  %8649 = vst [vmem:[#allocation8_spill] sm:$0xff] %v5177_v8 }
  0xb4   : > { %v2441_v57 = vmul.u32 %v2439_v32, %v2437_v30  ;;  %v2442_v38 = vmul.u32 %v2440_v50, %v2437_v30  ;;  %v2443_v61 = vmul.u32 %v2439_v32, %v2438_v34  ;;  %v2030_v62 = vsub.s32 0, %v5168_v47 }
  0xb5   : > { %v2467_v2 = vshll.u32 %v2464_v59, 16  ;;  %vm2029_vm10 = vcmp.lt.s32.totalorder %v5168_v47, 0  ;;  %v2444_v63 = vmul.u32 %v2440_v50, %v2438_v34  ;;  %v2469_v12 = vshll.u32 %v5172_v55, 16 }
  0xb6   : > { %v2445_v5 = vshll.u32 %v2442_v38, 16  ;;  %v2447_v11 = vshll.u32 %v2443_v61, 16  ;;  %v2031_v16 = vsel %vm2029_vm10, %v2030_v62, %v5168_v47  ;;  %v2853_v14 = vand.u32 2139095040, %v5177_v8 }
  0xb7   : > { %vm2471_vm11 = vc.u32 %v2463_v53, %v2467_v2  ;;  %v2473_v23 = vadd.s32 %v2467_v2, %v2463_v53  ;;  %v1881_v25 = vsel %vm4598_vm12, 0, %v4597_v56  ;;  %v2032_v26 = vclz %v2031_v16 }
  0xb8   : > { %vm2449_vm13 = vc.u32 %v2441_v57, %v2445_v5  ;;  %v2451_v13 = vadd.s32 %v2445_v5, %v2441_v57  ;;  %v2472_v15 = vsel %vm2471_vm11, 1, %v8557_v0  ;;  %v2468_v30 = vshrl.u32 %v2464_v59, 16 }
  0xb9   : > { %v2450_v22 = vsel %vm2449_vm13, 1, %v8557_v0  ;;  %v2474_v6 = vadd.s32 %v2472_v15, %v2466_v1  ;;  %vm2475_vm15 = vc.u32 %v2473_v23, %v2469_v12  ;;  %v2446_v34 = vshrl.u32 %v2442_v38, 16 }
  0xba   : > { %v2452_v24 = vadd.s32 %v2450_v22, %v2444_v63  ;;  %vm2453_vm14 = vc.u32 %v2451_v13, %v2447_v11  ;;  %v2476_v29 = vsel %vm2475_vm15, 1, %v8557_v0  ;;  %v2854_v42 = vshrl.u32 %v2853_v14, 23 }
  0xbb   : > { %v2454_v28 = vsel %vm2453_vm14, 1, %v8557_v0  ;;  %v2478_v33 = vadd.s32 %v2476_v29, %v2474_v6  ;;  %v1866_v48 = vadd.s32 %v5031_v60, %v5040_v9  ;;  %v1882_v32 = vsub.s32 32, %v1881_v25 }
  0xbc   : > { %v2456_v36 = vadd.s32 %v2454_v28, %v2452_v24  ;;  %v1886_v50 = vsub.s32 4294967266, %v1881_v25  ;;  %v2404_v53 = vshrl.u32 %v8559_v35, %v5108_v54  ;;  %v4600_v56 = vadd.s32 4294967294, %v2032_v26 }
  0xbd   : > { %v8543_v57 = vand.u32 2147483647, %v5177_v8  ;;  %v4617_v62 = vadd.s32 4294967169, %v2854_v42  ;;  %v2425_v59 = vsel %vm2423_vm9, %v5130_v52, 2102212464  ;;  %v2470_v38 = vshrl.u32 %v5172_v55, 16 }
  0xbe   : > { %v2479_v1 = vadd.s32 %v2478_v33, %v2468_v30  ;;  %v2448_v2 = vshrl.u32 %v2443_v61, 16  ;;  %v2457_v63 = vadd.s32 %v2456_v36, %v2446_v34  ;;  %v5196_v9 = vmul.f32 %v4978_v17, %v474_v31 }
  0xbf   : > { %v2860_v60 = vadd.s32 1, %v4617_v62  ;;  %v1883_v54 = vshll.u32 %v5099_v10, %v1881_v25  ;;  %v1884_v5 = vshrl.u32 %v1866_v48, %v1882_v32  ;;  %v1887_v11 = vadd.s32 127, %v1886_v50 }
  0xc0   : > { %8650 = vst [vmem:[#allocation9_spill] sm:$0xff] %v5196_v9  ;;  %v2424_v13 = vsel %vm2420_vm6, %v2404_v53, %v5123_v3  ;;  %vm4601_vm0 = vcmp.lt.s32.totalorder %v4600_v56, 0  ;;  %v2426_v52 = vsel %vm2422_vm7, %v5125_v4, %v2425_v59  ;;  %v2857_v55 = vand.u32 8388607, %v8543_v57 }
  0xc1   : > { %vm2861_vm1 = vcmp.gt.s32.totalorder %v2860_v60, 0  ;;  %v2020_v61 = vadd.s32 %v5097_v44, %v5101_v46  ;;  %v2480_v15 = vadd.s32 %v2479_v1, %v2470_v38  ;;  %v5209_v16 = vadd.s32 %v2457_v63, %v2448_v2 }
  0xc2   : > { %v2862_v10 = vsel %vm2861_vm1, %v2860_v60, 0  ;;  %v5211_v22 = vadd.s32 %v2473_v23, %v2469_v12  ;;  %v1467_v3 = vand.u32 2139095040, %v5196_v9  ;;  %v5214_v24 = vor.u32 %v1884_v5, %v1883_v54 }
  0xc3   : > { %v2864_v6 = vand.u32 31, %v2862_v10  ;;  %v1888_v14 = vshll.u32 %v1887_v11, 23  ;;  %v5216_v4 = vsel %vm4601_vm0, 0, %v4600_v56  ;;  %v2427_v25 = vsel %vm2421_vm8, %v2424_v13, %v2426_v52 }
  0xc4   : > { %v2858_v26 = vor.u32 8388608, %v2857_v55  ;;  %v5220_v28 = vshrl.u32 %v2862_v10, 5  ;;  %v2484_v29 = vadd.s32 1, %v2480_v15  ;;  %v2481_v33 = vmul.u32 %v5142_v20, %v2427_v25 }
  0xc5   : > { %v2865_v44 = vsub.s32 32, %v2864_v6  ;;  %v2867_v46 = vshll.u32 %v8559_v35, %v2864_v6  ;;  %v2870_v12 = vshll.u32 %v8555_v37, %v2864_v6  ;;  %v2873_v23 = vshll.u32 %v8553_v39, %v2864_v6 }
  0xc6   : > { %v2876_v30 = vshll.u32 %v8551_v41, %v2864_v6  ;;  %vm2483_vm2 = vc.u32 %v5209_v16, %v5211_v22  ;;  %v1468_v34 = vshrl.u32 %v1467_v3, 23  ;;  %v2879_v32 = vshll.u32 %v8549_v43, %v2864_v6 }
  0xc7   : > { %v2868_v58 = vshrl.u32 %v8555_v37, %v2865_v44  ;;  %v2871_v36 = vshrl.u32 %v8553_v39, %v2865_v44  ;;  %v2874_v42 = vshrl.u32 %v8551_v41, %v2865_v44  ;;  %v2877_v48 = vshrl.u32 %v8549_v43, %v2865_v44 }
  0xc8   : > { %v2880_v53 = vshrl.u32 %v8547_v51, %v2865_v44  ;;  %vm2882_vm3 = vcmp.lt.s32.totalorder %v5220_v28, 1  ;;  %v5236_v20 = vshll.u32 %v2858_v26, 8  ;;  %v2485_v31 = vsel %vm2483_vm2, %v2484_v29, %v2480_v15 }
  0xc9   : > { %v2869_v50 = vor.u32 %v2868_v58, %v2867_v46  ;;  %v2872_v56 = vor.u32 %v2871_v36, %v2870_v12  ;;  %v2875_v62 = vor.u32 %v2874_v42, %v2873_v23  ;;  %v2878_v59 = vor.u32 %v2877_v48, %v2876_v30 }
  0xca   : > { %v2881_v38 = vor.u32 %v2880_v53, %v2879_v32  ;;  %vm2883_vm4 = vcmp.lt.s32.totalorder %v5220_v28, 2  ;;  %vm2884_vm5 = vcmp.lt.s32.totalorder %v5220_v28, 3  ;;  %vm2885_vm6 = vcmp.lt.s32.totalorder %v5220_v28, 4 }
  0xcb   : > { %v2036_v1 = vsub.s32 32, %v5216_v4  ;;  %v2890_v2 = vsel %vm2882_vm3, %v2869_v50, %v2872_v56  ;;  %v2891_v63 = vsel %vm2885_vm6, %v2878_v59, 920167782  ;;  %v4590_v60 = vadd.s32 4294967169, %v1468_v34 }
  0xcc   : > { %v5246_v54 = vor.u32 4788187, %v1888_v14  ;;  %v2040_v5 = vsub.s32 4294967266, %v5216_v4  ;;  %v2892_v11 = vsel %vm2884_vm5, %v2875_v62, %v2891_v63  ;;  %v2899_v13 = vand.u32 65535, %v5236_v20 }
  0xcd   : > { %v5252_v52 = vadd.s32 %v2485_v31, %v2481_v33  ;;  %v2893_v55 = vsel %vm2883_vm4, %v2890_v2, %v2892_v11  ;;  %v2894_v15 = vsel %vm2882_vm3, %v2872_v56, %v2875_v62  ;;  %v2895_v10 = vsel %vm2885_vm6, %v2881_v38, 1326507024 }
  0xce   : > { %v2896_v6 = vsel %vm2884_vm5, %v2878_v59, %v2895_v10  ;;  %v2900_v3 = vshrl.u32 %v5236_v20, 16  ;;  %v2923_v14 = vand.u32 65535, %v2893_v55  ;;  %v2924_v25 = vshrl.u32 %v2893_v55, 16 }
  0xcf   : > { %v2037_v26 = vshll.u32 %v5168_v47, %v5216_v4  ;;  %v2038_v46 = vshrl.u32 %v2020_v61, %v2036_v1  ;;  %v2897_v29 = vsel %vm2883_vm4, %v2894_v15, %v2896_v6  ;;  %v1474_v12 = vadd.s32 1, %v4590_v60 }
  0xd0   : > { %v2041_v23 = vadd.s32 127, %v2040_v5  ;;  %v2901_v30 = vand.u32 65535, %v2897_v29  ;;  %v2902_v33 = vshrl.u32 %v2897_v29, 16  ;;  %v2926_v58 = vmul.u32 %v2924_v25, %v2899_v13 }
  0xd1   : > { %v2487_v34 = vadd.s32 536870912, %v5252_v52  ;;  %v2866_v36 = vshrl.u32 %v8559_v35, %v2865_v44  ;;  %v2887_v42 = vsel %vm2885_vm6, %v2875_v62, 2102212464  ;;  %v2925_v48 = vmul.u32 %v2923_v14, %v2899_v13 }
  0xd2   : > { %v2903_v32 = vmul.u32 %v2901_v30, %v2899_v13  ;;  %v2904_v53 = vmul.u32 %v2902_v33, %v2899_v13  ;;  %v2905_v47 = vmul.u32 %v2901_v30, %v2900_v3  ;;  %v2927_v61 = vmul.u32 %v2923_v14, %v2900_v3 }
  0xd3   : > { %v1892_v4 = vcvt.s32.f32 %v5214_v24  ;;  %v5272_v31 = vor.u32 %v2038_v46, %v2037_v26  ;;  %v2929_v59 = vshll.u32 %v2926_v58, 16  ;;  %vm1475_vm7 = vcmp.gt.s32.totalorder %v1474_v12, 0 }
  0xd4   : > { %v2906_v38 = vmul.u32 %v2902_v33, %v2900_v3  ;;  %v2907_v1 = vshll.u32 %v2904_v53, 16  ;;  %v2909_v2 = vshll.u32 %v2905_v47, 16  ;;  %v2928_v63 = vmul.u32 %v2924_v25, %v2900_v3 }
  0xd5   : > { %v2042_v60 = vshll.u32 %v2041_v23, 23  ;;  %v5274_v44 = vshrl.u32 %v2487_v34, 30  ;;  %v2886_v62 = vsel %vm2882_vm3, %v2866_v36, %v2869_v50  ;;  %v2888_v5 = vsel %vm2884_vm5, %v2872_v56, %v2887_v42 }
  0xd6   : > { %vm2911_vm8 = vc.u32 %v2903_v32, %v2907_v1  ;;  %v2913_v11 = vadd.s32 %v2907_v1, %v2903_v32  ;;  %v2931_v13 = vshll.u32 %v2927_v61, 16  ;;  %vm2933_vm9 = vc.u32 %v2925_v48, %v2929_v59 }
  0xd7   : > { %8651 = vst [vmem:[#allocation10_spill] sm:$0xff] %v5274_v44  ;;  %v2908_v55 = vshrl.u32 %v2904_v53, 16  ;;  %v2912_v15 = vsel %vm2911_vm8, 1, %v8557_v0  ;;  %v2934_v10 = vsel %vm2933_vm9, 1, %v8557_v0  ;;  %v1476_v6 = vsel %vm1475_vm7, %v1474_v12, 0 }
  0xd8   : > { %v2914_v3 = vadd.s32 %v2912_v15, %v2906_v38  ;;  %vm2915_vm10 = vc.u32 %v2913_v11, %v2909_v2  ;;  %v2935_v14 = vadd.s32 %v2929_v59, %v2925_v48  ;;  %v2936_v25 = vadd.s32 %v2934_v10, %v2928_v63 }
  0xd9   : > { %v5283_v26 = vor.u32 4788187, %v2042_v60  ;;  %v2916_v50 = vsel %vm2915_vm10, 1, %v8557_v0  ;;  %v2930_v56 = vshrl.u32 %v2926_v58, 16  ;;  %v8545_v46 = vand.u32 2147483647, %v5196_v9 }
  0xda   : > { %v2910_v29 = vshrl.u32 %v2905_v47, 16  ;;  %v2918_v23 = vadd.s32 %v2916_v50, %v2914_v3  ;;  %vm2937_vm11 = vc.u32 %v2935_v14, %v2931_v13  ;;  %v1478_v30 = vand.u32 31, %v1476_v6 }
  0xdb   : > { %v2489_v33 = vshll.u32 %v5274_v44, 30  ;;  %v2889_v12 = vsel %vm2883_vm4, %v2886_v62, %v2888_v5  ;;  %v2932_v34 = vshrl.u32 %v2927_v61, 16  ;;  %v2938_v36 = vsel %vm2937_vm11, 1, %v8557_v0 }
  0xdc   : > { %v2919_v42 = vadd.s32 %v2918_v23, %v2908_v55  ;;  %v2940_v48 = vadd.s32 %v2938_v36, %v2936_v25  ;;  %v5291_v32 = vshrl.u32 %v1476_v6, 5  ;;  %v5293_v53 = vsub.s32 32, %v1478_v30 }
  0xdd   : > { %v5295_v58 = vadd.s32 %v2935_v14, %v2931_v13  ;;  %v1481_v47 = vshll.u32 %v8559_v35, %v1478_v30  ;;  %v1484_v59 = vshll.u32 %v8555_v37, %v1478_v30  ;;  %v1487_v38 = vshll.u32 %v8553_v39, %v1478_v30 }
  0xde   : > { %v5300_v1 = vadd.s32 %v2919_v42, %v2910_v29  ;;  %v2941_v28 = vadd.s32 %v2940_v48, %v2930_v56  ;;  %v1482_v61 = vshrl.u32 %v8555_v37, %v5293_v53  ;;  %v1490_v2 = vshll.u32 %v8551_v41, %v1478_v30 }
  0xdf   : > { %v1471_v63 = vand.u32 8388607, %v8545_v46  ;;  %v1485_v60 = vshrl.u32 %v8553_v39, %v5293_v53  ;;  %v1488_v62 = vshrl.u32 %v8551_v41, %v5293_v53  ;;  %v1491_v5 = vshrl.u32 %v8549_v43, %v5293_v53 }
  0xe0   : > { %v5314_v11 = vsub.s32 %v5252_v52, %v2489_v33  ;;  %v2942_v13 = vadd.s32 %v2941_v28, %v2932_v34  ;;  %v2943_v55 = vmul.u32 %v5236_v20, %v2889_v12  ;;  %vm1496_vm12 = vcmp.lt.s32.totalorder %v5291_v32, 1 }
  0xe1   : > { %vm2945_vm13 = vc.u32 %v5300_v1, %v5295_v58  ;;  %v5320_v15 = vor.u32 %v1482_v61, %v1481_v47  ;;  %v5322_v10 = vor.u32 %v1485_v60, %v1484_v59  ;;  %v5324_v6 = vor.u32 %v1488_v62, %v1487_v38 }
  0xe2   : > { %v2946_v3 = vadd.s32 1, %v2942_v13  ;;  %v1492_v14 = vor.u32 %v1491_v5, %v1490_v2  ;;  %v1493_v25 = vshll.u32 %v8549_v43, %v1478_v30  ;;  %v1494_v52 = vshrl.u32 %v8547_v51, %v5293_v53 }
  0xe3   : > { %v1890_v20 = vand.u32 2147483647, %v5246_v54  ;;  %v2046_v50 = vcvt.s32.f32 %v5272_v31  ;;  %v1472_v56 = vor.u32 8388608, %v1471_v63  ;;  %vm1499_vm14 = vcmp.lt.s32.totalorder %v5291_v32, 4 }
  0xe4   : > { %v2044_v29 = vand.u32 2147483647, %v5283_v26  ;;  %v2947_v23 = vsel %vm2945_vm13, %v2946_v3, %v2942_v13  ;;  %v1495_v33 = vor.u32 %v1494_v52, %v1493_v25  ;;  %vm1498_vm15 = vcmp.lt.s32.totalorder %v5291_v32, 3 }
  0xe5   : > { %vm2491_vm0 = vcmp.lt.s32.totalorder %v5314_v11, 0  ;;  %v2948_v12 = vadd.s32 %v2947_v23, %v2943_v55  ;;  %vm1497_vm1 = vcmp.lt.s32.totalorder %v5291_v32, 2  ;;  %v1504_v54 = vsel %vm1496_vm12, %v5320_v15, %v5322_v10 }
  0xe6   : > { %v2492_v31 = vsub.s32 0, %v5314_v11  ;;  %v1505_v30 = vsel %vm1499_vm14, %v1492_v14, 920167782  ;;  %v1508_v26 = vsel %vm1496_vm12, %v5322_v10, %v5324_v6  ;;  %v1509_v34 = vsel %vm1499_vm14, %v1495_v33, 1326507024  ;;  %v464_v33 = vpop.permute.xlu0 %463 }
  0xe7   : > { %v2949_v36 = vadd.s32 536870912, %v2948_v12  ;;  %v1506_v42 = vsel %vm1498_vm15, %v5324_v6, %v1505_v30  ;;  %v1510_v48 = vsel %vm1498_vm15, %v1492_v14, %v1509_v34  ;;  %v5354_v47 = vshll.u32 %v1472_v56, 8 }
  0xe8   : > { %v1507_v59 = vsel %vm1497_vm1, %v1504_v54, %v1506_v42  ;;  %v1511_v38 = vsel %vm1497_vm1, %v1508_v26, %v1510_v48  ;;  %v2493_v63 = vsel %vm2491_vm0, %v2492_v31, %v5314_v11  ;;  %v5367_v13 = vmul.f32 %v1892_v4, %v1890_v20 }
  0xe9   : > { %v1513_v28 = vand.u32 65535, %v5354_v47  ;;  %v1514_v61 = vshrl.u32 %v5354_v47, 16  ;;  %v1515_v2 = vand.u32 65535, %v1511_v38  ;;  %v1516_v60 = vshrl.u32 %v1511_v38, 16 }
  0xea   : > { %v1537_v62 = vand.u32 65535, %v1507_v59  ;;  %v1538_v5 = vshrl.u32 %v1507_v59, 16  ;;  %v5369_v55 = vmul.f32 %v2046_v50, %v2044_v29  ;;  %v5371_v3 = vshrl.u32 %v2949_v36, 30 }
  0xeb   : > { %v1519_v14 = vmul.u32 %v1515_v2, %v1514_v61  ;;  %v1517_v25 = vmul.u32 %v1515_v2, %v1513_v28  ;;  %v1518_v52 = vmul.u32 %v1516_v60, %v1513_v28  ;;  %v2494_v54 = vclz %v2493_v63 }
  0xec   : > { %8652 = vst [vmem:[#allocation11_spill] sm:$0xff] %v5371_v3  ;;  %v1539_v56 = vmul.u32 %v1537_v62, %v1513_v28  ;;  %v1540_v23 = vmul.u32 %v1538_v5, %v1513_v28  ;;  %v1520_v30 = vmul.u32 %v1516_v60, %v1514_v61  ;;  %v1541_v31 = vmul.u32 %v1537_v62, %v1514_v61 }
  0xed   : > { %v1521_v26 = vshll.u32 %v1518_v52, 16  ;;  %v1523_v34 = vshll.u32 %v1519_v14, 16  ;;  %v1542_v42 = vmul.u32 %v1538_v5, %v1514_v61  ;;  %v1894_v24 = vxor.u32 2147483648, %v5367_v13 }
  0xee   : > { %v1543_v48 = vshll.u32 %v1540_v23, 16  ;;  %v2048_v4 = vxor.u32 2147483648, %v5369_v55  ;;  %v1545_v20 = vshll.u32 %v1541_v31, 16  ;;  %v5376_v50 = vmul.f32 %v4978_v17, %v464_v33 }
  0xef   : > { %v2951_v29 = vshll.u32 %v5371_v3, 30  ;;  %vm1525_vm2 = vc.u32 %v1517_v25, %v1521_v26  ;;  %v1527_v36 = vadd.s32 %v1521_v26, %v1517_v25  ;;  %vm8600_vm4 = vcmp.lt.s32.totalorder %v4981_v19, 0 }
  0xf0   : > { %vm1547_vm3 = vc.u32 %v1539_v56, %v1543_v48  ;;  %vm8595_vm5 = vcmp.lt.s32.totalorder %v4988_v27, 0  ;;  %v4609_v59 = vadd.s32 4294967294, %v2494_v54  ;;  %v1526_v38 = vsel %vm1525_vm2, 1, %v8557_v0 }
  0xf1   : > { %v1548_v28 = vsel %vm1547_vm3, 1, %v8557_v0  ;;  %v1549_v61 = vadd.s32 %v1543_v48, %v1539_v56  ;;  %v1480_v2 = vshrl.u32 %v8559_v35, %v5293_v53  ;;  %v1528_v17 = vadd.s32 %v1526_v38, %v1520_v30 }
  0xf2   : > { %vm1529_vm6 = vc.u32 %v1527_v36, %v1523_v34  ;;  %v1550_v63 = vadd.s32 %v1548_v28, %v1542_v42  ;;  %v1501_v60 = vsel %vm1499_vm14, %v5324_v6, 2102212464  ;;  %v1159_v5 = vand.u32 2139095040, %v5376_v50 }
  0xf3   : > { %v1530_v62 = vsel %vm1529_vm6, 1, %v8557_v0  ;;  %vm1551_vm7 = vc.u32 %v1549_v61, %v1545_v20  ;;  %v5390_v25 = vsub.s32 %v2948_v12, %v2951_v29  ;;  %v1522_v33 = vshrl.u32 %v1518_v52, 16 }
  0xf4   : > { %v1532_v54 = vadd.s32 %v1530_v62, %v1528_v17  ;;  %v1552_v56 = vsel %vm1551_vm7, 1, %v8557_v0  ;;  %vm4610_vm8 = vcmp.lt.s32.totalorder %v4609_v59, 0  ;;  %v1544_v53 = vshrl.u32 %v1540_v23, 16 }
  0xf5   : > { %v1554_v30 = vadd.s32 %v1552_v56, %v1550_v63  ;;  %v1160_v26 = vshrl.u32 %v1159_v5, 23  ;;  %v1500_v34 = vsel %vm1496_vm12, %v1480_v2, %v5320_v15  ;;  %v1502_v6 = vsel %vm1498_vm15, %v5322_v10, %v1501_v60 }
  0xf6   : > { %v1524_v42 = vshrl.u32 %v1519_v14, 16  ;;  %v1533_v48 = vadd.s32 %v1532_v54, %v1522_v33  ;;  %v1546_v12 = vshrl.u32 %v1541_v31, 16  ;;  %v8544_v52 = vand.u32 2147483647, %v5376_v50 }
  0xf7   : > { %v1555_v29 = vadd.s32 %v1554_v30, %v1544_v53  ;;  %v4584_v36 = vadd.s32 4294967169, %v1160_v26  ;;  %v5400_v38 = vsel %vm4610_vm8, 0, %v4609_v59  ;;  %v2954_v23 = vsub.s32 0, %v5390_v25 }
  0xf8   : > { %v5403_v28 = vadd.s32 %v1533_v48, %v1524_v42  ;;  %v5405_v17 = vadd.s32 %v1549_v61, %v1545_v20  ;;  %vm2953_vm9 = vcmp.lt.s32.totalorder %v5390_v25, 0  ;;  %v1503_v15 = vsel %vm1497_vm1, %v1500_v34, %v1502_v6 }
  0xf9   : > { %v1556_v10 = vadd.s32 %v1555_v29, %v1546_v12  ;;  %v1166_v14 = vadd.s32 1, %v4584_v36  ;;  %v1895_v31 = vsel %vm8600_vm4, %v1894_v24, %v5367_v13  ;;  %v2049_v59 = vsel %vm8595_vm5, %v2048_v4, %v5369_v55 }
  0xfa   : > { %v2482_v2 = vadd.s32 %v5211_v22, %v5209_v16  ;;  %vm1559_vm10 = vc.u32 %v5403_v28, %v5405_v17  ;;  %v2498_v20 = vsub.s32 32, %v5400_v38  ;;  %v1163_v61 = vand.u32 8388607, %v8544_v52 }
  0xfb   : > { %v1560_v32 = vadd.s32 1, %v1556_v10  ;;  %vm1167_vm11 = vcmp.gt.s32.totalorder %v1166_v14, 0  ;;  %vm5425_vm12 = vcmp.le.f32.partialorder %v1772_v21, 0.7853982  ;;  %v8653_v13 = vmov 0 }
  0xfc   : > { %v8654_v13 = vsel %vm5425_vm12, 4294967295, %v8653_v13  ;;  %v2955_v55 = vsel %vm2953_vm9, %v2954_v23, %v5390_v25  ;;  %v1557_v16 = vmul.u32 %v5354_v47, %v1503_v15  ;;  %v1168_v22 = vsel %vm1167_vm11, %v1166_v14, 0  ;;  %v479_v23 = vpop.permute.xlu1 %478 }
  0xfd   : > { %8655 = vst [vmem:[#allocation12_spill] sm:$0xff] %v8654_v13  ;;  %v5434_v24 = vsel %vm5425_vm12, %v4981_v19, %v1895_v31  ;;  %vm5438_vm13 = vcmp.le.f32.partialorder %v1926_v49, 0.7853982  ;;  %v8657_v4 = vmov 0  ;;  %v1561_v21 = vsel %vm1559_vm10, %v1560_v32, %v1556_v10 }
  0xfe   : > { %8656 = vst [vmem:[#allocation13_spill] sm:$0xff] %v5434_v24  ;;  %v8658_v4 = vsel %vm5438_vm13, 4294967295, %v8657_v4  ;;  %v1170_v63 = vand.u32 31, %v1168_v22  ;;  %v5445_v60 = vsel %vm5438_vm13, %v4988_v27, %v2049_v59  ;;  %v2499_v47 = vshll.u32 %v5314_v11, %v5400_v38 }
  0xff   : > { %8659 = vst [vmem:[#allocation14_spill] sm:$0xff] %v8658_v4  ;;  %v2502_v62 = vsub.s32 4294967266, %v5400_v38  ;;  %v1562_v5 = vadd.s32 %v1561_v21, %v1557_v16  ;;  %v2500_v33 = vshrl.u32 %v2482_v2, %v2498_v20  ;;  %v2956_v54 = vclz %v2955_v55  ;;  %v5483_v16 = vld [vmem:[%s8535_s2] ss:$0 sm:$0xff] }
 0x100   : > { %8660 = vst [vmem:[#allocation15_spill] sm:$0xff] %v5445_v60  ;;  %v1164_v56 = vor.u32 8388608, %v1163_v61  ;;  %v5450_v49 = vsub.s32 32, %v1170_v63  ;;  %v5452_v30 = vshrl.u32 %v1168_v22, 5  ;;  %v1173_v26 = vshll.u32 %v8559_v35, %v1170_v63 }
 0x101   : > { %v1563_v53 = vadd.s32 536870912, %v1562_v5  ;;  %v1176_v34 = vshll.u32 %v8555_v37, %v1170_v63  ;;  %v1179_v42 = vshll.u32 %v8553_v39, %v1170_v63  ;;  %v1182_v29 = vshll.u32 %v8551_v41, %v1170_v63 }
 0x102   : > { %v1174_v6 = vshrl.u32 %v8555_v37, %v5450_v49  ;;  %v1177_v11 = vshrl.u32 %v8553_v39, %v5450_v49  ;;  %v1180_v48 = vshrl.u32 %v8551_v41, %v5450_v49  ;;  %v1183_v36 = vshrl.u32 %v8549_v43, %v5450_v49 }
 0x103   : > { %v5463_v12 = vshrl.u32 %v1563_v53, 30  ;;  %v1186_v38 = vshrl.u32 %v8547_v51, %v5450_v49  ;;  %v2503_v15 = vadd.s32 127, %v2502_v62  ;;  %v1185_v31 = vshll.u32 %v8549_v43, %v1170_v63 }
 0x104   : > { %v5470_v10 = vor.u32 %v1174_v6, %v1173_v26  ;;  %v5472_v14 = vor.u32 %v1177_v11, %v1176_v34  ;;  %v4618_v59 = vadd.s32 4294967294, %v2956_v54  ;;  %v1181_v20 = vor.u32 %v1180_v48, %v1179_v42 }
 0x105   : > { %v1565_v2 = vshll.u32 %v5463_v12, 30  ;;  %v1184_v32 = vor.u32 %v1183_v36, %v1182_v29  ;;  %v5478_v61 = vmul.f32 %v5434_v24, %v5434_v24  ;;  %v1187_v55 = vor.u32 %v1186_v38, %v1185_v31 }
 0x106   : > { %v5486_v22 = vmul.f32 %v5483_v16, %v479_v23  ;;  %vm1188_vm14 = vcmp.lt.s32.totalorder %v5452_v30, 1  ;;  %vm1191_vm15 = vcmp.lt.s32.totalorder %v5452_v30, 4  ;;  %v5492_v63 = vshll.u32 %v1164_v56, 8 }
 0x107   : > { %8661 = vst [vmem:[#allocation16_spill] sm:$0xff] %v5478_v61  ;;  %v5488_v21 = vsub.s32 %v1562_v5, %v1565_v2  ;;  %v5496_v62 = vmul.f32 %v5445_v60, %v5445_v60  ;;  %v5498_v54 = vor.u32 %v2500_v33, %v2499_v47  ;;  %v1196_v53 = vsel %vm1188_vm14, %v5470_v10, %v5472_v14 }
 0x108   : > { %8662 = vst [vmem:[#allocation17_spill] sm:$0xff] %v5486_v22  ;;  %v1197_v5 = vsel %vm1191_vm15, %v1184_v32, 920167782  ;;  %v2504_v26 = vshll.u32 %v2503_v15, 23  ;;  %vm4619_vm0 = vcmp.lt.s32.totalorder %v4618_v59, 0  ;;  %vm1190_vm1 = vcmp.lt.s32.totalorder %v5452_v30, 3 }
 0x109   : > { %8663 = vst [vmem:[#allocation18_spill] sm:$0xff] %v5496_v62  ;;  %v1200_v56 = vsel %vm1188_vm14, %v5472_v14, %v1181_v20  ;;  %vm1189_vm2 = vcmp.lt.s32.totalorder %v5452_v30, 2  ;;  %v1198_v47 = vsel %vm1190_vm1, %v1181_v20, %v1197_v5  ;;  %v1201_v33 = vsel %vm1191_vm15, %v1187_v55, 1326507024 }
 0x10a   : > { %v1621_v34 = vand.u32 2139095040, %v5486_v22  ;;  %v1568_v6 = vsub.s32 0, %v5488_v21  ;;  %v1199_v11 = vsel %vm1189_vm2, %v1196_v53, %v1198_v47  ;;  %v1202_v42 = vsel %vm1190_vm1, %v1184_v32, %v1201_v33 }
 0x10b   : > { %v1205_v48 = vand.u32 65535, %v5492_v63  ;;  %vm1567_vm3 = vcmp.lt.s32.totalorder %v5488_v21, 0  ;;  %v1203_v29 = vsel %vm1189_vm2, %v1200_v56, %v1202_v42  ;;  %v1229_v36 = vand.u32 65535, %v1199_v11 }
 0x10c   : > { %v1230_v38 = vshrl.u32 %v1199_v11, 16  ;;  %v5525_v23 = vsel %vm4619_vm0, 0, %v4618_v59  ;;  %v1206_v15 = vshrl.u32 %v5492_v63, 16  ;;  %v1207_v31 = vand.u32 65535, %v1203_v29 }
 0x10d   : > { %v1208_v2 = vshrl.u32 %v1203_v29, 16  ;;  %v5528_v55 = vor.u32 4788187, %v2504_v26  ;;  %v1622_v5 = vshrl.u32 %v1621_v34, 23  ;;  %v2944_v47 = vadd.s32 %v5295_v58, %v5300_v1 }
 0x10e   : > { %v1232_v32 = vmul.u32 %v1230_v38, %v1205_v48  ;;  %v1569_v33 = vsel %vm1567_vm3, %v1568_v6, %v5488_v21  ;;  %v1211_v42 = vmul.u32 %v1207_v31, %v1206_v15  ;;  %v2960_v59 = vsub.s32 32, %v5525_v23 }
 0x10f   : > { %v1210_v56 = vmul.u32 %v1208_v2, %v1205_v48  ;;  %v1233_v11 = vmul.u32 %v1229_v36, %v1206_v15  ;;  %v2964_v26 = vsub.s32 4294967266, %v5525_v23  ;;  %v1172_v29 = vshrl.u32 %v8559_v35, %v5450_v49 }
 0x110   : > { %v1235_v57 = vshll.u32 %v1232_v32, 16  ;;  %v1209_v46 = vmul.u32 %v1207_v31, %v1205_v48  ;;  %v1570_v40 = vclz %v1569_v33  ;;  %v1193_v58 = vsel %vm1191_vm15, %v1181_v20, 2102212464 }
 0x111   : > { %v1213_v34 = vshll.u32 %v1210_v56, 16  ;;  %v1231_v1 = vmul.u32 %v1229_v36, %v1205_v48  ;;  %v4593_v6 = vadd.s32 4294967169, %v1622_v5  ;;  %v1212_v53 = vmul.u32 %v1208_v2, %v1206_v15 }
 0x112   : > { %v1215_v51 = vshll.u32 %v1211_v42, 16  ;;  %v1234_v39 = vmul.u32 %v1230_v38, %v1206_v15  ;;  %v1237_v37 = vshll.u32 %v1233_v11, 16  ;;  %v1192_v20 = vsel %vm1188_vm14, %v1172_v29, %v5470_v10  ;;  %v469_v15 = vpop.permute.xlu0 %468 }
 0x113   : > { %vm1217_vm6 = vc.u32 %v1209_v46, %v1213_v34  ;;  %v1219_v43 = vadd.s32 %v1213_v34, %v1209_v46  ;;  %vm1239_vm7 = vc.u32 %v1231_v1, %v1235_v57  ;;  %v1241_v31 = vadd.s32 %v1235_v57, %v1231_v1 }
 0x114   : > { %v1218_v41 = vsel %vm1217_vm6, 1, %v8557_v0  ;;  %v1240_v49 = vsel %vm1239_vm7, 1, %v8557_v0  ;;  %v8664_v2 = vand.u32 2147483647, %v5486_v22  ;;  %v1214_v5 = vshrl.u32 %v1210_v56, 16 }
 0x115   : > { %v1220_v52 = vadd.s32 %v1218_v41, %v1212_v53  ;;  %vm1221_vm8 = vc.u32 %v1219_v43, %v1215_v51  ;;  %v1242_v36 = vadd.s32 %v1240_v49, %v1234_v39  ;;  %vm1243_vm9 = vc.u32 %v1241_v31, %v1237_v37 }
 0x116   : > { %v1222_v48 = vsel %vm1221_vm8, 1, %v8557_v0  ;;  %v1625_v46 = vand.u32 8388607, %v8664_v2  ;;  %v1628_v38 = vadd.s32 1, %v4593_v6  ;;  %v4591_v41 = vadd.s32 4294967294, %v1570_v40 }
 0x117   : > { %v1224_v33 = vadd.s32 %v1222_v48, %v1220_v52  ;;  %v1194_v43 = vsel %vm1190_vm1, %v5472_v14, %v1193_v58  ;;  %v1236_v51 = vshrl.u32 %v1232_v32, 16  ;;  %v1244_v57 = vsel %vm1243_vm9, 1, %v8557_v0 }
 0x118   : > { %v1216_v10 = vshrl.u32 %v1211_v42, 16  ;;  %v1246_v29 = vadd.s32 %v1244_v57, %v1242_v36  ;;  %vm1629_vm10 = vcmp.gt.s32.totalorder %v1628_v38, 0  ;;  %v5555_v56 = vshrl.u32 %v2944_v47, %v2960_v59 }
 0x119   : > { %v1225_v53 = vadd.s32 %v1224_v33, %v1214_v5  ;;  %v1630_v52 = vsel %vm1629_vm10, %v1628_v38, 0  ;;  %v5558_v34 = vmul.f32 %v5483_v16, %v469_v15  ;;  %v1238_v1 = vshrl.u32 %v1233_v11, 16 }
 0x11a   : > { %v1247_v14 = vadd.s32 %v1246_v29, %v1236_v51  ;;  %v1632_v32 = vand.u32 31, %v1630_v52  ;;  %v5562_v58 = vadd.s32 127, %v2964_v26  ;;  %v5566_v42 = vadd.s32 %v5405_v17, %v5403_v28 }
 0x11b   : > { %v5560_v40 = vadd.s32 %v1225_v53, %v1216_v10  ;;  %v1195_v6 = vsel %vm1189_vm2, %v1192_v20, %v1194_v43  ;;  %v5570_v47 = vadd.s32 %v1241_v31, %v1237_v37  ;;  %vm4592_vm11 = vcmp.lt.s32.totalorder %v4591_v41, 0 }
 0x11c   : > { %v1248_v59 = vadd.s32 %v1247_v14, %v1238_v1  ;;  %v1626_v49 = vor.u32 8388608, %v1625_v46  ;;  %v1633_v48 = vsub.s32 32, %v1632_v32  ;;  %v1635_v11 = vshll.u32 %v8559_v35, %v1632_v32 }
 0x11d   : > { %vm1251_vm14 = vc.u32 %v5560_v40, %v5570_v47  ;;  %v8665_v26 = vmov 2475754826   ;;  %v8666_v2 = vmov 2131351028   ;;  %v5577_v17 = vshrl.u32 %v1630_v52, 5 }
 0x11e   : > { %v1638_v36 = vshll.u32 %v8665_v26, %v1632_v32  ;;  %v1641_v5 = vshll.u32 %v8666_v2, %v1632_v32  ;;  %v1252_v28 = vadd.s32 1, %v1248_v59  ;;  %v1636_v30 = vshrl.u32 %v8665_v26, %v1633_v48 }
 0x11f   : > { %v1639_v37 = vshrl.u32 %v8666_v2, %v1633_v48  ;;  %v1249_v31 = vmul.u32 %v5492_v63, %v1195_v6  ;;  %v8667_v20 = vmov 2102212464   ;;  %v8668_v38 = vmov 920167782  }
 0x120   : > { %v1642_v46 = vshrl.u32 %v8667_v20, %v1633_v48  ;;  %v1644_v33 = vshll.u32 %v8667_v20, %v1632_v32  ;;  %v1645_v15 = vshrl.u32 %v8668_v38, %v1633_v48  ;;  %v1253_v43 = vsel %vm1251_vm14, %v1252_v28, %v1248_v59 }
 0x121   : > { %v1637_v51 = vor.u32 %v1636_v30, %v1635_v11  ;;  %v1640_v57 = vor.u32 %v1639_v37, %v1638_v36  ;;  %v5585_v10 = vshll.u32 %v1626_v49, 8  ;;  %v5588_v53 = vsel %vm4592_vm11, 0, %v4591_v41 }
 0x122   : > { %v1254_v29 = vadd.s32 %v1253_v43, %v1249_v31  ;;  %v1643_v52 = vor.u32 %v1642_v46, %v1641_v5  ;;  %v1646_v1 = vor.u32 %v1645_v15, %v1644_v33  ;;  %v1647_v14 = vshll.u32 %v8668_v38, %v1632_v32 }
 0x123   : > { %v8669_v63 = vmov 1326507024   ;;  %vm1650_vm15 = vcmp.lt.s32.totalorder %v5577_v17, 1  ;;  %v1313_v39 = vand.u32 2139095040, %v5558_v34  ;;  %vm1651_vm0 = vcmp.lt.s32.totalorder %v5577_v17, 2 }
 0x124   : > { %v1648_v6 = vshrl.u32 %v8669_v63, %v1633_v48  ;;  %v1255_v0 = vadd.s32 536870912, %v1254_v29  ;;  %vm1652_vm1 = vcmp.lt.s32.totalorder %v5577_v17, 3  ;;  %vm1653_vm2 = vcmp.lt.s32.totalorder %v5577_v17, 4 }
 0x125   : > { %v1574_v41 = vsub.s32 32, %v5588_v53  ;;  %v1658_v49 = vsel %vm1650_vm15, %v1637_v51, %v1640_v57  ;;  %v1659_v32 = vsel %vm1653_vm2, %v1646_v1, 920167782  ;;  %v1578_v11 = vsub.s32 4294967266, %v5588_v53 }
 0x126   : > { %v1649_v59 = vor.u32 %v1648_v6, %v1647_v14  ;;  %v5603_v36 = vshrl.u32 %v1255_v0, 30  ;;  %v1660_v5 = vsel %vm1652_vm1, %v1643_v52, %v1659_v32  ;;  %v1662_v28 = vsel %vm1650_vm15, %v1640_v57, %v1643_v52 }
 0x127   : > { %v1634_v30 = vshrl.u32 %v8559_v35, %v1633_v48  ;;  %v1661_v37 = vsel %vm1651_vm0, %v1658_v49, %v1660_v5  ;;  %v1314_v46 = vshrl.u32 %v1313_v39, 23  ;;  %v1667_v6 = vand.u32 65535, %v5585_v10 }
 0x128   : > { %v1663_v31 = vsel %vm1653_vm2, %v1649_v59, 1326507024  ;;  %v1257_v33 = vshll.u32 %v5603_v36, 30  ;;  %v1691_v15 = vand.u32 65535, %v1661_v37  ;;  %v1692_v43 = vshrl.u32 %v1661_v37, 16 }
 0x129   : > { %v1664_v0 = vsel %vm1652_vm1, %v1646_v1, %v1663_v31  ;;  %v1668_v48 = vshrl.u32 %v5585_v10, 16  ;;  %v4587_v32 = vadd.s32 4294967169, %v1314_v46  ;;  %v2966_v49 = vshll.u32 %v5562_v58, 23 }
 0x12a   : > { %v1665_v14 = vsel %vm1651_vm0, %v1662_v28, %v1664_v0  ;;  %v1655_v39 = vsel %vm1653_vm2, %v1643_v52, 2102212464  ;;  %v1575_v1 = vshll.u32 %v5488_v21, %v5588_v53  ;;  %v5626_v31 = vsub.s32 %v1254_v29, %v1257_v33 }
 0x12b   : > { %v1669_v59 = vand.u32 65535, %v1665_v14  ;;  %v1670_v5 = vshrl.u32 %v1665_v14, 16  ;;  %v1694_v37 = vmul.u32 %v1692_v43, %v1667_v6  ;;  %v1695_v35 = vmul.u32 %v1691_v15, %v1668_v48 }
 0x12c   : > { %v1576_v28 = vshrl.u32 %v5566_v42, %v1574_v41  ;;  %v1579_v0 = vadd.s32 127, %v1578_v11  ;;  %v1654_v46 = vsel %vm1650_vm15, %v1634_v30, %v1637_v51  ;;  %v1656_v58 = vsel %vm1652_vm1, %v1640_v57, %v1655_v39 }
 0x12d   : > { %v1672_v3 = vmul.u32 %v1670_v5, %v1667_v6  ;;  %v1673_v52 = vmul.u32 %v1669_v59, %v1668_v48  ;;  %v1697_v44 = vshll.u32 %v1694_v37, 16  ;;  %v1320_v14 = vadd.s32 1, %v4587_v32 }
 0x12e   : > { %v1671_v60 = vmul.u32 %v1669_v59, %v1667_v6  ;;  %v1693_v21 = vmul.u32 %v1691_v15, %v1667_v6  ;;  %v1696_v53 = vmul.u32 %v1692_v43, %v1668_v48  ;;  %vm1259_vm3 = vcmp.lt.s32.totalorder %v5626_v31, 0 }
 0x12f   : > { %v1675_v24 = vshll.u32 %v1672_v3, 16  ;;  %v1674_v29 = vmul.u32 %v1670_v5, %v1668_v48  ;;  %v1677_v33 = vshll.u32 %v1673_v52, 16  ;;  %v1699_v42 = vshll.u32 %v1695_v35, 16 }
 0x130   : > { %vm1701_vm7 = vc.u32 %v1693_v21, %v1697_v44  ;;  %v1703_v51 = vadd.s32 %v1697_v44, %v1693_v21  ;;  %v1260_v11 = vsub.s32 0, %v5626_v31  ;;  %v8670_v30 = vmov 0  }
 0x131   : > { %vm1679_vm6 = vc.u32 %v1671_v60, %v1675_v24  ;;  %v1681_v41 = vadd.s32 %v1675_v24, %v1671_v60  ;;  %v1702_v39 = vsel %vm1701_vm7, 1, %v8670_v30  ;;  %vm1321_vm8 = vcmp.gt.s32.totalorder %v1320_v14, 0 }
 0x132   : > { %v1680_v57 = vsel %vm1679_vm6, 1, %v8670_v30  ;;  %v1704_v15 = vadd.s32 %v1702_v39, %v1696_v53  ;;  %vm1705_vm10 = vc.u32 %v1703_v51, %v1699_v42  ;;  %v1580_v43 = vshll.u32 %v1579_v0, 23 }
 0x133   : > { %v1682_v32 = vadd.s32 %v1680_v57, %v1674_v29  ;;  %vm1683_vm9 = vc.u32 %v1681_v41, %v1677_v33  ;;  %v1698_v48 = vshrl.u32 %v1694_v37, 16  ;;  %v1706_v59 = vsel %vm1705_vm10, 1, %v8670_v30 }
 0x134   : > { %v1684_v6 = vsel %vm1683_vm9, 1, %v8670_v30  ;;  %v1676_v24 = vshrl.u32 %v1672_v3, 16  ;;  %v1708_v44 = vadd.s32 %v1706_v59, %v1704_v15  ;;  %v1322_v5 = vsel %vm1321_vm8, %v1320_v14, 0 }
 0x135   : > { %v1686_v60 = vadd.s32 %v1684_v6, %v1682_v32  ;;  %v1261_v21 = vsel %vm1259_vm3, %v1260_v11, %v5626_v31  ;;  %v1657_v29 = vsel %vm1651_vm0, %v1654_v46, %v1656_v58  ;;  %v1678_v33 = vshrl.u32 %v1673_v52, 16 }
 0x136   : > { %v8567_v53 = vand.u32 2147483647, %v5558_v34  ;;  %v1700_v41 = vshrl.u32 %v1695_v35, 16  ;;  %v1709_v57 = vadd.s32 %v1708_v44, %v1698_v48  ;;  %v1324_v37 = vand.u32 31, %v1322_v5 }
 0x137   : > { %v1687_v0 = vadd.s32 %v1686_v60, %v1676_v24  ;;  %v2506_v39 = vand.u32 2147483647, %v5528_v55  ;;  %v8671_v3 = vshll.u32 %v5390_v25, %v5525_v23  ;;  %v5652_v32 = vor.u32 4788187, %v2966_v49 }
 0x138   : > { %v1577_v11 = vor.u32 %v1576_v28, %v1575_v1  ;;  %v5656_v46 = vadd.s32 %v1703_v51, %v1699_v42  ;;  %v1710_v58 = vadd.s32 %v1709_v57, %v1700_v41  ;;  %v5658_v52 = vsub.s32 32, %v1324_v37 }
 0x139   : > { %v5650_v14 = vor.u32 %v5555_v56, %v8671_v3  ;;  %v5654_v17 = vadd.s32 %v1687_v0, %v1678_v33  ;;  %v1581_v35 = vor.u32 4788187, %v1580_v43  ;;  %v1262_v15 = vclz %v1261_v21 }
 0x13a   : > { %v1711_v55 = vmul.u32 %v5585_v10, %v1657_v29  ;;  %v1317_v25 = vand.u32 8388607, %v8567_v53  ;;  %v1714_v23 = vadd.s32 1, %v1710_v58  ;;  %v5665_v56 = vshrl.u32 %v1322_v5, 5  ;;  %v454_v53 = vpop.permute.xlu2 %453 }
 0x13b   : > { %vm1713_vm11 = vc.u32 %v5654_v17, %v5656_v46  ;;  %v8672_v49 = vmov 683565275   ;;  %v1328_v28 = vshrl.u32 %v8665_v26, %v5658_v52  ;;  %v1330_v42 = vshll.u32 %v8665_v26, %v1324_v37 }
 0x13c   : > { %v1327_v1 = vshll.u32 %v8672_v49, %v1324_v37  ;;  %v1331_v51 = vshrl.u32 %v8666_v2, %v5658_v52  ;;  %v1333_v10 = vshll.u32 %v8666_v2, %v1324_v37  ;;  %v1715_v43 = vsel %vm1713_vm11, %v1714_v23, %v1710_v58 }
 0x13d   : > { %v1334_v6 = vshrl.u32 %v8667_v20, %v5658_v52  ;;  %v1336_v48 = vshll.u32 %v8667_v20, %v1324_v37  ;;  %v1337_v59 = vshrl.u32 %v8668_v38, %v5658_v52  ;;  %v1716_v24 = vadd.s32 %v1715_v43, %v1711_v55 }
 0x13e   : > { %v1318_v60 = vor.u32 8388608, %v1317_v25  ;;  %v5679_v44 = vor.u32 %v1328_v28, %v1327_v1  ;;  %v5681_v5 = vor.u32 %v1331_v51, %v1330_v42  ;;  %v1339_v33 = vshll.u32 %v8668_v38, %v1324_v37 }
 0x13f   : > { %v1335_v21 = vor.u32 %v1334_v6, %v1333_v10  ;;  %v1338_v29 = vor.u32 %v1337_v59, %v1336_v48  ;;  %v1340_v0 = vshrl.u32 %v8669_v63, %v5658_v52  ;;  %v1582_v41 = vand.u32 2147483647, %v1581_v35 }
 0x140   : > { %v1584_v57 = vcvt.s32.f32 %v1577_v11  ;;  %v1717_v3 = vadd.s32 536870912, %v1716_v24  ;;  %vm1342_vm14 = vcmp.lt.s32.totalorder %v5665_v56, 1  ;;  %v4585_v58 = vadd.s32 4294967294, %v1262_v15 }
 0x141   : > { %v1341_v23 = vor.u32 %v1340_v0, %v1339_v33  ;;  %vm1345_vm15 = vcmp.lt.s32.totalorder %v5665_v56, 4  ;;  %v1350_v55 = vsel %vm1342_vm14, %v5679_v44, %v5681_v5  ;;  %vm1344_vm0 = vcmp.lt.s32.totalorder %v5665_v56, 3 }
 0x142   : > { %v5692_v25 = vshrl.u32 %v1717_v3, 30  ;;  %v1351_v37 = vsel %vm1345_vm15, %v1338_v29, 920167782  ;;  %v5697_v11 = vshll.u32 %v1318_v60, 8  ;;  %vm1343_vm1 = vcmp.lt.s32.totalorder %v5665_v56, 2 }
 0x143   : > { %v1352_v35 = vsel %vm1344_vm0, %v1335_v21, %v1351_v37  ;;  %v1354_v15 = vsel %vm1342_vm14, %v5681_v5, %v1335_v21  ;;  %v1355_v1 = vsel %vm1345_vm15, %v1341_v23, 1326507024  ;;  %v8674_v28 = vcvt.s32.f32 %v5498_v54 }
 0x144   : > { %8673 = vst [vmem:[#allocation19_spill] sm:$0xff] %v5692_v25  ;;  %v1719_v51 = vshll.u32 %v5692_v25, 30  ;;  %v1353_v10 = vsel %vm1343_vm1, %v1350_v55, %v1352_v35  ;;  %v1356_v43 = vsel %vm1344_vm0, %v1338_v29, %v1355_v1  ;;  %v2968_v6 = vand.u32 2147483647, %v5652_v32 }
 0x145   : > { %v5709_v42 = vmul.f32 %v8674_v28, %v2506_v39  ;;  %v5717_v48 = vmul.f32 %v1584_v57, %v1582_v41  ;;  %vm4586_vm2 = vcmp.lt.s32.totalorder %v4585_v58, 0  ;;  %v1357_v59 = vsel %vm1343_vm1, %v1354_v15, %v1356_v43 }
 0x146   : > { %v5721_v60 = vsub.s32 %v1716_v24, %v1719_v51  ;;  %v1359_v54 = vand.u32 65535, %v5697_v11  ;;  %v1361_v39 = vand.u32 65535, %v1357_v59  ;;  %v1362_v33 = vshrl.u32 %v1357_v59, 16 }
 0x147   : > { %v2970_v0 = vcvt.s32.f32 %v5650_v14  ;;  %v1360_v3 = vshrl.u32 %v5697_v11, 16  ;;  %v1383_v23 = vand.u32 65535, %v1353_v10  ;;  %v1384_v29 = vshrl.u32 %v1353_v10, 16 }
 0x148   : > { %v5726_v55 = vsel %vm4586_vm2, 0, %v4585_v58  ;;  %vm1721_vm3 = vcmp.lt.s32.totalorder %v5721_v60, 0  ;;  %v1722_v32 = vsub.s32 0, %v5721_v60  ;;  %v1364_v41 = vmul.u32 %v1362_v33, %v1359_v54 }
 0x149   : > { %v2510_v24 = vxor.u32 2147483648, %v5709_v42  ;;  %v5731_v57 = vmul.f32 %v2970_v0, %v2968_v6  ;;  %v1365_v37 = vmul.u32 %v1361_v39, %v1360_v3  ;;  %v1386_v35 = vmul.u32 %v1384_v29, %v1359_v54 }
 0x14a   : > { %v1586_v15 = vxor.u32 2147483648, %v5717_v48  ;;  %v1363_v14 = vmul.u32 %v1361_v39, %v1359_v54  ;;  %v1367_v1 = vshll.u32 %v1364_v41, 16  ;;  %v1387_v28 = vmul.u32 %v1383_v23, %v1360_v3 }
 0x14b   : > { %v1270_v51 = vsub.s32 4294967266, %v5726_v55  ;;  %v1723_v58 = vsel %vm1721_vm3, %v1722_v32, %v5721_v60  ;;  %v1366_v10 = vmul.u32 %v1362_v33, %v1360_v3  ;;  %v1385_v43 = vmul.u32 %v1383_v23, %v1359_v54 }
 0x14c   : > { %vm8593_vm6 = vcmp.lt.s32.totalorder %v5061_v45, 0  ;;  %vm8611_vm7 = vcmp.lt.s32.totalorder %v5196_v9, 0  ;;  %v1369_v59 = vshll.u32 %v1365_v37, 16  ;;  %vm1371_vm8 = vc.u32 %v1363_v14, %v1367_v1 }
 0x14d   : > { %v1373_v6 = vadd.s32 %v1367_v1, %v1363_v14  ;;  %v1389_v0 = vshll.u32 %v1386_v35, 16  ;;  %v1347_v39 = vsel %vm1345_vm15, %v1335_v21, 2102212464  ;;  %v1372_v4 = vsel %vm1371_vm8, 1, %v8670_v30 }
 0x14e   : > { %v1388_v27 = vmul.u32 %v1384_v29, %v1360_v3  ;;  %v1391_v13 = vshll.u32 %v1387_v28, 16  ;;  %v1374_v62 = vadd.s32 %v1372_v4, %v1366_v10  ;;  %v8675_v33 = vand.u32 2147483647, %v5061_v45 }
 0x14f   : > { %vm1375_vm9 = vc.u32 %v1373_v6, %v1369_v59  ;;  %vm1393_vm10 = vc.u32 %v1385_v43, %v1389_v0  ;;  %v1395_v54 = vadd.s32 %v1389_v0, %v1385_v43  ;;  %v8676_v23 = vmov 0 }
 0x150   : > { %vm5743_vm11 = vcmp.le.f32.partialorder %v8675_v33, 0.7853982  ;;  %v1724_v32 = vclz %v1723_v58  ;;  %v1376_v14 = vsel %vm1375_vm9, 1, %v8670_v30  ;;  %v1394_v1 = vsel %vm1393_vm10, 1, %v8670_v30 }
 0x151   : > { %v8677_v23 = vsel %vm5743_vm11, 4294967295, %v8676_v23  ;;  %v5750_v21 = vmul.f32 %v5483_v16, %v454_v53  ;;  %v8680_v3 = vand.u32 2147483647, %v5196_v9  ;;  %v8681_v4 = vmov 0 }
 0x152   : > { %8678 = vst [vmem:[#allocation20_spill] sm:$0xff] %v8677_v23  ;;  %v1368_v29 = vshrl.u32 %v1364_v41, 16  ;;  %v1378_v10 = vadd.s32 %v1376_v14, %v1374_v62  ;;  %v1396_v43 = vadd.s32 %v1394_v1, %v1388_v27  ;;  %vm1397_vm2 = vc.u32 %v1395_v54, %v1391_v13 }
 0x153   : > { %8679 = vst [vmem:[#allocation21_spill] sm:$0xff] %v5750_v21  ;;  %vm5754_vm15 = vcmp.le.f32.partialorder %v8680_v3, 0.7853982  ;;  %v1266_v59 = vsub.s32 32, %v5726_v55  ;;  %v1271_v58 = vadd.s32 127, %v1270_v51  ;;  %v1326_v6 = vshrl.u32 %v8672_v49, %v5658_v52 }
 0x154   : > { %v8682_v4 = vsel %vm5754_vm15, 4294967295, %v8681_v4  ;;  %v1398_v0 = vsel %vm1397_vm2, 1, %v8670_v30  ;;  %vm8580_vm3 = vcmp.lt.s32.totalorder %v5177_v8, 0  ;;  %v1370_v53 = vshrl.u32 %v1365_v37, 16 }
 0x155   : > { %8683 = vst [vmem:[#allocation22_spill] sm:$0xff] %v8682_v4  ;;  %v1379_v33 = vadd.s32 %v1378_v10, %v1368_v29  ;;  %v1390_v3 = vshrl.u32 %v1386_v35, 16  ;;  %v1400_v18 = vadd.s32 %v1398_v0, %v1396_v43  ;;  %v4594_v19 = vadd.s32 4294967294, %v1724_v32  ;;  %v499_v29 = vpop.permute.xlu1 %498 }
 0x156   : > { %v1346_v27 = vsel %vm1342_vm14, %v1326_v6, %v5679_v44  ;;  %v1348_v62 = vsel %vm1344_vm0, %v5681_v5, %v1347_v39  ;;  %v851_v41 = vand.u32 2139095040, %v5750_v21  ;;  %v1250_v52 = vadd.s32 %v5570_v47, %v5560_v40 }
 0x157   : > { %v5772_v51 = vadd.s32 %v1379_v33, %v1370_v53  ;;  %v1392_v37 = vshrl.u32 %v1387_v28, 16  ;;  %v1401_v14 = vadd.s32 %v1400_v18, %v1390_v3  ;;  %v2511_v35 = vsel %vm8593_vm6, %v2510_v24, %v5709_v42 }
 0x158   : > { %v1587_v44 = vsel %vm8611_vm7, %v1586_v15, %v5717_v48  ;;  %v5780_v32 = vadd.s32 %v1395_v54, %v1391_v13  ;;  %v852_v5 = vshrl.u32 %v851_v41, 23  ;;  %v1268_v39 = vshrl.u32 %v1250_v52, %v1266_v59 }
 0x159   : > { %v1272_v1 = vshll.u32 %v1271_v58, 23  ;;  %v1349_v40 = vsel %vm1343_vm1, %v1346_v27, %v1348_v62  ;;  %v1402_v47 = vadd.s32 %v1401_v14, %v1392_v37  ;;  %v2972_v18 = vxor.u32 2147483648, %v5731_v57 }
 0x15a   : > { %vm4595_vm14 = vcmp.lt.s32.totalorder %v4594_v19, 0  ;;  %vm1405_vm0 = vc.u32 %v5772_v51, %v5780_v32  ;;  %v4578_v42 = vadd.s32 4294967169, %v852_v5  ;;  %v5790_v13 = vsel %vm5743_vm11, %v5061_v45, %v2511_v35 }
 0x15b   : > { %8684 = vst [vmem:[#allocation23_spill] sm:$0xff] %v5790_v13  ;;  %v1267_v48 = vshll.u32 %v5626_v31, %v5726_v55  ;;  %v1406_v24 = vadd.s32 1, %v1402_v47  ;;  %v8577_v56 = vand.u32 2147483647, %v5750_v21  ;;  %v5798_v15 = vsel %vm5754_vm15, %v5196_v9, %v1587_v44 }
 0x15c   : > { %8685 = vst [vmem:[#allocation24_spill] sm:$0xff] %v5798_v15  ;;  %v1403_v28 = vmul.u32 %v5697_v11, %v1349_v40  ;;  %v858_v54 = vadd.s32 1, %v4578_v42  ;;  %v5802_v10 = vmul.f32 %v5483_v16, %v499_v29  ;;  %v5806_v59 = vor.u32 4788187, %v1272_v1 }
 0x15d   : > { %v5804_v43 = vor.u32 %v1268_v39, %v1267_v48  ;;  %v1727_v58 = vsel %vm4595_vm14, 0, %v4594_v19  ;;  %v1407_v31 = vsel %vm1405_vm0, %v1406_v24, %v1402_v47  ;;  %v5810_v55 = vmul.f32 %v5790_v13, %v5790_v13 }
 0x15e   : > { %8686 = vst [vmem:[#allocation25_spill] sm:$0xff] %v5802_v10  ;;  %v5815_v6 = vsel %vm8580_vm3, %v2972_v18, %v5731_v57  ;;  %v1408_v11 = vadd.s32 %v1407_v31, %v1403_v28  ;;  %vm859_vm1 = vcmp.gt.s32.totalorder %v858_v54, 0  ;;  %v5819_v0 = vmul.f32 %v5798_v15, %v5798_v15 }
 0x15f   : > { %8687 = vst [vmem:[#allocation26_spill] sm:$0xff] %v5810_v55  ;;  %v1712_v53 = vadd.s32 %v5656_v46, %v5654_v17  ;;  %v855_v19 = vand.u32 8388607, %v8577_v56  ;;  %v860_v33 = vsel %vm859_vm1, %v858_v54, 0  ;;  %v1728_v3 = vsub.s32 32, %v1727_v58 }
 0x160   : > { %8688 = vst [vmem:[#allocation27_spill] sm:$0xff] %v5815_v6  ;;  %v1409_v27 = vadd.s32 536870912, %v1408_v11  ;;  %v862_v62 = vand.u32 31, %v860_v33  ;;  %v2237_v41 = vand.u32 2139095040, %v5802_v10  ;;  %v1274_v57 = vand.u32 2147483647, %v5806_v59 }
 0x161   : > { %v1276_v52 = vcvt.s32.f32 %v5804_v43  ;;  %v1729_v37 = vshll.u32 %v5721_v60, %v1727_v58  ;;  %v1732_v14 = vsub.s32 4294967266, %v1727_v58  ;;  %v5831_v44 = vshrl.u32 %v860_v33, 5 }
 0x162   : > { %v5829_v35 = vshrl.u32 %v1409_v27, 30  ;;  %v5833_v17 = vsub.s32 32, %v862_v62  ;;  %v865_v46 = vshll.u32 %v8672_v49, %v862_v62  ;;  %v856_v5 = vor.u32 8388608, %v855_v19 }
 0x163   : > { %v868_v39 = vshll.u32 %v8665_v26, %v862_v62  ;;  %v871_v1 = vshll.u32 %v8666_v2, %v862_v62  ;;  %v874_v40 = vshll.u32 %v8667_v20, %v862_v62  ;;  %v1730_v47 = vshrl.u32 %v1712_v53, %v1728_v3 }
 0x164   : > { %v1411_v29 = vshll.u32 %v5829_v35, 30  ;;  %v866_v60 = vshrl.u32 %v8665_v26, %v5833_v17  ;;  %v2238_v18 = vshrl.u32 %v2237_v41, 23  ;;  %v869_v42 = vshrl.u32 %v8666_v2, %v5833_v17 }
 0x165   : > { %v872_v48 = vshrl.u32 %v8667_v20, %v5833_v17  ;;  %v875_v24 = vshrl.u32 %v8668_v38, %v5833_v17  ;;  %v877_v28 = vshll.u32 %v8668_v38, %v862_v62  ;;  %v878_v59 = vshrl.u32 %v8669_v63, %v5833_v17 }
 0x166   : > { %v5849_v54 = vsub.s32 %v1408_v11, %v1411_v29  ;;  %v5851_v43 = vor.u32 %v866_v60, %v865_v46  ;;  %vm880_vm8 = vcmp.lt.s32.totalorder %v5831_v44, 1  ;;  %v5856_v58 = vor.u32 %v869_v42, %v868_v39 }
 0x167   : > { %v873_v31 = vor.u32 %v872_v48, %v871_v1  ;;  %v876_v53 = vor.u32 %v875_v24, %v874_v40  ;;  %v5858_v19 = vshll.u32 %v856_v5, 8  ;;  %v1733_v33 = vadd.s32 127, %v1732_v14 }
 0x168   : > { %v879_v3 = vor.u32 %v878_v59, %v877_v28  ;;  %vm881_vm9 = vcmp.lt.s32.totalorder %v5831_v44, 2  ;;  %vm882_vm10 = vcmp.lt.s32.totalorder %v5831_v44, 3  ;;  %v1414_v11 = vsub.s32 0, %v5849_v54 }
 0x169   : > { %vm883_vm2 = vcmp.lt.s32.totalorder %v5831_v44, 4  ;;  %v888_v27 = vsel %vm880_vm8, %v5851_v43, %v5856_v58  ;;  %v892_v62 = vsel %vm880_vm8, %v5856_v58, %v873_v31  ;;  %vm1413_vm14 = vcmp.lt.s32.totalorder %v5849_v54, 0 }
 0x16a   : > { %v889_v41 = vsel %vm883_vm2, %v876_v53, 920167782  ;;  %v893_v14 = vsel %vm883_vm2, %v879_v3, 1326507024  ;;  %v4605_v46 = vadd.s32 4294967169, %v2238_v18  ;;  %v897_v1 = vand.u32 65535, %v5858_v19  ;;  %v494_v18 = vpop.permute.xlu0 %493 }
 0x16b   : > { %v890_v5 = vsel %vm882_vm10, %v873_v31, %v889_v41  ;;  %v894_v39 = vsel %vm882_vm10, %v876_v53, %v893_v14  ;;  %v898_v40 = vshrl.u32 %v5858_v19, 16  ;;  %v5882_v29 = vor.u32 %v1730_v47, %v1729_v37 }
 0x16c   : > { %v1734_v60 = vshll.u32 %v1733_v33, 23  ;;  %v891_v42 = vsel %vm881_vm9, %v888_v27, %v890_v5  ;;  %v895_v48 = vsel %vm881_vm9, %v892_v62, %v894_v39  ;;  %v1415_v24 = vsel %vm1413_vm14, %v1414_v11, %v5849_v54 }
 0x16d   : > { %v899_v28 = vand.u32 65535, %v895_v48  ;;  %v900_v59 = vshrl.u32 %v895_v48, 16  ;;  %v8578_v53 = vand.u32 2147483647, %v5802_v10  ;;  %v5890_v3 = vmul.f32 %v1276_v52, %v1274_v57 }
 0x16e   : > { %v921_v41 = vand.u32 65535, %v891_v42  ;;  %v922_v14 = vshrl.u32 %v891_v42, 16  ;;  %v2244_v37 = vadd.s32 1, %v4605_v46  ;;  %v5893_v27 = vmul.f32 %v5483_v16, %v494_v18 }
 0x16f   : > { %v901_v47 = vmul.u32 %v899_v28, %v897_v1  ;;  %v902_v33 = vmul.u32 %v900_v59, %v897_v1  ;;  %v903_v56 = vmul.u32 %v899_v28, %v898_v40  ;;  %v5895_v5 = vor.u32 4788187, %v1734_v60 }
 0x170   : > { %8689 = vst [vmem:[#allocation28_spill] sm:$0xff] %v5893_v27  ;;  %v5899_v11 = vadd.s32 %v5780_v32, %v5772_v51  ;;  %v1416_v62 = vclz %v1415_v24  ;;  %v924_v39 = vmul.u32 %v922_v14, %v897_v1  ;;  %v904_v52 = vmul.u32 %v900_v59, %v898_v40 }
 0x171   : > { %v905_v48 = vshll.u32 %v902_v33, 16  ;;  %v5904_v46 = vand.u32 8388607, %v8578_v53  ;;  %v907_v42 = vshll.u32 %v903_v56, 16  ;;  %v923_v28 = vmul.u32 %v921_v41, %v897_v1 }
 0x172   : > { %v925_v16 = vmul.u32 %v921_v41, %v898_v40  ;;  %vm2245_vm0 = vcmp.gt.s32.totalorder %v2244_v37, 0  ;;  %v864_v60 = vshrl.u32 %v8672_v49, %v5833_v17  ;;  %v885_v51 = vsel %vm883_vm2, %v873_v31, 2102212464 }
 0x173   : > { %vm909_vm1 = vc.u32 %v901_v47, %v905_v48  ;;  %v911_v32 = vadd.s32 %v905_v48, %v901_v47  ;;  %v4588_v18 = vadd.s32 4294967294, %v1416_v62  ;;  %v926_v59 = vmul.u32 %v922_v14, %v898_v40 }
 0x174   : > { %v910_v24 = vsel %vm909_vm1, 1, %v8670_v30  ;;  %v927_v57 = vshll.u32 %v924_v39, 16  ;;  %v906_v6 = vshrl.u32 %v902_v33, 16  ;;  %v2246_v13 = vsel %vm2245_vm0, %v2244_v37, 0 }
 0x175   : > { %v912_v53 = vadd.s32 %v910_v24, %v904_v52  ;;  %vm913_vm14 = vc.u32 %v911_v32, %v907_v42  ;;  %v929_v41 = vshll.u32 %v925_v16, 16  ;;  %v2083_v17 = vand.u32 2139095040, %v5893_v27 }
 0x176   : > { %v914_v1 = vsel %vm913_vm14, 1, %v8670_v30  ;;  %vm931_vm3 = vc.u32 %v923_v28, %v927_v57  ;;  %v884_v31 = vsel %vm880_vm8, %v864_v60, %v5851_v43  ;;  %v886_v47 = vsel %vm882_vm10, %v5856_v58, %v885_v51 }
 0x177   : > { %v916_v40 = vadd.s32 %v914_v1, %v912_v53  ;;  %v932_v14 = vsel %vm931_vm3, 1, %v8670_v30  ;;  %vm4589_vm2 = vcmp.lt.s32.totalorder %v4588_v18, 0  ;;  %v933_v33 = vadd.s32 %v927_v57, %v923_v28 }
 0x178   : > { %v934_v37 = vadd.s32 %v932_v14, %v926_v59  ;;  %v2248_v62 = vand.u32 31, %v2246_v13  ;;  %v908_v48 = vshrl.u32 %v903_v56, 16  ;;  %v928_v24 = vshrl.u32 %v924_v39, 16 }
 0x179   : > { %v917_v42 = vadd.s32 %v916_v40, %v906_v6  ;;  %vm935_vm0 = vc.u32 %v933_v33, %v929_v41  ;;  %v2242_v43 = vor.u32 8388608, %v5904_v46  ;;  %v5923_v8 = vsel %vm4589_vm2, 0, %v4588_v18 }
 0x17a   : > { %v2249_v60 = vsub.s32 32, %v2248_v62  ;;  %v887_v58 = vsel %vm881_vm9, %v884_v31, %v886_v47  ;;  %v936_v53 = vsel %vm935_vm0, 1, %v8670_v30  ;;  %v2084_v57 = vshrl.u32 %v2083_v17, 23 }
 0x17b   : > { %v930_v28 = vshrl.u32 %v925_v16, 16  ;;  %v938_v51 = vadd.s32 %v936_v53, %v934_v37  ;;  %v5930_v59 = vadd.s32 %v917_v42, %v908_v48  ;;  %v5932_v39 = vadd.s32 %v933_v33, %v929_v41 }
 0x17c   : > { %v2252_v56 = vshrl.u32 %v8665_v26, %v2249_v60  ;;  %v2255_v6 = vshrl.u32 %v8666_v2, %v2249_v60  ;;  %v2251_v46 = vshll.u32 %v8672_v49, %v2248_v62  ;;  %v2254_v18 = vshll.u32 %v8665_v26, %v2248_v62 }
 0x17d   : > { %v939_v1 = vadd.s32 %v938_v51, %v928_v24  ;;  %v5936_v44 = vshrl.u32 %v2246_v13, 5  ;;  %v2257_v31 = vshll.u32 %v8666_v2, %v2248_v62  ;;  %v2258_v16 = vshrl.u32 %v8667_v20, %v2249_v60 }
 0x17e   : > { %v2253_v17 = vor.u32 %v2252_v56, %v2251_v46  ;;  %v2256_v47 = vor.u32 %v2255_v6, %v2254_v18  ;;  %v2260_v40 = vshll.u32 %v8667_v20, %v2248_v62  ;;  %v2261_v14 = vshrl.u32 %v8668_v38, %v2249_v60 }
 0x17f   : > { %v940_v37 = vadd.s32 %v939_v1, %v930_v28  ;;  %v2259_v41 = vor.u32 %v2258_v16, %v2257_v31  ;;  %v2263_v33 = vshll.u32 %v8668_v38, %v2248_v62  ;;  %v2264_v48 = vshrl.u32 %v8669_v63, %v2249_v60 }
 0x180   : > { %v941_v42 = vmul.u32 %v5858_v19, %v887_v58  ;;  %vm943_vm3 = vc.u32 %v5930_v59, %v5932_v39  ;;  %v2262_v13 = vor.u32 %v2261_v14, %v2260_v40  ;;  %v5947_v24 = vshll.u32 %v2242_v43, 8 }
 0x181   : > { %v944_v53 = vadd.s32 1, %v940_v37  ;;  %v2265_v51 = vor.u32 %v2264_v48, %v2263_v33  ;;  %vm2266_vm8 = vcmp.lt.s32.totalorder %v5936_v44, 1  ;;  %vm2269_vm9 = vcmp.lt.s32.totalorder %v5936_v44, 4 }
 0x182   : > { %v1424_v28 = vsub.s32 4294967266, %v5923_v8  ;;  %vm2268_vm10 = vcmp.lt.s32.totalorder %v5936_v44, 3  ;;  %v2274_v62 = vsel %vm2266_vm8, %v2253_v17, %v2256_v47  ;;  %v2275_v19 = vsel %vm2269_vm9, %v2262_v13, 920167782 }
 0x183   : > { %v945_v58 = vsel %vm943_vm3, %v944_v53, %v940_v37  ;;  %vm2267_vm1 = vcmp.lt.s32.totalorder %v5936_v44, 2  ;;  %v2276_v43 = vsel %vm2268_vm10, %v2259_v41, %v2275_v19  ;;  %v2278_v56 = vsel %vm2266_vm8, %v2256_v47, %v2259_v41 }
 0x184   : > { %v946_v6 = vadd.s32 %v945_v58, %v941_v42  ;;  %v2277_v46 = vsel %vm2267_vm1, %v2274_v62, %v2276_v43  ;;  %v2279_v18 = vsel %vm2269_vm9, %v2265_v51, 1326507024  ;;  %v2283_v1 = vand.u32 65535, %v5947_v24 }
 0x185   : > { %v2280_v31 = vsel %vm2268_vm10, %v2262_v13, %v2279_v18  ;;  %v2284_v16 = vshrl.u32 %v5947_v24, 16  ;;  %v2307_v40 = vand.u32 65535, %v2277_v46  ;;  %v2308_v14 = vshrl.u32 %v2277_v46, 16 }
 0x186   : > { %v947_v37 = vadd.s32 536870912, %v946_v6  ;;  %v2250_v33 = vshrl.u32 %v8672_v49, %v2249_v60  ;;  %v2271_v48 = vsel %vm2269_vm9, %v2259_v41, 2102212464  ;;  %v2281_v42 = vsel %vm2267_vm1, %v2278_v56, %v2280_v31 }
 0x187   : > { %v1420_v53 = vsub.s32 32, %v5923_v8  ;;  %v2285_v51 = vand.u32 65535, %v2281_v42  ;;  %v2286_v62 = vshrl.u32 %v2281_v42, 16  ;;  %v2310_v19 = vmul.u32 %v2308_v14, %v2283_v1 }
 0x188   : > { %v5976_v58 = vadd.s32 127, %v1424_v28  ;;  %v5978_v13 = vshrl.u32 %v947_v37, 30  ;;  %v2270_v43 = vsel %vm2266_vm8, %v2250_v33, %v2253_v17  ;;  %v2311_v46 = vmul.u32 %v2307_v40, %v2284_v16 }
 0x189   : > { %v2272_v60 = vsel %vm2268_vm10, %v2256_v47, %v2271_v48  ;;  %v2288_v41 = vmul.u32 %v2286_v62, %v2283_v1  ;;  %v2289_v18 = vmul.u32 %v2285_v51, %v2284_v16  ;;  %v4602_v52 = vadd.s32 4294967169, %v2084_v57 }
 0x18a   : > { %8690 = vst [vmem:[#allocation29_spill] sm:$0xff] %v5978_v13  ;;  %v949_v56 = vshll.u32 %v5978_v13, 30  ;;  %v2309_v31 = vmul.u32 %v2307_v40, %v2283_v1  ;;  %v2312_v32 = vmul.u32 %v2308_v14, %v2284_v16  ;;  %v2313_v42 = vshll.u32 %v2310_v19, 16 }
 0x18b   : > { %v2287_v23 = vmul.u32 %v2285_v51, %v2283_v1  ;;  %v2290_v28 = vmul.u32 %v2286_v62, %v2284_v16  ;;  %v2291_v45 = vshll.u32 %v2288_v41, 16  ;;  %v2315_v37 = vshll.u32 %v2311_v46, 16 }
 0x18c   : > { %v5985_v55 = vsub.s32 %v946_v6, %v949_v56  ;;  %v2293_v7 = vshll.u32 %v2289_v18, 16  ;;  %vm2317_vm14 = vc.u32 %v2309_v31, %v2313_v42  ;;  %v2319_v17 = vadd.s32 %v2313_v42, %v2309_v31 }
 0x18d   : > { %vm2295_vm2 = vc.u32 %v2287_v23, %v2291_v45  ;;  %v2297_v33 = vadd.s32 %v2291_v45, %v2287_v23  ;;  %v2318_v47 = vsel %vm2317_vm14, 1, %v8670_v30  ;;  %v2090_v48 = vadd.s32 1, %v4602_v52 }
 0x18e   : > { %vm951_vm0 = vcmp.lt.s32.totalorder %v5985_v55, 0  ;;  %v952_v57 = vsub.s32 0, %v5985_v55  ;;  %v2296_v40 = vsel %vm2295_vm2, 1, %v8670_v30  ;;  %v2320_v1 = vadd.s32 %v2318_v47, %v2312_v32 }
 0x18f   : > { %v2298_v16 = vadd.s32 %v2296_v40, %v2290_v28  ;;  %vm2299_vm3 = vc.u32 %v2297_v33, %v2293_v7  ;;  %v2314_v14 = vshrl.u32 %v2310_v19, 16  ;;  %vm2321_vm8 = vc.u32 %v2319_v17, %v2315_v37 }
 0x190   : > { %v953_v6 = vsel %vm951_vm0, %v952_v57, %v5985_v55  ;;  %v2300_v51 = vsel %vm2299_vm3, 1, %v8670_v30  ;;  %v2322_v45 = vsel %vm2321_vm8, 1, %v8670_v30  ;;  %vm2091_vm9 = vcmp.gt.s32.totalorder %v2090_v48, 0 }
 0x191   : > { %v2292_v23 = vshrl.u32 %v2288_v41, 16  ;;  %v2302_v52 = vadd.s32 %v2300_v51, %v2298_v16  ;;  %v2324_v62 = vadd.s32 %v2322_v45, %v2320_v1  ;;  %v2092_v56 = vsel %vm2091_vm9, %v2090_v48, 0 }
 0x192   : > { %vm8613_vm10 = vcmp.lt.s32.totalorder %v5376_v50, 0  ;;  %v2273_v32 = vsel %vm2267_vm1, %v2270_v43, %v2272_v60  ;;  %v2294_v31 = vshrl.u32 %v2289_v18, 16  ;;  %v8691_v7 = vand.u32 2147483647, %v5893_v27 }
 0x193   : > { %v2094_v42 = vand.u32 31, %v2092_v56  ;;  %v954_v28 = vclz %v953_v6  ;;  %v2303_v33 = vadd.s32 %v2302_v52, %v2292_v23  ;;  %v2316_v47 = vshrl.u32 %v2311_v46, 16 }
 0x194   : > { %v2087_v19 = vand.u32 8388607, %v8691_v7  ;;  %v2325_v57 = vadd.s32 %v2324_v62, %v2314_v14  ;;  %v1278_v40 = vxor.u32 2147483648, %v5890_v3  ;;  %v8692_v41 = vand.u32 2147483647, %v5895_v5 }
 0x195   : > { %v8693_v48 = vcvt.s32.f32 %v5882_v29  ;;  %v1421_v44 = vshll.u32 %v5849_v54, %v5923_v8  ;;  %v6006_v43 = vsub.s32 32, %v2094_v42  ;;  %v1422_v60 = vshrl.u32 %v5899_v11, %v1420_v53 }
 0x196   : > { %v1426_v18 = vshll.u32 %v5976_v58, 23  ;;  %v6010_v16 = vadd.s32 %v2303_v33, %v2294_v31  ;;  %v2326_v46 = vadd.s32 %v2325_v57, %v2316_v47  ;;  %v8694_v14 = vand.u32 2147483647, %v5376_v50 }
 0x197   : > { %v1739_v1 = vmul.f32 %v8693_v48, %v8692_v41  ;;  %v6018_v29 = vadd.s32 %v2319_v17, %v2315_v37  ;;  %v2327_v5 = vmul.u32 %v5947_v24, %v2273_v32  ;;  %v2098_v8 = vshrl.u32 %v8665_v26, %v6006_v43 }
 0x198   : > { %vm6014_vm1 = vcmp.le.f32.partialorder %v8694_v14, 0.7853982  ;;  %v2101_v54 = vshrl.u32 %v8666_v2, %v6006_v43  ;;  %v4579_v11 = vadd.s32 4294967294, %v954_v28  ;;  %v2088_v53 = vor.u32 8388608, %v2087_v19 }
 0x199   : > { %v6025_v58 = vshrl.u32 %v2092_v56, 5  ;;  %v2097_v51 = vshll.u32 %v8672_v49, %v2094_v42  ;;  %vm8601_vm14 = vcmp.lt.s32.totalorder %v5486_v22, 0  ;;  %vm2329_vm2 = vc.u32 %v6010_v16, %v6018_v29 }
 0x19a   : > { %v2330_v37 = vadd.s32 1, %v2326_v46  ;;  %v2100_v24 = vshll.u32 %v8665_v26, %v2094_v42  ;;  %v2103_v17 = vshll.u32 %v8666_v2, %v2094_v42  ;;  %v2104_v23 = vshrl.u32 %v8667_v20, %v6006_v43 }
 0x19b   : > { %v6033_v45 = vor.u32 %v2098_v8, %v2097_v51  ;;  %v2106_v52 = vshll.u32 %v8667_v20, %v2094_v42  ;;  %v2107_v62 = vshrl.u32 %v8668_v38, %v6006_v43  ;;  %v2109_v31 = vshll.u32 %v8668_v38, %v2094_v42 }
 0x19c   : > { %v2331_v56 = vsel %vm2329_vm2, %v2330_v37, %v2326_v46  ;;  %v6040_v32 = vor.u32 %v2101_v54, %v2100_v24  ;;  %v2110_v7 = vshrl.u32 %v8669_v63, %v6006_v43  ;;  %v1279_v19 = vsel %vm8613_vm10, %v1278_v40, %v5890_v3 }
 0x19d   : > { %v1740_v28 = vxor.u32 2147483648, %v1739_v1  ;;  %v2332_v33 = vadd.s32 %v2331_v56, %v2327_v5  ;;  %v6048_v47 = vor.u32 %v2104_v23, %v2103_v17  ;;  %v1423_v57 = vor.u32 %v1422_v60, %v1421_v44 }
 0x19e   : > { %v1427_v41 = vor.u32 4788187, %v1426_v18  ;;  %v2108_v48 = vor.u32 %v2107_v62, %v2106_v52  ;;  %v2111_v14 = vor.u32 %v2110_v7, %v2109_v31  ;;  %vm2112_vm0 = vcmp.lt.s32.totalorder %v6025_v58, 1  ;;  %v514_v31 = vpop.permute.xlu1 %513 }
 0x19f   : > { %v2333_v46 = vadd.s32 536870912, %v2332_v33  ;;  %vm2115_vm3 = vcmp.lt.s32.totalorder %v6025_v58, 4  ;;  %v6052_v42 = vshll.u32 %v2088_v53, 8  ;;  %vm4580_vm8 = vcmp.lt.s32.totalorder %v4579_v11, 0 }
 0x1a0   : > { %vm2114_vm9 = vcmp.lt.s32.totalorder %v6025_v58, 3  ;;  %v2120_v3 = vsel %vm2112_vm0, %v6033_v45, %v6040_v32  ;;  %v2121_v40 = vsel %vm2115_vm3, %v2108_v48, 920167782  ;;  %v6064_v44 = vsel %vm6014_vm1, %v5376_v50, %v1279_v19 }
 0x1a1   : > { %v6066_v60 = vshrl.u32 %v2333_v46, 30  ;;  %vm2113_vm2 = vcmp.lt.s32.totalorder %v6025_v58, 2  ;;  %v2122_v18 = vsel %vm2114_vm9, %v6048_v47, %v2121_v40  ;;  %v1428_v5 = vand.u32 2147483647, %v1427_v41 }
 0x1a2   : > { %v2123_v8 = vsel %vm2113_vm2, %v2120_v3, %v2122_v18  ;;  %v2124_v54 = vsel %vm2112_vm0, %v6040_v32, %v6048_v47  ;;  %v2125_v53 = vsel %vm2115_vm3, %v2111_v14, 1326507024  ;;  %v6082_v51 = vsel %vm8601_vm14, %v1740_v28, %v1739_v1 }
 0x1a3   : > { %8697 = vst [vmem:[#allocation30_spill] sm:$0xff] %v6066_v60  ;;  %v6084_v37 = vsel %vm4580_vm8, 0, %v4579_v11  ;;  %v2335_v24 = vshll.u32 %v6066_v60, 30  ;;  %v2126_v17 = vsel %vm2114_vm9, %v2108_v48, %v2125_v53  ;;  %v1430_v23 = vcvt.s32.f32 %v1423_v57 }
 0x1a4   : > { %v2127_v52 = vsel %vm2113_vm2, %v2124_v54, %v2126_v17  ;;  %v2129_v62 = vand.u32 65535, %v6052_v42  ;;  %v2154_v56 = vshrl.u32 %v2123_v8, 16  ;;  %v2153_v28 = vand.u32 65535, %v2123_v8 }
 0x1a5   : > { %v6092_v7 = vsub.s32 %v2332_v33, %v2335_v24  ;;  %v2131_v19 = vand.u32 65535, %v2127_v52  ;;  %v2132_v1 = vshrl.u32 %v2127_v52, 16  ;;  %v6094_v11 = vmul.f32 %v1430_v23, %v1428_v5  ;;  %v6105_v33 = vld [vmem:[%s8535_s2] ss:$0 sm:$0xff] }
 0x1a6   : > { %v962_v41 = vsub.s32 4294967266, %v6084_v37  ;;  %v2130_v14 = vshrl.u32 %v6052_v42, 16  ;;  %v2156_v48 = vmul.u32 %v2154_v56, %v2129_v62  ;;  %v942_v57 = vadd.s32 %v5932_v39, %v5930_v59 }
 0x1a7   : > { %vm2337_vm8 = vcmp.lt.s32.totalorder %v6092_v7, 0  ;;  %v2338_v46 = vsub.s32 0, %v6092_v7  ;;  %v6108_v3 = vmul.f32 %v6105_v33, %v514_v31  ;;  %v958_v40 = vsub.s32 32, %v6084_v37 }
 0x1a8   : > { %v2096_v18 = vshrl.u32 %v8672_v49, %v6006_v43  ;;  %v2134_v5 = vmul.u32 %v2132_v1, %v2129_v62  ;;  %v2135_v8 = vmul.u32 %v2131_v19, %v2130_v14  ;;  %v2155_v39 = vmul.u32 %v2153_v28, %v2129_v62 }
 0x1a9   : > { %v2339_v59 = vsel %vm2337_vm8, %v2338_v46, %v6092_v7  ;;  %v2157_v54 = vmul.u32 %v2153_v28, %v2130_v14  ;;  %v2159_v53 = vshll.u32 %v2156_v48, 16  ;;  %v963_v24 = vadd.s32 127, %v962_v41 }
 0x1aa   : > { %v2340_v17 = vclz %v2339_v59  ;;  %v2133_v23 = vmul.u32 %v2131_v19, %v2129_v62  ;;  %v2137_v52 = vshll.u32 %v2134_v5, 16  ;;  %v2136_v60 = vmul.u32 %v2132_v1, %v2130_v14 }
 0x1ab   : > { %v2139_v13 = vshll.u32 %v2135_v8, 16  ;;  %v2158_v31 = vmul.u32 %v2154_v56, %v2130_v14  ;;  %vm2163_vm6 = vc.u32 %v2155_v39, %v2159_v53  ;;  %v959_v4 = vshll.u32 %v5985_v55, %v6084_v37 }
 0x1ac   : > { %v4606_v61 = vadd.s32 4294967294, %v2340_v17  ;;  %vm2141_vm5 = vc.u32 %v2133_v23, %v2137_v52  ;;  %v2143_v15 = vadd.s32 %v2137_v52, %v2133_v23  ;;  %v2164_v43 = vsel %vm2163_vm6, 1, %v8670_v30 }
 0x1ad   : > { %v2142_v46 = vsel %vm2141_vm5, 1, %v8670_v30  ;;  %v2161_v28 = vshll.u32 %v2157_v54, 16  ;;  %v2165_v25 = vadd.s32 %v2159_v53, %v2155_v39  ;;  %v8698_v41 = vand.u32 2147483647, %v5486_v22 }
 0x1ae   : > { %v8699_v62 = vmov 0  ;;  %vm4607_vm4 = vcmp.lt.s32.totalorder %v4606_v61, 0  ;;  %v2144_v56 = vadd.s32 %v2142_v46, %v2136_v60  ;;  %vm2145_vm14 = vc.u32 %v2143_v15, %v2139_v13 }
 0x1af   : > { %vm6120_vm8 = vcmp.le.f32.partialorder %v8698_v41, 0.7853982  ;;  %v2166_v19 = vadd.s32 %v2164_v43, %v2158_v31  ;;  %v960_v1 = vshrl.u32 %v942_v57, %v958_v40  ;;  %v2343_v14 = vsel %vm4607_vm4, 0, %v4606_v61 }
 0x1b0   : > { %v8700_v62 = vsel %vm6120_vm8, 4294967295, %v8699_v62  ;;  %v2146_v59 = vsel %vm2145_vm14, 1, %v8670_v30  ;;  %vm2167_vm6 = vc.u32 %v2165_v25, %v2161_v28  ;;  %v964_v55 = vshll.u32 %v963_v24, 23  ;;  %v509_v24 = vpop.permute.xlu0 %508 }
 0x1b1   : > { %8701 = vst [vmem:[#allocation31_spill] sm:$0xff] %v8700_v62  ;;  %v2117_v37 = vsel %vm2115_vm3, %v6048_v47, 2102212464  ;;  %v2138_v39 = vshrl.u32 %v2134_v5, 16  ;;  %v2148_v53 = vadd.s32 %v2146_v59, %v2144_v56  ;;  %v2348_v17 = vsub.s32 4294967266, %v2343_v14 }
 0x1b2   : > { %v2160_v23 = vshrl.u32 %v2156_v48, 16  ;;  %v2168_v52 = vsel %vm2167_vm6, 1, %v8670_v30  ;;  %v2699_v60 = vand.u32 2139095040, %v6108_v3  ;;  %v2140_v15 = vshrl.u32 %v2135_v8, 16 }
 0x1b3   : > { %v2149_v13 = vadd.s32 %v2148_v53, %v2138_v39  ;;  %v2170_v57 = vadd.s32 %v2168_v52, %v2166_v19  ;;  %v8603_v61 = vand.u32 2147483647, %v6108_v3  ;;  %vm8612_vm4 = vcmp.lt.s32.totalorder %v5558_v34, 0 }
 0x1b4   : > { %v961_v40 = vor.u32 %v960_v1, %v959_v4  ;;  %v2116_v47 = vsel %vm2112_vm0, %v2096_v18, %v6033_v45  ;;  %v2118_v48 = vsel %vm2114_vm9, %v6040_v32, %v2117_v37  ;;  %v2700_v5 = vshrl.u32 %v2699_v60, 23 }
 0x1b5   : > { %v965_v31 = vor.u32 4788187, %v964_v55  ;;  %v6138_v43 = vadd.s32 %v2149_v13, %v2140_v15  ;;  %v2162_v8 = vshrl.u32 %v2157_v54, 16  ;;  %v2171_v46 = vadd.s32 %v2170_v57, %v2160_v23 }
 0x1b6   : > { %v2344_v41 = vsub.s32 32, %v2343_v14  ;;  %v2349_v56 = vadd.s32 127, %v2348_v17  ;;  %v6140_v19 = vadd.s32 %v2165_v25, %v2161_v28  ;;  %v4614_v4 = vadd.s32 4294967169, %v2700_v5 }
 0x1b7   : > { %v2119_v1 = vsel %vm2113_vm2, %v2116_v47, %v2118_v48  ;;  %v2172_v45 = vadd.s32 %v2171_v46, %v2162_v8  ;;  %v2703_v18 = vand.u32 8388607, %v8603_v61  ;;  %v6147_v32 = vmul.f32 %v6105_v33, %v509_v24 }
 0x1b8   : > { %v6153_v54 = vsel %vm6120_vm8, %v5486_v22, %v6082_v51  ;;  %v2328_v25 = vadd.s32 %v6018_v29, %v6010_v16  ;;  %vm2175_vm5 = vc.u32 %v6138_v43, %v6140_v19  ;;  %v2706_v58 = vadd.s32 1, %v4614_v4 }
 0x1b9   : > { %8702 = vst [vmem:[#allocation32_spill] sm:$0xff] %v6147_v32  ;;  %v1432_v28 = vxor.u32 2147483648, %v6094_v11  ;;  %v966_v59 = vand.u32 2147483647, %v965_v31  ;;  %v968_v55 = vcvt.s32.f32 %v961_v40  ;;  %v2176_v37 = vadd.s32 1, %v2172_v45 }
 0x1ba   : > { %8703 = vst [vmem:[#allocation33_spill] sm:$0xff] %v6153_v54  ;;  %v2346_v39 = vshrl.u32 %v2328_v25, %v2344_v41  ;;  %v2350_v53 = vshll.u32 %v2349_v56, 23  ;;  %v2173_v17 = vmul.u32 %v6052_v42, %v2119_v1  ;;  %vm2707_vm14 = vcmp.gt.s32.totalorder %v2706_v58, 0 }
 0x1bb   : > { %v2177_v23 = vsel %vm2175_vm5, %v2176_v37, %v2172_v45  ;;  %v2704_v51 = vor.u32 8388608, %v2703_v18  ;;  %v2708_v52 = vsel %vm2707_vm14, %v2706_v58, 0  ;;  %v2545_v60 = vand.u32 2139095040, %v6147_v32 }
 0x1bc   : > { %v6164_v16 = vmul.f32 %v6064_v44, %v6064_v44  ;;  %v2345_v29 = vshll.u32 %v6092_v7, %v2343_v14  ;;  %v2178_v15 = vadd.s32 %v2177_v23, %v2173_v17  ;;  %v2710_v13 = vand.u32 31, %v2708_v52 }
 0x1bd   : > { %v6169_v57 = vmul.f32 %v6153_v54, %v6153_v54  ;;  %v6174_v42 = vsel %vm8612_vm4, %v1432_v28, %v6094_v11  ;;  %v6176_v40 = vmul.f32 %v968_v55, %v966_v59  ;;  %v8602_v47 = vand.u32 2147483647, %v6147_v32 }
 0x1be   : > { %v6179_v48 = vor.u32 %v2346_v39, %v2345_v29  ;;  %v6181_v5 = vor.u32 4788187, %v2350_v53  ;;  %v2179_v7 = vadd.s32 536870912, %v2178_v15  ;;  %v2711_v14 = vsub.s32 32, %v2710_v13 }
 0x1bf   : > { %8704 = vst [vmem:[#allocation34_spill] sm:$0xff] %v6169_v57  ;;  %v6183_v24 = vshrl.u32 %v2708_v52, 5  ;;  %v2713_v31 = vshll.u32 %v8672_v49, %v2710_v13  ;;  %v6186_v8 = vshll.u32 %v2704_v51, 8  ;;  %v2546_v46 = vshrl.u32 %v2545_v60, 23 }
 0x1c0   : > { %v6188_v41 = vshrl.u32 %v2179_v7, 30  ;;  %v2714_v11 = vshrl.u32 %v8665_v26, %v2711_v14  ;;  %v2716_v56 = vshll.u32 %v8665_v26, %v2710_v13  ;;  %v2719_v4 = vshll.u32 %v8666_v2, %v2710_v13 }
 0x1c1   : > { %v2717_v1 = vshrl.u32 %v8666_v2, %v2711_v14  ;;  %v2720_v45 = vshrl.u32 %v8667_v20, %v2711_v14  ;;  %v2722_v18 = vshll.u32 %v8667_v20, %v2710_v13  ;;  %v2723_v25 = vshrl.u32 %v8668_v38, %v2711_v14 }
 0x1c2   : > { %8705 = vst [vmem:[#allocation35_spill] sm:$0xff] %v6188_v41  ;;  %v2181_v58 = vshll.u32 %v6188_v41, 30  ;;  %v2715_v28 = vor.u32 %v2714_v11, %v2713_v31  ;;  %v2725_v59 = vshll.u32 %v8668_v38, %v2710_v13  ;;  %v2726_v55 = vshrl.u32 %v8669_v63, %v2711_v14 }
 0x1c3   : > { %v2718_v37 = vor.u32 %v2717_v1, %v2716_v56  ;;  %v2721_v39 = vor.u32 %v2720_v45, %v2719_v4  ;;  %v2724_v53 = vor.u32 %v2723_v25, %v2722_v18  ;;  %v4611_v17 = vadd.s32 4294967169, %v2546_v46 }
 0x1c4   : > { %v6200_v23 = vsub.s32 %v2178_v15, %v2181_v58  ;;  %v2727_v51 = vor.u32 %v2726_v55, %v2725_v59  ;;  %vm2728_vm0 = vcmp.lt.s32.totalorder %v6183_v24, 1  ;;  %vm2731_vm3 = vcmp.lt.s32.totalorder %v6183_v24, 4 }
 0x1c5   : > { %vm2730_vm9 = vcmp.lt.s32.totalorder %v6183_v24, 3  ;;  %v2736_v60 = vsel %vm2728_vm0, %v2715_v28, %v2718_v37  ;;  %v2737_v29 = vsel %vm2731_vm3, %v2724_v53, 920167782  ;;  %vm2729_vm6 = vcmp.lt.s32.totalorder %v6183_v24, 2 }
 0x1c6   : > { %vm2183_vm2 = vcmp.lt.s32.totalorder %v6200_v23, 0  ;;  %v2184_v15 = vsub.s32 0, %v6200_v23  ;;  %v2738_v13 = vsel %vm2730_vm9, %v2721_v39, %v2737_v29  ;;  %v2740_v31 = vsel %vm2728_vm0, %v2718_v37, %v2721_v39 }
 0x1c7   : > { %v2739_v7 = vsel %vm2729_vm6, %v2736_v60, %v2738_v13  ;;  %v2741_v46 = vsel %vm2731_vm3, %v2727_v51, 1326507024  ;;  %v2745_v11 = vand.u32 65535, %v6186_v8  ;;  %v2552_v45 = vadd.s32 1, %v4611_v17 }
 0x1c8   : > { %v2185_v56 = vsel %vm2183_vm2, %v2184_v15, %v6200_v23  ;;  %v2742_v4 = vsel %vm2730_vm9, %v2724_v53, %v2741_v46  ;;  %v2770_v1 = vshrl.u32 %v2739_v7, 16  ;;  %v2174_v18 = vadd.s32 %v6140_v19, %v6138_v43 }
 0x1c9   : > { %v2186_v25 = vclz %v2185_v56  ;;  %v2743_v58 = vsel %vm2729_vm6, %v2740_v31, %v2742_v4  ;;  %v2769_v59 = vand.u32 65535, %v2739_v7  ;;  %v2746_v55 = vshrl.u32 %v6186_v8, 16 }
 0x1ca   : > { %v2747_v51 = vand.u32 65535, %v2743_v58  ;;  %v2748_v60 = vshrl.u32 %v2743_v58, 16  ;;  %v2772_v29 = vmul.u32 %v2770_v1, %v2745_v11  ;;  %v2712_v53 = vshrl.u32 %v8672_v49, %v2711_v14 }
 0x1cb   : > { %v4603_v13 = vadd.s32 4294967294, %v2186_v25  ;;  %v6234_v17 = vand.u32 8388607, %v8602_v47  ;;  %v2733_v43 = vsel %vm2731_vm3, %v2721_v39, 2102212464  ;;  %vm2553_vm5 = vcmp.gt.s32.totalorder %v2552_v45, 0 }
 0x1cc   : > { %v2750_v19 = vmul.u32 %v2748_v60, %v2745_v11  ;;  %v2751_v31 = vmul.u32 %v2747_v51, %v2746_v55  ;;  %v2732_v7 = vsel %vm2728_vm0, %v2712_v53, %v2715_v28  ;;  %v2773_v46 = vmul.u32 %v2769_v59, %v2746_v55 }
 0x1cd   : > { %vm4604_vm14 = vcmp.lt.s32.totalorder %v4603_v13, 0  ;;  %v2775_v56 = vshll.u32 %v2772_v29, 16  ;;  %v2749_v25 = vmul.u32 %v2747_v51, %v2745_v11  ;;  %v2771_v58 = vmul.u32 %v2769_v59, %v2745_v11 }
 0x1ce   : > { %v6240_v4 = vsel %vm4604_vm14, 0, %v4603_v13  ;;  %v2753_v14 = vshll.u32 %v2750_v19, 16  ;;  %v2734_v47 = vsel %vm2730_vm9, %v2718_v37, %v2733_v43  ;;  %v2752_v61 = vmul.u32 %v2748_v60, %v2746_v55 }
 0x1cf   : > { %v2774_v52 = vmul.u32 %v2770_v1, %v2746_v55  ;;  %v2554_v39 = vsel %vm2553_vm5, %v2552_v45, 0  ;;  %v2755_v15 = vshll.u32 %v2751_v31, 16  ;;  %vm2779_vm2 = vc.u32 %v2771_v58, %v2775_v56 }
 0x1d0   : > { %vm2757_vm3 = vc.u32 %v2749_v25, %v2753_v14  ;;  %v2759_v41 = vadd.s32 %v2753_v14, %v2749_v25  ;;  %v2194_v32 = vsub.s32 4294967266, %v6240_v4  ;;  %v2777_v53 = vshll.u32 %v2773_v46, 16 }
 0x1d1   : > { %v2758_v28 = vsel %vm2757_vm3, 1, %v8670_v30  ;;  %v2780_v13 = vsel %vm2779_vm2, 1, %v8670_v30  ;;  %v2781_v11 = vadd.s32 %v2775_v56, %v2771_v58  ;;  %v2190_v37 = vsub.s32 32, %v6240_v4 }
 0x1d2   : > { %v2760_v51 = vadd.s32 %v2758_v28, %v2752_v61  ;;  %vm2761_vm0 = vc.u32 %v2759_v41, %v2755_v15  ;;  %v2782_v59 = vadd.s32 %v2780_v13, %v2774_v52  ;;  %v2735_v1 = vsel %vm2729_vm6, %v2732_v7, %v2734_v47 }
 0x1d3   : > { %v2762_v45 = vsel %vm2761_vm0, 1, %v8670_v30  ;;  %v2550_v55 = vor.u32 8388608, %v6234_v17  ;;  %v2754_v60 = vshrl.u32 %v2750_v19, 16  ;;  %vm2783_vm9 = vc.u32 %v2781_v11, %v2777_v53 }
 0x1d4   : > { %v2764_v43 = vadd.s32 %v2762_v45, %v2760_v51  ;;  %v2556_v25 = vand.u32 31, %v2554_v39  ;;  %v2191_v14 = vshll.u32 %v6200_v23, %v6240_v4  ;;  %v2756_v61 = vshrl.u32 %v2751_v31, 16 }
 0x1d5   : > { %v2776_v41 = vshrl.u32 %v2772_v29, 16  ;;  %v2784_v52 = vsel %vm2783_vm9, 1, %v8670_v30  ;;  %v2195_v15 = vadd.s32 127, %v2194_v32  ;;  %v2192_v47 = vshrl.u32 %v2174_v18, %v2190_v37 }
 0x1d6   : > { %v2765_v56 = vadd.s32 %v2764_v43, %v2754_v60  ;;  %v2786_v58 = vadd.s32 %v2784_v52, %v2782_v59  ;;  %v6255_v24 = vsub.s32 32, %v2556_v25  ;;  %v2778_v7 = vshrl.u32 %v2773_v46, 16 }
 0x1d7   : > { %v6257_v28 = vadd.s32 %v2781_v11, %v2777_v53  ;;  %v2559_v17 = vshll.u32 %v8672_v49, %v2556_v25  ;;  %v2562_v29 = vshll.u32 %v8665_v26, %v2556_v25  ;;  %v2565_v31 = vshll.u32 %v8666_v2, %v2556_v25 }
 0x1d8   : > { %v6260_v19 = vadd.s32 %v2765_v56, %v2756_v61  ;;  %v2787_v13 = vadd.s32 %v2786_v58, %v2776_v41  ;;  %v2560_v23 = vshrl.u32 %v8665_v26, %v6255_v24  ;;  %v2563_v32 = vshrl.u32 %v8666_v2, %v6255_v24 }
 0x1d9   : > { %v2566_v18 = vshrl.u32 %v8667_v20, %v6255_v24  ;;  %v2569_v46 = vshrl.u32 %v8668_v38, %v6255_v24  ;;  %v2196_v4 = vshll.u32 %v2195_v15, 23  ;;  %v6272_v51 = vshrl.u32 %v2554_v39, 5 }
 0x1da   : > { %v2788_v53 = vadd.s32 %v2787_v13, %v2778_v7  ;;  %v2568_v11 = vshll.u32 %v8667_v20, %v2556_v25  ;;  %v8706_v59 = vand.u32 2147483647, %v5558_v34  ;;  %vm8608_vm5 = vcmp.lt.s32.totalorder %v5750_v21, 0 }
 0x1db   : > { %vm2791_vm14 = vc.u32 %v6260_v19, %v6257_v28  ;;  %v6284_v45 = vor.u32 %v2560_v23, %v2559_v17  ;;  %v6286_v60 = vor.u32 %v2563_v32, %v2562_v29  ;;  %v6288_v43 = vor.u32 %v2566_v18, %v2565_v31 }
 0x1dc   : > { %vm6277_vm6 = vcmp.le.f32.partialorder %v8706_v59, 0.7853982  ;;  %v2792_v39 = vadd.s32 1, %v2788_v53  ;;  %v2570_v61 = vor.u32 %v2569_v46, %v2568_v11  ;;  %v2571_v41 = vshll.u32 %v8668_v38, %v2556_v25 }
 0x1dd   : > { %v2572_v52 = vshrl.u32 %v8669_v63, %v6255_v24  ;;  %v970_v15 = vxor.u32 2147483648, %v6176_v40  ;;  %v8709_v56 = vand.u32 2147483647, %v6181_v5  ;;  %v8710_v58 = vcvt.s32.f32 %v6179_v48 }
 0x1de   : > { %v2789_v17 = vmul.u32 %v6186_v8, %v2735_v1  ;;  %v6301_v13 = vshll.u32 %v2550_v55, 8  ;;  %v6303_v23 = vor.u32 %v2192_v47, %v2191_v14  ;;  %v2793_v29 = vsel %vm2791_vm14, %v2792_v39, %v2788_v53 }
 0x1df   : > { %v6298_v7 = vmul.f32 %v8710_v58, %v8709_v56  ;;  %v2573_v32 = vor.u32 %v2572_v52, %v2571_v41  ;;  %vm2574_vm3 = vcmp.lt.s32.totalorder %v6272_v51, 1  ;;  %v6306_v25 = vor.u32 4788187, %v2196_v4 }
 0x1e0   : > { %v2794_v31 = vadd.s32 %v2793_v29, %v2789_v17  ;;  %vm2577_vm2 = vcmp.lt.s32.totalorder %v6272_v51, 4  ;;  %v2582_v48 = vsel %vm2574_vm3, %v6284_v45, %v6286_v60  ;;  %vm2576_vm0 = vcmp.lt.s32.totalorder %v6272_v51, 3  ;;  %v449_v17 = vpop.permute.xlu1 %448 }
 0x1e1   : > { %v2583_v5 = vsel %vm2577_vm2, %v2570_v61, 920167782  ;;  %v2586_v8 = vsel %vm2574_vm3, %v6286_v60, %v6288_v43  ;;  %v2587_v1 = vsel %vm2577_vm2, %v2573_v32, 1326507024  ;;  %vm8614_vm9 = vcmp.lt.s32.totalorder %v6272_v51, 2 }
 0x1e2   : > { %v2795_v55 = vadd.s32 536870912, %v2794_v31  ;;  %v2584_v14 = vsel %vm2576_vm0, %v6288_v43, %v2583_v5  ;;  %v2588_v47 = vsel %vm2576_vm0, %v2570_v61, %v2587_v1  ;;  %v2591_v4 = vand.u32 65535, %v6301_v13 }
 0x1e3   : > { %v2585_v18 = vsel %vm8614_vm9, %v2582_v48, %v2584_v14  ;;  %v2589_v46 = vsel %vm8614_vm9, %v2586_v8, %v2588_v47  ;;  %v2592_v53 = vshrl.u32 %v6301_v13, 16  ;;  %v6340_v61 = vsel %vm6277_vm6, %v5558_v34, %v6174_v42 }
 0x1e4   : > { %v6334_v11 = vshrl.u32 %v2795_v55, 30  ;;  %v2593_v59 = vand.u32 65535, %v2589_v46  ;;  %v2594_v39 = vshrl.u32 %v2589_v46, 16  ;;  %v2615_v41 = vand.u32 65535, %v2585_v18 }
 0x1e5   : > { %v6345_v52 = vsel %vm8608_vm5, %v970_v15, %v6176_v40  ;;  %v2616_v58 = vshrl.u32 %v2585_v18, 16  ;;  %v2200_v29 = vcvt.s32.f32 %v6303_v23  ;;  %v2198_v8 = vand.u32 2147483647, %v6306_v25 }
 0x1e6   : > { %8711 = vst [vmem:[#allocation36_spill] sm:$0xff] %v6334_v11  ;;  %v2797_v32 = vshll.u32 %v6334_v11, 30  ;;  %v2596_v48 = vmul.u32 %v2594_v39, %v2591_v4  ;;  %v2597_v5 = vmul.u32 %v2593_v59, %v2592_v53  ;;  %v2558_v42 = vshrl.u32 %v8672_v49, %v6255_v24 }
 0x1e7   : > { %v2618_v1 = vmul.u32 %v2616_v58, %v2591_v4  ;;  %v2619_v55 = vmul.u32 %v2615_v41, %v2592_v53  ;;  %v2595_v40 = vmul.u32 %v2593_v59, %v2591_v4  ;;  %v6356_v47 = vmul.f32 %v6105_v33, %v449_v17 }
 0x1e8   : > { %v6353_v14 = vsub.s32 %v2794_v31, %v2797_v32  ;;  %v2599_v15 = vshll.u32 %v2596_v48, 16  ;;  %v2598_v18 = vmul.u32 %v2594_v39, %v2592_v53  ;;  %v2601_v23 = vshll.u32 %v2597_v5, 16 }
 0x1e9   : > { %v2617_v46 = vmul.u32 %v2615_v41, %v2591_v4  ;;  %v2621_v56 = vshll.u32 %v2618_v1, 16  ;;  %v8712_v24 = vand.u32 2147483647, %v5750_v21  ;;  %v8713_v31 = vmov 0 }
 0x1ea   : > { %vm2799_vm14 = vcmp.lt.s32.totalorder %v6353_v14, 0  ;;  %v2800_v25 = vsub.s32 0, %v6353_v14  ;;  %vm2603_vm5 = vc.u32 %v2595_v40, %v2599_v15  ;;  %v2605_v11 = vadd.s32 %v2599_v15, %v2595_v40 }
 0x1eb   : > { %vm6362_vm7 = vcmp.le.f32.partialorder %v8712_v24, 0.7853982  ;;  %vm8628_vm4 = vcmp.lt.s32.totalorder %v5802_v10, 0  ;;  %v2604_v59 = vsel %vm2603_vm5, 1, %v8670_v30  ;;  %v2620_v39 = vmul.u32 %v2616_v58, %v2592_v53 }
 0x1ec   : > { %v8714_v31 = vsel %vm6362_vm7, 4294967295, %v8713_v31  ;;  %v2623_v17 = vshll.u32 %v2619_v55, 16  ;;  %vm2625_vm10 = vc.u32 %v2617_v46, %v2621_v56  ;;  %v2801_v4 = vsel %vm2799_vm14, %v2800_v25, %v6353_v14 }
 0x1ed   : > { %8715 = vst [vmem:[#allocation37_spill] sm:$0xff] %v8714_v31  ;;  %v2606_v41 = vadd.s32 %v2604_v59, %v2598_v18  ;;  %vm2607_vm9 = vc.u32 %v2605_v11, %v2601_v23  ;;  %v2626_v32 = vsel %vm2625_vm10, 1, %v8670_v30  ;;  %v2802_v40 = vclz %v2801_v4 }
 0x1ee   : > { %v2608_v15 = vsel %vm2607_vm9, 1, %v8670_v30  ;;  %v2627_v24 = vadd.s32 %v2621_v56, %v2617_v46  ;;  %v2628_v54 = vadd.s32 %v2626_v32, %v2620_v39  ;;  %v2579_v62 = vsel %vm2577_vm2, %v6288_v43, 2102212464 }
 0x1ef   : > { %v2600_v57 = vshrl.u32 %v2596_v48, 16  ;;  %v2610_v22 = vadd.s32 %v2608_v15, %v2606_v41  ;;  %v697_v53 = vand.u32 2139095040, %v6356_v47  ;;  %v8716_v58 = vand.u32 2147483647, %v5802_v10 }
 0x1f0   : > { %v8717_v18 = vmov 0  ;;  %v2201_v11 = vmul.f32 %v2200_v29, %v2198_v8  ;;  %v4615_v23 = vadd.s32 4294967294, %v2802_v40  ;;  %v2578_v56 = vsel %vm2574_vm3, %v2558_v42, %v6284_v45  ;;  %v444_v42 = vpop.permute.xlu0 %443 }
 0x1f1   : > { %vm6377_vm5 = vcmp.le.f32.partialorder %v8716_v58, 0.7853982  ;;  %vm2629_vm10 = vc.u32 %v2627_v24, %v2623_v17  ;;  %vm8635_vm9 = vcmp.lt.s32.totalorder %v5893_v27, 0  ;;  %v2602_v43 = vshrl.u32 %v2597_v5, 16 }
 0x1f2   : > { %v8718_v18 = vsel %vm6377_vm5, 4294967295, %v8717_v18  ;;  %v2611_v48 = vadd.s32 %v2610_v22, %v2600_v57  ;;  %v2630_v46 = vsel %vm2629_vm10, 1, %v8670_v30  ;;  %v698_v25 = vshrl.u32 %v697_v53, 23 }
 0x1f3   : > { %8719 = vst [vmem:[#allocation38_spill] sm:$0xff] %v8718_v18  ;;  %vm4616_vm2 = vcmp.lt.s32.totalorder %v4615_v23, 0  ;;  %v2580_v59 = vsel %vm2576_vm0, %v6286_v60, %v2579_v62  ;;  %v2622_v39 = vshrl.u32 %v2618_v1, 16  ;;  %v2632_v29 = vadd.s32 %v2630_v46, %v2628_v54 }
 0x1f4   : > { %v2805_v8 = vsel %vm4616_vm2, 0, %v4615_v23  ;;  %v2612_v4 = vadd.s32 %v2611_v48, %v2602_v43  ;;  %v8620_v41 = vand.u32 2147483647, %v6356_v47  ;;  %v4575_v45 = vadd.s32 4294967169, %v698_v25 }
 0x1f5   : > { %v6392_v5 = vmul.f32 %v6340_v61, %v6340_v61  ;;  %v2810_v22 = vsub.s32 4294967266, %v2805_v8  ;;  %v2624_v57 = vshrl.u32 %v2619_v55, 16  ;;  %v2633_v32 = vadd.s32 %v2632_v29, %v2622_v39 }
 0x1f6   : > { %v6398_v62 = vsel %vm6362_vm7, %v5750_v21, %v6345_v52  ;;  %v8721_v54 = vxor.u32 2147483648, %v6298_v7  ;;  %v2631_v1 = vadd.s32 %v2627_v24, %v2623_v17  ;;  %v704_v40 = vadd.s32 1, %v4575_v45 }
 0x1f7   : > { %8720 = vst [vmem:[#allocation39_spill] sm:$0xff] %v6398_v62  ;;  %v2202_v15 = vxor.u32 2147483648, %v2201_v11  ;;  %vm8722_vm3 = vcmp.lt.s32.totalorder %v6272_v51, 2  ;;  %v2634_v55 = vadd.s32 %v2633_v32, %v2624_v57  ;;  %v6408_v58 = vmul.f32 %v6105_v33, %v444_v42 }
 0x1f8   : > { %v2357_v60 = vsel %vm8628_vm4, %v8721_v54, %v6298_v7  ;;  %v2581_v53 = vsel %vm8722_vm3, %v2578_v56, %v2580_v59  ;;  %v2806_v23 = vsub.s32 32, %v2805_v8  ;;  %vm2637_vm0 = vc.u32 %v2612_v4, %v2631_v1 }
 0x1f9   : > { %v701_v52 = vand.u32 8388607, %v8620_v41  ;;  %vm705_vm14 = vcmp.gt.s32.totalorder %v704_v40, 0  ;;  %v6414_v43 = vmul.f32 %v6398_v62, %v6398_v62  ;;  %v2811_v7 = vadd.s32 127, %v2810_v22 }
 0x1fa   : > { %v2638_v17 = vadd.s32 1, %v2634_v55  ;;  %v706_v24 = vsel %vm705_vm14, %v704_v40, 0  ;;  %v6419_v51 = vsel %vm6377_vm5, %v5802_v10, %v2357_v60  ;;  %v2790_v56 = vadd.s32 %v6257_v28, %v6260_v19 }
 0x1fb   : > { %8723 = vst [vmem:[#allocation40_spill] sm:$0xff] %v6414_v43  ;;  %v2635_v48 = vmul.u32 %v6301_v13, %v2581_v53  ;;  %v708_v46 = vand.u32 31, %v706_v24  ;;  %v6426_v25 = vsel %vm8635_vm9, %v2202_v15, %v2201_v11  ;;  %v2807_v59 = vshll.u32 %v6353_v14, %v2805_v8 }
 0x1fc   : > { %8724 = vst [vmem:[#allocation41_spill] sm:$0xff] %v6419_v51  ;;  %v2639_v39 = vsel %vm2637_vm0, %v2638_v17, %v2634_v55  ;;  %v2808_v45 = vshrl.u32 %v2790_v56, %v2806_v23  ;;  %v702_v22 = vor.u32 8388608, %v701_v52  ;;  %v2812_v32 = vshll.u32 %v2811_v7, 23 }
 0x1fd   : > { %v2640_v42 = vadd.s32 %v2639_v39, %v2635_v48  ;;  %v709_v57 = vsub.s32 32, %v708_v46  ;;  %v6430_v54 = vshrl.u32 %v706_v24, 5  ;;  %v711_v28 = vshll.u32 %v8672_v49, %v708_v46 }
 0x1fe   : > { %v714_v19 = vshll.u32 %v8665_v26, %v708_v46  ;;  %v717_v14 = vshll.u32 %v8666_v2, %v708_v46  ;;  %v720_v40 = vshll.u32 %v8667_v20, %v708_v46  ;;  %v723_v7 = vshll.u32 %v8668_v38, %v708_v46 }
 0x1ff   : > { %v2641_v13 = vadd.s32 536870912, %v2640_v42  ;;  %v712_v11 = vshrl.u32 %v8665_v26, %v709_v57  ;;  %v715_v60 = vshrl.u32 %v8666_v2, %v709_v57  ;;  %v718_v8 = vshrl.u32 %v8667_v20, %v709_v57 }
 0x200   : > { %v721_v15 = vshrl.u32 %v8668_v38, %v709_v57  ;;  %v724_v53 = vshrl.u32 %v8669_v63, %v709_v57  ;;  %v6444_v17 = vadd.s32 %v2631_v1, %v2612_v4  ;;  %v543_v48 = vand.u32 2139095040, %v6408_v58 }
 0x201   : > { %v6441_v55 = vshrl.u32 %v2641_v13, 30  ;;  %v713_v23 = vor.u32 %v712_v11, %v711_v28  ;;  %v716_v52 = vor.u32 %v715_v60, %v714_v19  ;;  %v719_v24 = vor.u32 %v718_v8, %v717_v14 }
 0x202   : > { %v722_v56 = vor.u32 %v721_v15, %v720_v40  ;;  %v725_v41 = vor.u32 %v724_v53, %v723_v7  ;;  %vm726_vm10 = vcmp.lt.s32.totalorder %v6430_v54, 1  ;;  %v6449_v29 = vshll.u32 %v702_v22, 8 }
 0x203   : > { %8725 = vst [vmem:[#allocation42_spill] sm:$0xff] %v6441_v55  ;;  %v2643_v39 = vshll.u32 %v6441_v55, 30  ;;  %v2809_v18 = vor.u32 %v2808_v45, %v2807_v59  ;;  %vm729_vm2 = vcmp.lt.s32.totalorder %v6430_v54, 4  ;;  %v734_v28 = vsel %vm726_vm10, %v713_v23, %v716_v52 }
 0x204   : > { %v8726_v4 = vand.u32 2147483647, %v6408_v58  ;;  %v2813_v46 = vor.u32 4788187, %v2812_v32  ;;  %vm728_vm3 = vcmp.lt.s32.totalorder %v6430_v54, 3  ;;  %vm727_vm0 = vcmp.lt.s32.totalorder %v6430_v54, 2 }
 0x205   : > { %v6458_v19 = vsub.s32 %v2640_v42, %v2643_v39  ;;  %v735_v13 = vsel %vm729_vm2, %v722_v56, 920167782  ;;  %v738_v45 = vsel %vm726_vm10, %v716_v52, %v719_v24  ;;  %v544_v22 = vshrl.u32 %v543_v48, 23 }
 0x206   : > { %v6456_v1 = vand.u32 8388607, %v8726_v4  ;;  %v736_v59 = vsel %vm728_vm3, %v719_v24, %v735_v13  ;;  %v739_v11 = vsel %vm729_vm2, %v725_v41, 1326507024  ;;  %v743_v14 = vand.u32 65535, %v6449_v29 }
 0x207   : > { %vm2645_vm14 = vcmp.lt.s32.totalorder %v6458_v19, 0  ;;  %v2646_v32 = vsub.s32 0, %v6458_v19  ;;  %v737_v42 = vsel %vm727_vm0, %v734_v28, %v736_v59  ;;  %v740_v60 = vsel %vm728_vm3, %v722_v56, %v739_v11 }
 0x208   : > { %v767_v8 = vand.u32 65535, %v737_v42  ;;  %v768_v40 = vshrl.u32 %v737_v42, 16  ;;  %v2816_v15 = vcvt.s32.f32 %v2809_v18  ;;  %v741_v7 = vsel %vm727_vm0, %v738_v45, %v740_v60 }
 0x209   : > { %v2647_v53 = vsel %vm2645_vm14, %v2646_v32, %v6458_v19  ;;  %v744_v48 = vshrl.u32 %v6449_v29, 16  ;;  %v731_v28 = vsel %vm729_vm2, %v719_v24, 2102212464  ;;  %v745_v41 = vand.u32 65535, %v741_v7 }
 0x20a   : > { %v2648_v39 = vclz %v2647_v53  ;;  %v746_v4 = vshrl.u32 %v741_v7, 16  ;;  %v2814_v13 = vand.u32 2147483647, %v2813_v46  ;;  %v710_v56 = vshrl.u32 %v8672_v49, %v709_v57 }
 0x20b   : > { %v770_v59 = vmul.u32 %v768_v40, %v743_v14  ;;  %v4572_v11 = vadd.s32 4294967169, %v544_v22  ;;  %v749_v55 = vmul.u32 %v745_v41, %v744_v48  ;;  %v771_v32 = vmul.u32 %v767_v8, %v744_v48 }
 0x20c   : > { %v4612_v42 = vadd.s32 4294967294, %v2648_v39  ;;  %v748_v18 = vmul.u32 %v746_v4, %v743_v14  ;;  %v730_v45 = vsel %vm726_vm10, %v710_v56, %v713_v23  ;;  %v732_v60 = vsel %vm728_vm3, %v716_v52, %v731_v28 }
 0x20d   : > { %v769_v53 = vmul.u32 %v767_v8, %v743_v14  ;;  %v773_v10 = vshll.u32 %v770_v59, 16  ;;  %v747_v24 = vmul.u32 %v745_v41, %v743_v14  ;;  %v772_v46 = vmul.u32 %v768_v40, %v744_v48 }
 0x20e   : > { %vm4613_vm2 = vcmp.lt.s32.totalorder %v4612_v42, 0  ;;  %v751_v7 = vshll.u32 %v748_v18, 16  ;;  %v750_v57 = vmul.u32 %v746_v4, %v744_v48  ;;  %v550_v22 = vadd.s32 1, %v4572_v11 }
 0x20f   : > { %v6488_v62 = vsel %vm4613_vm2, 0, %v4612_v42  ;;  %vm777_vm14 = vc.u32 %v769_v53, %v773_v10  ;;  %v753_v31 = vshll.u32 %v749_v55, 16  ;;  %v775_v21 = vshll.u32 %v771_v32, 16 }
 0x210   : > { %v2656_v39 = vsub.s32 4294967266, %v6488_v62  ;;  %vm755_vm4 = vc.u32 %v747_v24, %v751_v7  ;;  %v757_v56 = vadd.s32 %v751_v7, %v747_v24  ;;  %v778_v52 = vsel %vm777_vm14, 1, %v8670_v30 }
 0x211   : > { %v756_v23 = vsel %vm755_vm4, 1, %v8670_v30  ;;  %v779_v8 = vadd.s32 %v773_v10, %v769_v53  ;;  %v2817_v28 = vmul.f32 %v2816_v15, %v2814_v13  ;;  %v733_v14 = vsel %vm727_vm0, %v730_v45, %v732_v60 }
 0x212   : > { %v758_v40 = vadd.s32 %v756_v23, %v750_v57  ;;  %v780_v41 = vadd.s32 %v778_v52, %v772_v46  ;;  %vm759_vm10 = vc.u32 %v757_v56, %v753_v31  ;;  %v774_v48 = vshrl.u32 %v770_v59, 16 }
 0x213   : > { %vm781_vm3 = vc.u32 %v779_v8, %v775_v21  ;;  %vm551_vm2 = vcmp.gt.s32.totalorder %v550_v22, 0  ;;  %v2652_v4 = vsub.s32 32, %v6488_v62  ;;  %v752_v11 = vshrl.u32 %v748_v18, 16 }
 0x214   : > { %v760_v42 = vsel %vm759_vm10, 1, %v8670_v30  ;;  %v782_v24 = vsel %vm781_vm3, 1, %v8670_v30  ;;  %v8727_v7 = vand.u32 2147483647, %v5893_v27  ;;  %v8728_v10 = vmov 0 }
 0x215   : > { %v2657_v54 = vadd.s32 127, %v2656_v39  ;;  %v762_v15 = vadd.s32 %v760_v42, %v758_v40  ;;  %v784_v13 = vadd.s32 %v782_v24, %v780_v41  ;;  %v552_v31 = vsel %vm551_vm2, %v550_v22, 0 }
 0x216   : > { %vm6500_vm4 = vcmp.le.f32.partialorder %v8727_v7, 0.7853982  ;;  %vm8633_vm0 = vcmp.lt.s32.totalorder %v6108_v3, 0  ;;  %v2818_v59 = vxor.u32 2147483648, %v2817_v28  ;;  %v787_v45 = vmul.u32 %v6449_v29, %v733_v14 }
 0x217   : > { %v8729_v10 = vsel %vm6500_vm4, 4294967295, %v8728_v10  ;;  %v548_v18 = vor.u32 8388608, %v6456_v1  ;;  %v554_v60 = vand.u32 31, %v552_v31  ;;  %v754_v53 = vshrl.u32 %v749_v55, 16 }
 0x218   : > { %8730 = vst [vmem:[#allocation43_spill] sm:$0xff] %v8729_v10  ;;  %v763_v46 = vadd.s32 %v762_v15, %v752_v11  ;;  %v776_v57 = vshrl.u32 %v771_v32, 16  ;;  %v785_v23 = vadd.s32 %v784_v13, %v774_v48  ;;  %v2653_v56 = vshll.u32 %v6458_v19, %v6488_v62 }
 0x219   : > { %v2654_v39 = vshrl.u32 %v6444_v17, %v2652_v4  ;;  %v783_v52 = vadd.s32 %v779_v8, %v775_v21  ;;  %v555_v40 = vsub.s32 32, %v554_v60  ;;  %v2658_v22 = vshll.u32 %v2657_v54, 23 }
 0x21a   : > { %v764_v41 = vadd.s32 %v763_v46, %v754_v53  ;;  %v786_v42 = vadd.s32 %v785_v23, %v776_v57  ;;  %v6510_v24 = vshrl.u32 %v552_v31, 5  ;;  %v557_v29 = vshll.u32 %v8672_v49, %v554_v60 }
 0x21b   : > { %v558_v1 = vshrl.u32 %v8665_v26, %v555_v40  ;;  %v560_v55 = vshll.u32 %v8665_v26, %v554_v60  ;;  %v561_v32 = vshrl.u32 %v8666_v2, %v555_v40  ;;  %v563_v62 = vshll.u32 %v8666_v2, %v554_v60 }
 0x21c   : > { %vm789_vm14 = vc.u32 %v764_v41, %v783_v52  ;;  %v790_v14 = vadd.s32 1, %v786_v42  ;;  %v564_v21 = vshrl.u32 %v8667_v20, %v555_v40  ;;  %v566_v8 = vshll.u32 %v8667_v20, %v554_v60 }
 0x21d   : > { %v559_v17 = vor.u32 %v558_v1, %v557_v29  ;;  %v562_v19 = vor.u32 %v561_v32, %v560_v55  ;;  %v567_v48 = vshrl.u32 %v8668_v38, %v555_v40  ;;  %v569_v7 = vshll.u32 %v8668_v38, %v554_v60 }
 0x21e   : > { %v791_v4 = vsel %vm789_vm14, %v790_v14, %v786_v42  ;;  %v565_v11 = vor.u32 %v564_v21, %v563_v62  ;;  %v570_v54 = vshrl.u32 %v8669_v63, %v555_v40  ;;  %v6524_v15 = vmul.f32 %v6419_v51, %v6419_v51 }
 0x21f   : > { %v6530_v13 = vsel %vm6500_vm4, %v5893_v27, %v6426_v25  ;;  %v792_v31 = vadd.s32 %v791_v4, %v787_v45  ;;  %v568_v53 = vor.u32 %v567_v48, %v566_v8  ;;  %v6534_v46 = vsel %vm8633_vm0, %v2818_v59, %v2817_v28  ;;  %v459_v8 = vpop.permute.xlu0 %458 }
 0x220   : > { %8731 = vst [vmem:[#allocation44_spill] sm:$0xff] %v6524_v15  ;;  %v6536_v57 = vor.u32 %v2654_v39, %v2653_v56  ;;  %v571_v60 = vor.u32 %v570_v54, %v569_v7  ;;  %v6538_v23 = vshll.u32 %v548_v18, 8  ;;  %v6540_v42 = vor.u32 4788187, %v2658_v22 }
 0x221   : > { %v793_v29 = vadd.s32 536870912, %v792_v31  ;;  %vm572_vm10 = vcmp.lt.s32.totalorder %v6510_v24, 1  ;;  %vm575_vm3 = vcmp.lt.s32.totalorder %v6510_v24, 4  ;;  %vm574_vm2 = vcmp.lt.s32.totalorder %v6510_v24, 3 }
 0x222   : > { %v580_v25 = vsel %vm572_vm10, %v559_v17, %v562_v19  ;;  %v581_v45 = vsel %vm575_vm3, %v568_v53, 920167782  ;;  %v584_v28 = vsel %vm572_vm10, %v562_v19, %v565_v11  ;;  %vm573_vm14 = vcmp.lt.s32.totalorder %v6510_v24, 2 }
 0x223   : > { %v6549_v59 = vshrl.u32 %v793_v29, 30  ;;  %v582_v18 = vsel %vm574_vm2, %v565_v11, %v581_v45  ;;  %v585_v56 = vsel %vm575_vm3, %v571_v60, 1326507024  ;;  %v556_v39 = vshrl.u32 %v8672_v49, %v555_v40 }
 0x224   : > { %v583_v22 = vsel %vm573_vm14, %v580_v25, %v582_v18  ;;  %v586_v1 = vsel %vm574_vm2, %v568_v53, %v585_v56  ;;  %v589_v55 = vand.u32 65535, %v6538_v23  ;;  %v577_v14 = vsel %vm575_vm3, %v565_v11, 2102212464 }
 0x225   : > { %v795_v32 = vshll.u32 %v6549_v59, 30  ;;  %v587_v62 = vsel %vm573_vm14, %v584_v28, %v586_v1  ;;  %v613_v21 = vand.u32 65535, %v583_v22  ;;  %v590_v48 = vshrl.u32 %v6538_v23, 16 }
 0x226   : > { %v591_v4 = vand.u32 65535, %v587_v62  ;;  %v592_v40 = vshrl.u32 %v587_v62, 16  ;;  %v614_v7 = vshrl.u32 %v583_v22, 16  ;;  %v788_v60 = vadd.s32 %v783_v52, %v764_v41 }
 0x227   : > { %v796_v29 = vsub.s32 %v792_v31, %v795_v32  ;;  %v576_v53 = vsel %vm572_vm10, %v556_v39, %v559_v17  ;;  %v578_v11 = vsel %vm574_vm2, %v562_v19, %v577_v14  ;;  %v6570_v28 = vmul.f32 %v6105_v33, %v459_v8 }
 0x228   : > { %v594_v25 = vmul.u32 %v592_v40, %v589_v55  ;;  %v595_v45 = vmul.u32 %v591_v4, %v590_v48  ;;  %v616_v56 = vmul.u32 %v614_v7, %v589_v55  ;;  %v617_v1 = vmul.u32 %v613_v21, %v590_v48 }
 0x229   : > { %vm797_vm3 = vcmp.lt.s32.totalorder %v796_v29, 0  ;;  %v798_v18 = vsub.s32 0, %v796_v29  ;;  %v818_v22 = vsub.s32 4, %v6549_v59  ;;  %v593_v62 = vmul.u32 %v591_v4, %v589_v55 }
 0x22a   : > { %v597_v52 = vshll.u32 %v594_v25, 16  ;;  %v615_v41 = vmul.u32 %v613_v21, %v589_v55  ;;  %v596_v32 = vmul.u32 %v592_v40, %v590_v48  ;;  %v599_v17 = vshll.u32 %v595_v45, 16 }
 0x22b   : > { %v799_v31 = vsel %vm797_vm3, %v798_v18, %v796_v29  ;;  %v619_v39 = vshll.u32 %v616_v56, 16  ;;  %v618_v14 = vmul.u32 %v614_v7, %v590_v48  ;;  %v621_v8 = vshll.u32 %v617_v1, 16 }
 0x22c   : > { %v800_v54 = vclz %v799_v31  ;;  %vm601_vm10 = vc.u32 %v593_v62, %v597_v52  ;;  %v603_v19 = vadd.s32 %v597_v52, %v593_v62  ;;  %v8732_v10 = vand.u32 2147483647, %v6108_v3 }
 0x22d   : > { %v602_v33 = vsel %vm601_vm10, 1, %v8670_v30  ;;  %vm623_vm2 = vc.u32 %v615_v41, %v619_v39  ;;  %v625_v51 = vadd.s32 %v619_v39, %v615_v41  ;;  %v8733_v15 = vmov 0 }
 0x22e   : > { %vm6576_vm0 = vcmp.le.f32.partialorder %v8732_v10, 0.7853982  ;;  %v4576_v55 = vadd.s32 4294967294, %v800_v54  ;;  %v604_v21 = vadd.s32 %v602_v33, %v596_v32  ;;  %vm605_vm3 = vc.u32 %v603_v19, %v599_v17 }
 0x22f   : > { %v8734_v15 = vsel %vm6576_vm0, 4294967295, %v8733_v15  ;;  %v624_v4 = vsel %vm623_vm2, 1, %v8670_v30  ;;  %v598_v40 = vshrl.u32 %v594_v25, 16  ;;  %v606_v18 = vsel %vm605_vm3, 1, %v8670_v30 }
 0x230   : > { %v626_v48 = vadd.s32 %v624_v4, %v618_v14  ;;  %vm627_vm9 = vc.u32 %v625_v51, %v621_v8  ;;  %vm4577_vm10 = vcmp.lt.s32.totalorder %v4576_v55, 0  ;;  %v608_v7 = vadd.s32 %v606_v18, %v604_v21 }
 0x231   : > { %v620_v62 = vshrl.u32 %v616_v56, 16  ;;  %v628_v52 = vsel %vm627_vm9, 1, %v8670_v30  ;;  %v803_v41 = vsel %vm4577_vm10, 0, %v4576_v55  ;;  %v8641_v31 = vand.u32 2147483647, %v6570_v28 }
 0x232   : > { %v630_v10 = vadd.s32 %v628_v52, %v626_v48  ;;  %v1005_v54 = vand.u32 2139095040, %v6570_v28  ;;  %v804_v32 = vsub.s32 32, %v803_v41  ;;  %v808_v17 = vsub.s32 4294967266, %v803_v41 }
 0x233   : > { %v600_v39 = vshrl.u32 %v595_v45, 16  ;;  %v609_v19 = vadd.s32 %v608_v7, %v598_v40  ;;  %v622_v25 = vshrl.u32 %v617_v1, 16  ;;  %v629_v33 = vadd.s32 %v625_v51, %v621_v8 }
 0x234   : > { %v631_v27 = vadd.s32 %v630_v10, %v620_v62  ;;  %v1006_v14 = vshrl.u32 %v1005_v54, 23  ;;  %v805_v4 = vshll.u32 %v796_v29, %v803_v41  ;;  %v806_v43 = vshrl.u32 %v788_v60, %v804_v32 }
 0x235   : > { %v809_v21 = vadd.s32 127, %v808_v17  ;;  %v610_v56 = vadd.s32 %v609_v19, %v600_v39  ;;  %v579_v55 = vsel %vm573_vm14, %v576_v53, %v578_v11  ;;  %v1009_v52 = vand.u32 8388607, %v8641_v31 }
 0x236   : > { %v632_v18 = vadd.s32 %v631_v27, %v622_v25  ;;  %v4581_v48 = vadd.s32 4294967169, %v1006_v14  ;;  %v2662_v9 = vcvt.s32.f32 %v6536_v57  ;;  %v807_v45 = vor.u32 %v806_v43, %v805_v4 }
 0x237   : > { %v810_v40 = vshll.u32 %v809_v21, 23  ;;  %vm635_vm9 = vc.u32 %v610_v56, %v629_v33  ;;  %v6594_v51 = vsel %vm6576_vm0, %v6108_v3, %v6534_v46  ;;  %vm696_vm2 = vcmp.lt.s32.totalorder %v6356_v47, 0 }
 0x238   : > { %v636_v24 = vadd.s32 1, %v632_v18  ;;  %v1012_v60 = vadd.s32 1, %v4581_v48  ;;  %v8735_v27 = vand.u32 2147483647, %v6540_v42  ;;  %v6604_v43 = vsel %vm696_vm2, %v818_v22, %v6549_v59 }
 0x239   : > { %v811_v53 = vor.u32 4788187, %v810_v40  ;;  %v633_v57 = vmul.u32 %v6538_v23, %v579_v55  ;;  %v1010_v1 = vor.u32 8388608, %v1009_v52  ;;  %v1280_v46 = vsub.s32 4, %v5603_v36 }
 0x23a   : > { %v6599_v29 = vmul.f32 %v2662_v9, %v8735_v27  ;;  %v637_v11 = vsel %vm635_vm9, %v636_v24, %v632_v18  ;;  %vm1013_vm14 = vcmp.gt.s32.totalorder %v1012_v60, 0  ;;  %v814_v7 = vcvt.s32.f32 %v807_v45 }
 0x23b   : > { %v812_v8 = vand.u32 2147483647, %v811_v53  ;;  %v638_v62 = vadd.s32 %v637_v11, %v633_v57  ;;  %v1014_v41 = vsel %vm1013_vm14, %v1012_v60, 0  ;;  %v6610_v9 = vmul.f32 %v6530_v13, %v6530_v13 }
 0x23c   : > { %v6614_v42 = vmul.f32 %v6594_v51, %v6594_v51  ;;  %v8736_v59 = vand.u32 2147483647, %v6356_v47  ;;  %v1016_v22 = vand.u32 31, %v1014_v41  ;;  %v6626_v39 = vadd.s32 %v629_v33, %v610_v56 }
 0x23d   : > { %v815_v54 = vmul.f32 %v814_v7, %v812_v8  ;;  %v639_v17 = vadd.s32 536870912, %v638_v62  ;;  %v6628_v25 = vshll.u32 %v1010_v1, 8  ;;  %vm8739_vm10 = vcmp.lt.s32.totalorder %v5376_v50, 0 }
 0x23e   : > { %vm6618_vm3 = vcmp.le.f32.partialorder %v8736_v59, 0.7853982  ;;  %v1017_v19 = vsub.s32 32, %v1016_v22  ;;  %v1281_v14 = vsel %vm8739_vm10, %v1280_v46, %v5603_v36  ;;  %v6635_v55 = vshrl.u32 %v1014_v41, 5 }
 0x23f   : > { %v821_v32 = vsel %vm6618_vm3, 0, %v6604_v43  ;;  %v816_v4 = vxor.u32 2147483648, %v815_v54  ;;  %v6633_v21 = vshrl.u32 %v639_v17, 30  ;;  %v1019_v18 = vshll.u32 %v8672_v49, %v1016_v22 }
 0x240   : > { %v1020_v48 = vshrl.u32 %v8665_v26, %v1017_v19  ;;  %v1022_v52 = vshll.u32 %v8665_v26, %v1016_v22  ;;  %v1023_v33 = vshrl.u32 %v8666_v2, %v1017_v19  ;;  %v1026_v56 = vshrl.u32 %v8667_v20, %v1017_v19 }
 0x241   : > { %v817_v45 = vsel %vm696_vm2, %v816_v4, %v815_v54  ;;  %v641_v36 = vshll.u32 %v6633_v21, 30  ;;  %v1028_v40 = vshll.u32 %v8667_v20, %v1016_v22  ;;  %v1029_v24 = vshrl.u32 %v8668_v38, %v1017_v19 }
 0x242   : > { %v6650_v60 = vsel %vm6618_vm3, %v6356_v47, %v817_v45  ;;  %v1021_v27 = vor.u32 %v1020_v48, %v1019_v18  ;;  %v1024_v26 = vor.u32 %v1023_v33, %v1022_v52  ;;  %v1025_v53 = vshll.u32 %v8666_v2, %v1016_v22 }
 0x243   : > { %v6655_v57 = vmul.f32 %v6650_v60, %v6650_v60  ;;  %v6657_v11 = vsub.s32 %v638_v62, %v641_v36  ;;  %v1030_v1 = vor.u32 %v1029_v24, %v1028_v40  ;;  %v1283_v20 = vsel %vm6014_vm1, 0, %v1281_v14 }
 0x244   : > { %v1027_v46 = vor.u32 %v1026_v56, %v1025_v53  ;;  %v1031_v8 = vshll.u32 %v8668_v38, %v1016_v22  ;;  %v1032_v7 = vshrl.u32 %v8669_v63, %v1017_v19  ;;  %v1051_v41 = vand.u32 65535, %v6628_v25 }
 0x245   : > { %v830_v59 = vmul.f32 -0.00019511016, %v6655_v57  ;;  %vm643_vm9 = vcmp.lt.s32.totalorder %v6657_v11, 0  ;;  %v644_v2 = vsub.s32 0, %v6657_v11  ;;  %vm1034_vm2 = vcmp.lt.s32.totalorder %v6635_v55, 1 }
 0x246   : > { %v1033_v62 = vor.u32 %v1032_v7, %v1031_v8  ;;  %vm1035_vm14 = vcmp.lt.s32.totalorder %v6635_v55, 2  ;;  %vm1037_vm1 = vcmp.lt.s32.totalorder %v6635_v55, 4  ;;  %v1042_v38 = vsel %vm1034_vm2, %v1021_v27, %v1024_v26 }
 0x247   : > { %v831_v6 = vadd.f32 0.008332121, %v830_v59  ;;  %v645_v63 = vsel %vm643_vm9, %v644_v2, %v6657_v11  ;;  %vm1036_vm10 = vcmp.lt.s32.totalorder %v6635_v55, 3  ;;  %v1043_v22 = vsel %vm1037_vm1, %v1030_v1, 920167782 }
 0x248   : > { %v646_v54 = vclz %v645_v63  ;;  %v1039_v17 = vsel %vm1037_vm1, %v1027_v46, 2102212464  ;;  %v1044_v14 = vsel %vm1036_vm10, %v1027_v46, %v1043_v22  ;;  %v1046_v4 = vsel %vm1034_vm2, %v1024_v26, %v1027_v46 }
 0x249   : > { %v1018_v18 = vshrl.u32 %v8672_v49, %v1017_v19  ;;  %v1045_v48 = vsel %vm1035_vm14, %v1042_v38, %v1044_v14  ;;  %v1047_v52 = vsel %vm1037_vm1, %v1033_v62, 1326507024  ;;  %v1052_v33 = vshrl.u32 %v6628_v25, 16 }
 0x24a   : > { %v4573_v56 = vadd.s32 4294967294, %v646_v54  ;;  %v1048_v45 = vsel %vm1036_vm10, %v1030_v1, %v1047_v52  ;;  %v1076_v36 = vshrl.u32 %v1045_v48, 16  ;;  %v6684_v40 = vand.u32 3, %v1283_v20  ;;  %v6696_v1 = vld [vmem:[%s8537_s4 + $0x18] sm:$0xff]  ;;  %v6714_v52 = vld [vmem:[%s8537_s4 + $0x10] sm:$0xff] }
 0x24b   : > { %v832_v24 = vmul.f32 %v831_v6, %v6655_v57  ;;  %v1038_v53 = vsel %vm1034_vm2, %v1018_v18, %v1021_v27  ;;  %v1040_v49 = vsel %vm1036_vm10, %v1024_v26, %v1039_v17  ;;  %v1049_v19 = vsel %vm1035_vm14, %v1046_v4, %v1048_v45  ;;  %4697 = vmatpush.bf16.msra.mxu1 %v6696_v1 }
 0x24c   : > { %vm4574_vm9 = vcmp.lt.s32.totalorder %v4573_v56, 0  ;;  %v1053_v46 = vand.u32 65535, %v1049_v19  ;;  %v1054_v8 = vshrl.u32 %v1049_v19, 16  ;;  %v1075_v7 = vand.u32 65535, %v1045_v48 }
 0x24d   : > { %v649_v20 = vsel %vm4574_vm9, 0, %v4573_v56  ;;  %v6698_v59 = vmul.u32 %v1076_v36, %v1051_v41  ;;  %v1434_v27 = vsub.s32 4, %v5829_v35  ;;  %v1588_v2 = vsub.s32 4, %v5463_v12 }
 0x24e   : > { %v650_v26 = vsub.s32 32, %v649_v20  ;;  %v654_v62 = vsub.s32 4294967266, %v649_v20  ;;  %v664_v38 = vsub.s32 4, %v6633_v21  ;;  %v6705_v6 = vsel %vm1035_vm14, %v1038_v53, %v1040_v49 }
 0x24f   : > { %v833_v63 = vadd.f32 -0.16666654, %v832_v24  ;;  %v1056_v22 = vmul.u32 %v1054_v8, %v1051_v41  ;;  %v1057_v54 = vmul.u32 %v1053_v46, %v1052_v33  ;;  %v1285_v17 = vmul.f32 -0.001358992, %v6164_v16  ;;  %4698 = vmatpush.bf16.msra.mxu1 %v6714_v52 }
 0x250   : > { %v651_v14 = vshll.u32 %v6657_v11, %v649_v20  ;;  %v652_v4 = vshrl.u32 %v6626_v39, %v650_v26  ;;  %v655_v18 = vadd.s32 127, %v654_v62  ;;  %v1079_v48 = vmul.u32 %v1075_v7, %v1052_v33 }
 0x251   : > { %v1055_v55 = vmul.u32 %v1053_v46, %v1051_v41  ;;  %v1059_v56 = vshll.u32 %v1056_v22, 16  ;;  %v1077_v45 = vmul.u32 %v1075_v7, %v1051_v41  ;;  %v1081_v24 = vshll.u32 %v6698_v59, 16 }
 0x252   : > { %v653_v53 = vor.u32 %v652_v4, %v651_v14  ;;  %v656_v49 = vshll.u32 %v655_v18, 23  ;;  %v1058_v19 = vmul.u32 %v1054_v8, %v1052_v33  ;;  %v1080_v10 = vmul.u32 %v1076_v36, %v1052_v33  ;;  %v6729_v33 = vld [vmem:[%s8537_s4 + $0x8] sm:$0xff] }
 0x253   : > { %vm542_vm2 = vcmp.lt.s32.totalorder %v6408_v58, 0  ;;  %v1060_v39 = vshrl.u32 %v1056_v22, 16  ;;  %v1061_v11 = vshll.u32 %v1057_v54, 16  ;;  %vm1063_vm14 = vc.u32 %v1055_v55, %v1059_v56  ;;  %4699 = vmatpush.bf16.msra.mxu1 %v6729_v33 }
 0x254   : > { %v1065_v20 = vadd.s32 %v1059_v56, %v1055_v55  ;;  %v8740_v26 = vand.u32 2147483647, %v6408_v58  ;;  %v657_v41 = vor.u32 4788187, %v656_v49  ;;  %v660_v7 = vcvt.s32.f32 %v653_v53 }
 0x255   : > { %v1064_v62 = vsel %vm1063_vm14, 1, %v8670_v30  ;;  %v1083_v8 = vshll.u32 %v1079_v48, 16  ;;  %vm1085_vm9 = vc.u32 %v1077_v45, %v1081_v24  ;;  %v1087_v22 = vadd.s32 %v1081_v24, %v1077_v45 }
 0x256   : > { %vm6721_vm1 = vcmp.le.f32.partialorder %v8740_v26, 0.7853982  ;;  %v1066_v36 = vadd.s32 %v1064_v62, %v1058_v19  ;;  %vm1067_vm10 = vc.u32 %v1065_v20, %v1061_v11  ;;  %v658_v14 = vand.u32 2147483647, %v657_v41  ;;  %v6738_v19 = vld [vmem:[%s8537_s4] sm:$0xff] }
 0x257   : > { %v1068_v4 = vsel %vm1067_vm10, 1, %v8670_v30  ;;  %v1086_v18 = vsel %vm1085_vm9, 1, %v8670_v30  ;;  %v1286_v55 = vadd.f32 0.041655596, %v1285_v17  ;;  %v1062_v56 = vshrl.u32 %v1057_v54, 16  ;;  %4700 = vmatpush.bf16.msra.mxu1 %v6738_v19 }
 0x258   : > { %v1070_v53 = vadd.s32 %v1068_v4, %v1066_v36  ;;  %v1088_v49 = vadd.s32 %v1086_v18, %v1080_v10  ;;  %vm1089_vm14 = vc.u32 %v1087_v22, %v1083_v8  ;;  %v661_v26 = vmul.f32 %v660_v7, %v658_v14 }
 0x259   : > { %v1090_v31 = vsel %vm1089_vm14, 1, %v8670_v30  ;;  %v1287_v45 = vmul.f32 %v1286_v55, %v6164_v16  ;;  %v1292_v24 = vmul.f32 -0.00019511016, %v6164_v16  ;;  %v1082_v20 = vshrl.u32 %v6698_v59, 16 }
 0x25a   : > { %v1071_v11 = vadd.s32 %v1070_v53, %v1060_v39  ;;  %v1084_v17 = vshrl.u32 %v1079_v48, 16  ;;  %v1092_v54 = vadd.s32 %v1090_v31, %v1088_v49  ;;  %v662_v41 = vxor.u32 2147483648, %v661_v26 }
 0x25b   : > { %v1288_v10 = vadd.f32 -0.4999988, %v1287_v45  ;;  %v1293_v7 = vadd.f32 0.008332121, %v1292_v24  ;;  %vm8743_vm10 = vcmp.lt.s32.totalorder %v5558_v34, 0  ;;  %v834_v31 = vmul.f32 %v833_v63, %v6655_v57 }
 0x25c   : > { %v1435_v30 = vsel %vm8743_vm10, %v1434_v27, %v5829_v35  ;;  %v6749_v62 = vadd.s32 %v1071_v11, %v1062_v56  ;;  %v1093_v36 = vadd.s32 %v1092_v54, %v1082_v20  ;;  %v1439_v39 = vmul.f32 -0.001358992, %v6392_v5 }
 0x25d   : > { %v1446_v59 = vmul.f32 -0.00019511016, %v6392_v5  ;;  %v663_v48 = vsel %vm542_vm2, %v662_v41, %v661_v26  ;;  %v6756_v14 = vadd.s32 %v1087_v22, %v1083_v8  ;;  %v1294_v4 = vmul.f32 %v1293_v7, %v6164_v16 }
 0x25e   : > { %v6762_v35 = vsel %vm6721_vm1, %v6408_v58, %v663_v48  ;;  %v1094_v27 = vadd.s32 %v1093_v36, %v1084_v17  ;;  %v1289_v18 = vmul.f32 %v1288_v10, %v6164_v16  ;;  %v1437_v55 = vsel %vm6277_vm6, 0, %v1435_v30 }
 0x25f   : > { %v6769_v63 = vmul.f32 %v6762_v35, %v6762_v35  ;;  %vm1097_vm9 = vc.u32 %v6749_v62, %v6756_v14  ;;  %v1295_v8 = vadd.f32 -0.16666654, %v1294_v4  ;;  %v1440_v22 = vadd.f32 0.041655596, %v1439_v39  ;;  %v4688_v4 = vld [vmem:[%s8536_s3] sm:$0xff] }
 0x260   : > { %v6778_v56 = vsel %vm542_vm2, %v664_v38, %v6633_v21  ;;  %v1095_v37 = vmul.u32 %v6628_v25, %v6705_v6  ;;  %v1098_v53 = vadd.s32 1, %v1094_v27  ;;  %v1447_v49 = vadd.f32 0.008332121, %v1446_v59  ;;  %379 = vmatpush.bf16.msra.mxu0 %v4688_v4 }
 0x261   : > { %v835_v26 = vadd.f32 1.0, %v834_v31  ;;  %v676_v45 = vmul.f32 -0.00019511016, %v6769_v63  ;;  %v1296_v24 = vmul.f32 %v1295_v8, %v6164_v16  ;;  %v1441_v11 = vmul.f32 %v1440_v22, %v6392_v5 }
 0x262   : > { %v1099_v20 = vsel %vm1097_vm9, %v1098_v53, %v1094_v27  ;;  %v1290_v17 = vadd.f32 1.0, %v1289_v18  ;;  %v1448_v54 = vmul.f32 %v1447_v49, %v6392_v5  ;;  %v1454_v41 = vand.u32 3, %v1437_v55  ;;  %v357_v27 = vld [vmem:[%s337_s13] sm:$0xf] }
 0x263   : > { %v677_v21 = vadd.f32 0.008332121, %v676_v45  ;;  %v1100_v38 = vadd.s32 %v1099_v20, %v1095_v37  ;;  %v1297_v10 = vadd.f32 1.0, %v1296_v24  ;;  %v1442_v7 = vadd.f32 -0.4999988, %v1441_v11 }
 0x264   : > { %v667_v25 = vsel %vm6721_vm1, 0, %v6778_v56  ;;  %v1449_v16 = vadd.f32 -0.16666654, %v1448_v54  ;;  %v1593_v6 = vmul.f32 -0.001358992, %v5819_v0  ;;  %v6800_v31 = vmul.f32 %v835_v26, %v6650_v60  ;;  %3074 = vmatpush.bf16.msrb.mxu0 %v6696_v1  ;;  %v8745_v54 = vld [vmem:[#allocation9_spill] sm:$0xff] }
 0x265   : > { %v678_v30 = vmul.f32 %v677_v21, %v6769_v63  ;;  %v1101_v36 = vadd.s32 536870912, %v1100_v38  ;;  %v1298_v39 = vmul.f32 %v1297_v10, %v6064_v44  ;;  %v1443_v59 = vmul.f32 %v1442_v7, %v6392_v5  ;;  %v8747_v7 = vld [vmem:[#allocation19_spill] sm:$0xff] }
 0x266   : > { %vm1305_vm14 = vcmp.eq.s32.totalorder %v6684_v40, 2  ;;  %v1450_v48 = vmul.f32 %v1449_v16, %v6392_v5  ;;  %v1306_v55 = vxor.u32 2147483648, %v1290_v17  ;;  %vm368_vm2 = vcmask 130048  }
 0x267   : > { %v6807_v18 = vshrl.u32 %v1101_v36, 30  ;;  %v1303_v44 = vxor.u32 2147483648, %v1298_v39  ;;  %v1444_v60 = vadd.f32 1.0, %v1443_v59  ;;  %v358_v22 = vpack.c.bf16 %v357_v27, %v357_v27 }
 0x268   : > { %v1451_v8 = vadd.f32 1.0, %v1450_v48  ;;  %v1594_v5 = vadd.f32 0.041655596, %v1593_v6  ;;  %v679_v37 = vadd.f32 -0.16666654, %v678_v30  ;;  %vm8744_vm9 = vcmp.eq.s32.totalorder %v6684_v40, 0  ;;  %3075 = vmatpush.bf16.msrb.mxu0 %v6714_v52 }
 0x269   : > { %v1103_v53 = vshll.u32 %v6807_v18, 30  ;;  %v1600_v49 = vmul.f32 -0.00019511016, %v5819_v0  ;;  %v1304_v26 = vsel %vm8744_vm9, %v1290_v17, %v1303_v44  ;;  %v1460_v24 = vxor.u32 2147483648, %v1444_v60  ;;  %4571 = vmatmul.msk.bf16.vlgmr.msra.gmra.mxu0 %vm368_vm2, %v358_v22  ;;  %v8754_v22 = vld [vmem:[#allocation17_spill] sm:$0xff] }
 0x26a   : > { %v1452_v45 = vmul.f32 %v1451_v8, %v6340_v61  ;;  %v1595_v11 = vmul.f32 %v1594_v5, %v5819_v0  ;;  %vm1459_vm6 = vcmp.eq.s32.totalorder %v1454_v41, 2  ;;  %vm8746_vm10 = vcmp.lt.s32.totalorder %v8745_v54, 0 }
 0x26b   : > { %v6818_v20 = vsub.s32 %v1100_v38, %v1103_v53  ;;  %v1589_v1 = vsel %vm8746_vm10, %v1588_v2, %v5463_v12  ;;  %v1601_v21 = vadd.f32 0.008332121, %v1600_v49  ;;  %v1307_v17 = vsel %vm1305_vm14, %v1306_v55, %v1298_v39 }
 0x26c   : > { %v1457_v10 = vxor.u32 2147483648, %v1452_v45  ;;  %v1596_v61 = vadd.f32 -0.4999988, %v1595_v11  ;;  %v1742_v16 = vsub.s32 4, %v8747_v7  ;;  %vm8748_vm2 = vcmp.lt.s32.totalorder %v6684_v40, 2  ;;  %3076 = vmatpush.bf16.msrb.mxu0 %v6729_v33 }
 0x26d   : > { %vm1105_vm9 = vcmp.lt.s32.totalorder %v6818_v20, 0  ;;  %v1106_v38 = vsub.s32 0, %v6818_v20  ;;  %v1308_v6 = vsel %vm8748_vm2, %v1304_v26, %v1307_v17  ;;  %v1602_v30 = vmul.f32 %v1601_v21, %v5819_v0 }
 0x26e   : > { %v680_v12 = vmul.f32 %v679_v37, %v6769_v63  ;;  %vm8749_vm10 = vcmp.eq.s32.totalorder %v1454_v41, 0  ;;  %v1461_v36 = vsel %vm1459_vm6, %v1460_v24, %v1452_v45  ;;  %v1591_v59 = vsel %vm5754_vm15, 0, %v1589_v1 }
 0x26f   : > { %v1458_v2 = vsel %vm8749_vm10, %v1444_v60, %v1457_v10  ;;  %v1107_v48 = vsel %vm1105_vm9, %v1106_v38, %v6818_v20  ;;  %vm8751_vm14 = vcmp.lt.s32.totalorder %v1454_v41, 2  ;;  %vm3045_vm0 = vcmask 523264   ;;  %v8756_v41 = vld [vmem:[#allocation34_spill] sm:$0xff]  ;;  %v8758_v10 = vld [vmem:[#allocation24_spill] sm:$0xff] }
 0x270   : > { %v1462_v4 = vsel %vm8751_vm14, %v1458_v2, %v1461_v36  ;;  %v1603_v27 = vadd.f32 -0.16666654, %v1602_v30  ;;  %v1108_v40 = vclz %v1107_v48  ;;  %vm8752_vm2 = vweird.f32 %v5376_v50  ;;  %3077 = vmatpush.bf16.msrb.mxu0 %v6738_v19 }
 0x271   : > { %v1309_v52 = vsel %vm8752_vm2, nan, %v1308_v6  ;;  %vm8753_vm11 = vweird.f32 %v5558_v34  ;;  %v1597_v55 = vmul.f32 %v1596_v61, %v5819_v0  ;;  %vm8755_vm15 = vcmp.lt.s32.totalorder %v8754_v22, 0 }
 0x272   : > { %v1463_v44 = vsel %vm8753_vm11, nan, %v1462_v4  ;;  %v1604_v8 = vmul.f32 %v1603_v27, %v5819_v0  ;;  %v1743_v5 = vsel %vm8755_vm15, %v1742_v16, %v8747_v7  ;;  %v1747_v37 = vmul.f32 -0.001358992, %v8756_v41 }
 0x273   : > { %v3006_v60 = vpack.c.bf16 %v1463_v44, %v1309_v52  ;;  %v841_v53 = vxor.u32 2147483648, %v6800_v31  ;;  %v681_v50 = vadd.f32 1.0, %v680_v12  ;;  %v4582_v49 = vadd.s32 4294967294, %v1108_v40 }
 0x274   : > { %v1754_v34 = vmul.f32 -0.00019511016, %v8756_v41  ;;  %v1096_v26 = vadd.s32 %v6756_v14, %v6749_v62  ;;  %v1605_v0 = vadd.f32 1.0, %v1604_v8  ;;  %v1608_v45 = vand.u32 3, %v1591_v59 }
 0x275   : > { %4638 = vmatmul.msk.bf16.vlgmr.msra.gmra.mxu1 %vm3045_vm0, %v3006_v60  ;;  %v1748_v24 = vadd.f32 0.041655596, %v1747_v37  ;;  %vm4583_vm11 = vcmp.lt.s32.totalorder %v4582_v49, 0  ;;  %v1598_v11 = vadd.f32 1.0, %v1597_v55  ;;  %v1745_v21 = vsel %vm6120_vm8, 0, %v1743_v5 }
 0x276   : > { %v1755_v33 = vadd.f32 0.008332121, %v1754_v34  ;;  %v1111_v17 = vsel %vm4583_vm11, 0, %v4582_v49  ;;  %v1606_v61 = vmul.f32 %v1605_v0, %v8758_v10  ;;  %v669_v62 = vmul.f32 -0.001358992, %v6769_v63 }
 0x277   : > { %v1749_v7 = vmul.f32 %v1748_v24, %v8756_v41  ;;  %v6864_v14 = vmul.f32 %v681_v50, %v6762_v35  ;;  %v1112_v16 = vsub.s32 32, %v1111_v17  ;;  %v1116_v38 = vsub.s32 4294967266, %v1111_v17 }
 0x278   : > { %v1756_v6 = vmul.f32 %v1755_v33, %v8756_v41  ;;  %vm1609_vm6 = vcmp.lt.s32.totalorder %v1608_v45, 2  ;;  %vm1610_vm9 = vcmp.eq.s32.totalorder %v1608_v45, 0  ;;  %vm1613_vm8 = vcmp.eq.s32.totalorder %v1608_v45, 2 }
 0x279   : > { %v1750_v30 = vadd.f32 -0.4999988, %v1749_v7  ;;  %v1114_v12 = vshrl.u32 %v1096_v26, %v1112_v16  ;;  %v1117_v2 = vadd.s32 127, %v1116_v38  ;;  %v1762_v39 = vand.u32 3, %v1745_v21  ;;  %v8759_v26 = vld [vmem:[#allocation33_spill] sm:$0xff] }
 0x27a   : > { %v1757_v36 = vadd.f32 -0.16666654, %v1756_v6  ;;  %v1611_v59 = vxor.u32 2147483648, %v1606_v61  ;;  %v1614_v48 = vxor.u32 2147483648, %v1598_v11  ;;  %v670_v4 = vadd.f32 0.041655596, %v669_v62 }
 0x27b   : > { %v1751_v19 = vmul.f32 %v1750_v30, %v8756_v41  ;;  %v687_v35 = vxor.u32 2147483648, %v6864_v14  ;;  %v1113_v27 = vshll.u32 %v6818_v20, %v1111_v17  ;;  %v1118_v40 = vshll.u32 %v1117_v2, 23 }
 0x27c   : > { %v1758_v52 = vmul.f32 %v1757_v36, %v8756_v41  ;;  %vm1607_vm10 = vweird.f32 %v8745_v54  ;;  %vm1761_vm14 = vweird.f32 %v8754_v22  ;;  %v671_v55 = vmul.f32 %v670_v4, %v6769_v63 }
 0x27d   : > { %v1752_v44 = vadd.f32 1.0, %v1751_v19  ;;  %v684_v60 = vand.u32 3, %v667_v25  ;;  %v1115_v8 = vor.u32 %v1114_v12, %v1113_v27  ;;  %v1119_v5 = vor.u32 4788187, %v1118_v40  ;;  %v8760_v25 = vld [vmem:[#allocation16_spill] sm:$0xff]  ;;  %v8761_v12 = vld [vmem:[#allocation6_spill] sm:$0xff] }
 0x27e   : > { %v1759_v37 = vadd.f32 1.0, %v1758_v52  ;;  %vm1763_vm2 = vcmp.lt.s32.totalorder %v1762_v39, 2  ;;  %v1612_v20 = vsel %vm1610_vm9, %v1598_v11, %v1611_v59  ;;  %v1615_v41 = vsel %vm1613_vm8, %v1614_v48, %v1606_v61 }
 0x27f   : > { %v672_v50 = vadd.f32 -0.4999988, %v671_v55  ;;  %v823_v49 = vmul.f32 -0.001358992, %v6655_v57  ;;  %v1120_v34 = vand.u32 2147483647, %v1119_v5  ;;  %v1122_v21 = vcvt.s32.f32 %v1115_v8 }
 0x280   : > { %v1760_v0 = vmul.f32 %v1759_v37, %v8759_v26  ;;  %vm1764_vm15 = vcmp.eq.s32.totalorder %v1762_v39, 0  ;;  %v1768_v24 = vxor.u32 2147483648, %v1752_v44  ;;  %vm1767_vm11 = vcmp.eq.s32.totalorder %v1762_v39, 2 }
 0x281   : > { %v673_v46 = vmul.f32 %v672_v50, %v6769_v63  ;;  %v824_v56 = vadd.f32 0.041655596, %v823_v49  ;;  %v1901_v1 = vmul.f32 -0.001358992, %v8760_v25  ;;  %v1616_v33 = vsel %vm1609_vm6, %v1612_v20, %v1615_v41 }
 0x282   : > { %v1765_v11 = vxor.u32 2147483648, %v1760_v0  ;;  %vm686_vm1 = vcmp.eq.s32.totalorder %v684_v60, 0  ;;  %vm1004_vm9 = vcmp.lt.s32.totalorder %v6570_v28, 0  ;;  %v838_v61 = vand.u32 3, %v821_v32 }
 0x283   : > { %v674_v17 = vadd.f32 1.0, %v673_v46  ;;  %v825_v10 = vmul.f32 %v824_v56, %v6655_v57  ;;  %v1908_v63 = vmul.f32 -0.00019511016, %v8760_v25  ;;  %v1123_v7 = vmul.f32 %v1122_v21, %v1120_v34  ;;  %v8771_v21 = vld [vmem:[#allocation4_spill] sm:$0xff] }
 0x284   : > { %v1766_v62 = vsel %vm1764_vm15, %v1752_v44, %v1765_v11  ;;  %v1769_v16 = vsel %vm1767_vm11, %v1768_v24, %v1760_v0  ;;  %v1902_v45 = vadd.f32 0.041655596, %v1901_v1  ;;  %v1896_v2 = vsub.s32 4, %v8761_v12  ;;  %v8767_v44 = vld [vmem:[#allocation32_spill] sm:$0xff] }
 0x285   : > { %v1770_v38 = vsel %vm1763_vm2, %v1766_v62, %v1769_v16  ;;  %v690_v6 = vxor.u32 2147483648, %v674_v17  ;;  %v826_v30 = vadd.f32 -0.4999988, %v825_v10  ;;  %v8762_v36 = vand.u32 2147483647, %v6570_v28 }
 0x286   : > { %v1617_v43 = vsel %vm1607_vm10, nan, %v1616_v33  ;;  %v1771_v32 = vsel %vm1761_vm14, nan, %v1770_v38  ;;  %v688_v59 = vsel %vm686_vm1, %v674_v17, %v687_v35  ;;  %v1903_v39 = vmul.f32 %v1902_v45, %v8760_v25  ;;  %v8765_v35 = vld [vmem:[#allocation3_spill] sm:$0xff] }
 0x287   : > { %vm6897_vm6 = vcmp.le.f32.partialorder %v8762_v36, 0.7853982  ;;  %v3007_v48 = vpack.c.bf16 %v1771_v32, %v1617_v43  ;;  %vm683_vm3 = vweird.f32 %v6408_v58  ;;  %vm689_vm8 = vcmp.eq.s32.totalorder %v684_v60, 2 }
 0x288   : > { %v827_v19 = vmul.f32 %v826_v30, %v6655_v57  ;;  %v1124_v4 = vxor.u32 2147483648, %v1123_v7  ;;  %vm685_vm2 = vcmp.lt.s32.totalorder %v684_v60, 2  ;;  %v691_v27 = vsel %vm689_vm8, %v690_v6, %v6864_v14  ;;  %v8768_v57 = vld [vmem:[#allocation7_spill] sm:$0xff]  ;;  %v8769_v60 = vld [vmem:[#allocation18_spill] sm:$0xff]  ;;  %v8775_v6 = vld [vmem:[#allocation29_spill] sm:$0xff] }
 0x289   : > { %v1909_v40 = vadd.f32 0.008332121, %v1908_v63  ;;  %4639 = vmatmul.msk.bf16.gmra.mxu1 %vm3045_vm0, %v3007_v48  ;;  %v692_v54 = vsel %vm685_vm2, %v688_v59, %v691_v27  ;;  %vm840_vm10 = vcmp.eq.s32.totalorder %v838_v61, 0  ;;  %vm8766_vm14 = vcmp.lt.s32.totalorder %v8765_v35, 0 }
 0x28a   : > { %v828_v22 = vadd.f32 1.0, %v827_v19  ;;  %v1897_v52 = vsel %vm8766_vm14, %v1896_v2, %v8761_v12  ;;  %vm2544_vm15 = vcmp.lt.s32.totalorder %v8767_v44, 0  ;;  %v1904_v55 = vadd.f32 -0.4999988, %v1903_v39  ;;  %v8776_v2 = vld [vmem:[#allocation13_spill] sm:$0xff] }
 0x28b   : > { %v1910_v8 = vmul.f32 %v1909_v40, %v8760_v25  ;;  %v2050_v5 = vsub.s32 4, %v8768_v57  ;;  %v2055_v37 = vmul.f32 -0.001358992, %v8769_v60  ;;  %vm837_vm11 = vweird.f32 %v6356_v47 }
 0x28c   : > { %vm839_vm1 = vcmp.lt.s32.totalorder %v838_v61, 2  ;;  %v842_v14 = vsel %vm840_vm10, %v828_v22, %v841_v53  ;;  %v844_v20 = vxor.u32 2147483648, %v828_v22  ;;  %v1125_v41 = vsel %vm1004_vm9, %v1124_v4, %v1123_v7  ;;  %v8773_v7 = vld [vmem:[#allocation40_spill] sm:$0xff] }
 0x28d   : > { %vm843_vm8 = vcmp.eq.s32.totalorder %v838_v61, 2  ;;  %v1899_v49 = vsel %vm5425_vm12, 0, %v1897_v52  ;;  %v1911_v34 = vadd.f32 -0.16666654, %v1910_v8  ;;  %v693_v26 = vsel %vm683_vm3, nan, %v692_v54  ;;  %v8778_v52 = vld [vmem:[#allocation21_spill] sm:$0xff] }
 0x28e   : > { %v845_v0 = vsel %vm843_vm8, %v844_v20, %v6800_v31  ;;  %v2056_v24 = vadd.f32 0.041655596, %v2055_v37  ;;  %v2062_v46 = vmul.f32 -0.00019511016, %v8769_v60  ;;  %v1905_v53 = vmul.f32 %v1904_v55, %v8760_v25 }
 0x28f   : > { %v846_v56 = vsel %vm839_vm1, %v842_v14, %v845_v0  ;;  %v1912_v1 = vmul.f32 %v1911_v34, %v8760_v25  ;;  %vm8772_vm2 = vcmp.lt.s32.totalorder %v8771_v21, 0  ;;  %v6937_v11 = vsel %vm6897_vm6, %v6570_v28, %v1125_v41 }
 0x290   : > { %v2051_v33 = vsel %vm8772_vm2, %v2050_v5, %v8768_v57  ;;  %v847_v58 = vsel %vm837_vm11, nan, %v846_v56  ;;  %v2057_v31 = vmul.f32 %v2056_v24, %v8769_v60  ;;  %v2063_v17 = vadd.f32 0.008332121, %v2062_v46 }
 0x291   : > { %v3004_v10 = vpack.c.bf16 %v847_v58, %v693_v26  ;;  %v1913_v61 = vadd.f32 1.0, %v1912_v1  ;;  %v1916_v63 = vand.u32 3, %v1899_v49  ;;  %v977_v25 = vmul.f32 -0.001358992, %v8773_v7  ;;  %v8784_v26 = vld [vmem:[#allocation15_spill] sm:$0xff] }
 0x292   : > { %v2053_v16 = vsel %vm5438_vm13, 0, %v2051_v33  ;;  %v2058_v45 = vadd.f32 -0.4999988, %v2057_v31  ;;  %v2064_v38 = vmul.f32 %v2063_v17, %v8769_v60  ;;  %v972_v30 = vsub.s32 4, %v8775_v6 }
 0x293   : > { %v6949_v47 = vmul.f32 %v6937_v11, %v6937_v11  ;;  %4636 = vmatmul.msk.bf16.vlgmr.msrb.gmra.mxu0 %vm3045_vm0, %v3004_v10  ;;  %v1906_v12 = vadd.f32 1.0, %v1905_v53  ;;  %v1914_v36 = vmul.f32 %v1913_v61, %v8776_v2  ;;  %v978_v43 = vadd.f32 0.041655596, %v977_v25 }
 0x294   : > { %v8777_v32 = vxor.u32 2147483648, %v6599_v29  ;;  %v2059_v39 = vmul.f32 %v2058_v45, %v8769_v60  ;;  %v2065_v48 = vadd.f32 -0.16666654, %v2064_v38  ;;  %v984_v19 = vmul.f32 -0.00019511016, %v8773_v7 }
 0x295   : > { %vm1917_vm12 = vcmp.lt.s32.totalorder %v1916_v63, 2  ;;  %v1919_v4 = vxor.u32 2147483648, %v1914_v36  ;;  %v2070_v27 = vand.u32 3, %v2053_v16  ;;  %v979_v40 = vmul.f32 %v978_v43, %v8773_v7 }
 0x296   : > { %v2665_v59 = vsel %vm2544_vm15, %v8777_v32, %v6599_v29  ;;  %v2060_v54 = vadd.f32 1.0, %v2059_v39  ;;  %v2066_v22 = vmul.f32 %v2065_v48, %v8769_v60  ;;  %vm8779_vm13 = vcmp.lt.s32.totalorder %v8778_v52, 0 }
 0x297   : > { %v973_v55 = vsel %vm8779_vm13, %v972_v30, %v8775_v6  ;;  %v985_v8 = vadd.f32 0.008332121, %v984_v19  ;;  %vm1915_vm3 = vweird.f32 %v8765_v35  ;;  %vm1918_vm10 = vcmp.eq.s32.totalorder %v1916_v63, 0 }
 0x298   : > { %v1922_v29 = vxor.u32 2147483648, %v1906_v12  ;;  %v1126_v57 = vsub.s32 4, %v6807_v18  ;;  %v1131_v5 = vmul.f32 -0.001358992, %v6949_v47  ;;  %vm1921_vm14 = vcmp.eq.s32.totalorder %v1916_v63, 2 }
 0x299   : > { %v2067_v37 = vadd.f32 1.0, %v2066_v22  ;;  %v980_v14 = vadd.f32 -0.4999988, %v979_v40  ;;  %v986_v20 = vmul.f32 %v985_v8, %v8773_v7  ;;  %v8780_v60 = vand.u32 2147483647, %v8767_v44 }
 0x29a   : > { %v1920_v50 = vsel %vm1918_vm10, %v1906_v12, %v1919_v4  ;;  %vm2071_vm1 = vcmp.lt.s32.totalorder %v2070_v27, 2  ;;  %vm2072_vm8 = vcmp.eq.s32.totalorder %v2070_v27, 0  ;;  %v975_v34 = vsel %vm6362_vm7, 0, %v973_v55  ;;  %v8786_v4 = vld [vmem:[#allocation35_spill] sm:$0xff] }
 0x29b   : > { %vm6971_vm11 = vcmp.le.f32.partialorder %v8780_v60, 0.7853982  ;;  %v2068_v0 = vmul.f32 %v2067_v37, %v8784_v26  ;;  %v2076_v24 = vxor.u32 2147483648, %v2060_v54  ;;  %v987_v46 = vadd.f32 -0.16666654, %v986_v20 }
 0x29c   : > { %v1127_v56 = vsel %vm1004_vm9, %v1126_v57, %v6807_v18  ;;  %v1923_v53 = vsel %vm1921_vm14, %v1922_v29, %v1914_v36  ;;  %vm2075_vm2 = vcmp.eq.s32.totalorder %v2070_v27, 2  ;;  %v1132_v1 = vadd.f32 0.041655596, %v1131_v5  ;;  %v8785_v36 = vld [vmem:[#allocation39_spill] sm:$0xff]  ;;  %v8787_v5 = vld [vmem:[#allocation28_spill] sm:$0xff] }
 0x29d   : > { %v1138_v33 = vmul.f32 -0.00019511016, %v6949_v47  ;;  %v2073_v58 = vxor.u32 2147483648, %v2068_v0  ;;  %v981_v31 = vmul.f32 %v980_v14, %v8773_v7  ;;  %v988_v17 = vmul.f32 %v987_v46, %v8773_v7  ;;  %v8789_v14 = vld [vmem:[#allocation30_spill] sm:$0xff] }
 0x29e   : > { %v992_v10 = vand.u32 3, %v975_v34  ;;  %v1924_v61 = vsel %vm1917_vm12, %v1920_v50, %v1923_v53  ;;  %v1129_v25 = vsel %vm6897_vm6, 0, %v1127_v56  ;;  %v1133_v62 = vmul.f32 %v1132_v1, %v6949_v47 }
 0x29f   : > { %v1139_v16 = vadd.f32 0.008332121, %v1138_v33  ;;  %v2074_v18 = vsel %vm2072_vm8, %v2060_v54, %v2073_v58  ;;  %v2077_v45 = vsel %vm2075_vm2, %v2076_v24, %v2068_v0  ;;  %v989_v38 = vadd.f32 1.0, %v988_v17  ;;  %v8790_v0 = vld [vmem:[#allocation44_spill] sm:$0xff] }
 0x2a0   : > { %v2209_v6 = vmul.f32 -0.001358992, %v6610_v9  ;;  %vm2069_vm7 = vweird.f32 %v8771_v21  ;;  %v2078_v30 = vsel %vm2071_vm1, %v2074_v18, %v2077_v45  ;;  %v1134_v7 = vadd.f32 -0.4999988, %v1133_v62  ;;  %v8794_v45 = vld [vmem:[#allocation26_spill] sm:$0xff] }
 0x2a1   : > { %v1140_v63 = vmul.f32 %v1139_v16, %v6949_v47  ;;  %v1925_v23 = vsel %vm1915_vm3, nan, %v1924_v61  ;;  %v2079_v12 = vsel %vm2069_vm7, nan, %v2078_v30  ;;  %v982_v2 = vadd.f32 1.0, %v981_v31 }
 0x2a2   : > { %v990_v43 = vmul.f32 %v989_v38, %v8785_v36  ;;  %v3008_v32 = vpack.c.bf16 %v2079_v12, %v1925_v23  ;;  %v1135_v39 = vmul.f32 %v1134_v7, %v6949_v47  ;;  %v1146_v19 = vand.u32 3, %v1129_v25 }
 0x2a3   : > { %v1141_v48 = vadd.f32 -0.16666654, %v1140_v63  ;;  %v7000_v21 = vsel %vm6971_vm11, %v8767_v44, %v2665_v59  ;;  %vm993_vm9 = vcmp.lt.s32.totalorder %v992_v10, 2  ;;  %v2204_v27 = vsub.s32 4, %v8786_v4 }
 0x2a4   : > { %v2210_v40 = vadd.f32 0.041655596, %v2209_v6  ;;  %4640 = vmatmul.msk.bf16.gmra.mxu1 %vm3045_vm0, %v3008_v32  ;;  %v995_v35 = vxor.u32 2147483648, %v990_v43  ;;  %v1136_v54 = vadd.f32 1.0, %v1135_v39  ;;  %v2216_v55 = vmul.f32 -0.00019511016, %v6610_v9 }
 0x2a5   : > { %v1142_v22 = vmul.f32 %v1141_v48, %v6949_v47  ;;  %vm991_vm6 = vweird.f32 %v8778_v52  ;;  %vm994_vm12 = vcmp.eq.s32.totalorder %v992_v10, 0  ;;  %vm997_vm13 = vcmp.eq.s32.totalorder %v992_v10, 2 }
 0x2a6   : > { %vm1145_vm3 = vweird.f32 %v6570_v28  ;;  %v2211_v59 = vmul.f32 %v2210_v40, %v6610_v9  ;;  %v998_v8 = vxor.u32 2147483648, %v982_v2  ;;  %vm1147_vm10 = vcmp.lt.s32.totalorder %v1146_v19, 2 }
 0x2a7   : > { %v1143_v29 = vadd.f32 1.0, %v1142_v22  ;;  %v2217_v57 = vadd.f32 0.008332121, %v2216_v55  ;;  %vm1148_vm14 = vcmp.eq.s32.totalorder %v1146_v19, 0  ;;  %vm8788_vm1 = vcmp.lt.s32.totalorder %v8787_v5, 0 }
 0x2a8   : > { %v2205_v37 = vsel %vm8788_vm1, %v2204_v27, %v8786_v4  ;;  %v2212_v47 = vadd.f32 -0.4999988, %v2211_v59  ;;  %v2358_v20 = vsub.s32 4, %v8789_v14  ;;  %v996_v60 = vsel %vm994_vm12, %v982_v2, %v995_v35 }
 0x2a9   : > { %v1144_v50 = vmul.f32 %v1143_v29, %v6937_v11  ;;  %v1152_v49 = vxor.u32 2147483648, %v1136_v54  ;;  %v2218_v34 = vmul.f32 %v2217_v57, %v6610_v9  ;;  %vm1151_vm8 = vcmp.eq.s32.totalorder %v1146_v19, 2  ;;  %v8792_v11 = vld [vmem:[#allocation25_spill] sm:$0xff]  ;;  %v8796_v29 = vld [vmem:[#allocation10_spill] sm:$0xff] }
 0x2aa   : > { %v2213_v26 = vmul.f32 %v2212_v47, %v6610_v9  ;;  %v2363_v24 = vmul.f32 -0.001358992, %v8790_v0  ;;  %v2370_v46 = vmul.f32 -0.00019511016, %v8790_v0  ;;  %v999_v56 = vsel %vm997_vm13, %v998_v8, %v990_v43 }
 0x2ab   : > { %v1149_v53 = vxor.u32 2147483648, %v1144_v50  ;;  %v2207_v33 = vsel %vm6500_vm4, 0, %v2205_v37  ;;  %v2219_v58 = vadd.f32 -0.16666654, %v2218_v34  ;;  %v1000_v31 = vsel %vm993_vm9, %v996_v60, %v999_v56  ;;  %v8799_v56 = vld [vmem:[#allocation5_spill] sm:$0xff] }
 0x2ac   : > { %vm8793_vm2 = vcmp.lt.s32.totalorder %v8792_v11, 0  ;;  %v2364_v61 = vadd.f32 0.041655596, %v2363_v24  ;;  %v2371_v25 = vadd.f32 0.008332121, %v2370_v46  ;;  %v1153_v16 = vsel %vm1151_vm8, %v1152_v49, %v1144_v50  ;;  %v8798_v24 = vld [vmem:[#allocation42_spill] sm:$0xff] }
 0x2ad   : > { %v2359_v17 = vsel %vm8793_vm2, %v2358_v20, %v8789_v14  ;;  %v1150_v62 = vsel %vm1148_vm14, %v1136_v54, %v1149_v53  ;;  %v2220_v18 = vmul.f32 %v2219_v58, %v6610_v9  ;;  %v2517_v38 = vmul.f32 -0.001358992, %v8794_v45  ;;  %v8797_v20 = vld [vmem:[#allocation41_spill] sm:$0xff] }
 0x2ae   : > { %v1154_v6 = vsel %vm1147_vm10, %v1150_v62, %v1153_v16  ;;  %v2214_v30 = vadd.f32 1.0, %v2213_v26  ;;  %v2365_v7 = vmul.f32 %v2364_v61, %v8790_v0  ;;  %v2372_v10 = vmul.f32 %v2371_v25, %v8790_v0 }
 0x2af   : > { %v1001_v63 = vsel %vm991_vm6, nan, %v1000_v31  ;;  %v1155_v23 = vsel %vm1145_vm3, nan, %v1154_v6  ;;  %v2221_v12 = vadd.f32 1.0, %v2220_v18  ;;  %v2224_v2 = vand.u32 3, %v2207_v33  ;;  %v8801_v6 = vld [vmem:[#allocation20_spill] sm:$0xff] }
 0x2b0   : > { %v7037_v9 = vmul.f32 %v7000_v21, %v7000_v21  ;;  %v3005_v36 = vpack.c.bf16 %v1155_v23, %v1001_v63  ;;  %v2366_v43 = vadd.f32 -0.4999988, %v2365_v7  ;;  %v2373_v32 = vadd.f32 -0.16666654, %v2372_v10  ;;  %v8803_v10 = vld [vmem:[#allocation8_spill] sm:$0xff] }
 0x2b1   : > { %v2222_v39 = vmul.f32 %v2221_v12, %v6530_v13  ;;  %v2361_v19 = vsel %vm6377_vm5, 0, %v2359_v17  ;;  %v2518_v4 = vadd.f32 0.041655596, %v2517_v38  ;;  %v2524_v52 = vmul.f32 -0.00019511016, %v8794_v45  ;;  %v8807_v12 = vld [vmem:[#allocation23_spill] sm:$0xff] }
 0x2b2   : > { %4637 = vmatmul.msk.bf16.gmra.mxu0 %vm3045_vm0, %v3005_v36  ;;  %vm2223_vm4 = vweird.f32 %v8787_v5  ;;  %v2230_v28 = vxor.u32 2147483648, %v2214_v30  ;;  %v2367_v27 = vmul.f32 %v2366_v43, %v8790_v0  ;;  %v2374_v40 = vmul.f32 %v2373_v32, %v8790_v0 }
 0x2b3   : > { %vm2226_vm7 = vcmp.eq.s32.totalorder %v2224_v2, 0  ;;  %v2227_v35 = vxor.u32 2147483648, %v2222_v39  ;;  %v2519_v54 = vmul.f32 %v2518_v4, %v8794_v45  ;;  %v2525_v13 = vadd.f32 0.008332121, %v2524_v52 }
 0x2b4   : > { %vm2229_vm9 = vcmp.eq.s32.totalorder %v2224_v2, 2  ;;  %v2368_v22 = vadd.f32 1.0, %v2367_v27  ;;  %v2375_v55 = vadd.f32 1.0, %v2374_v40  ;;  %v2378_v59 = vand.u32 3, %v2361_v19 }
 0x2b5   : > { %v2228_v8 = vsel %vm2226_vm7, %v2214_v30, %v2227_v35  ;;  %v2512_v57 = vsub.s32 4, %v8796_v29  ;;  %v2526_v37 = vmul.f32 %v2525_v13, %v8794_v45  ;;  %v2671_v47 = vmul.f32 -0.001358992, %v7037_v9 }
 0x2b6   : > { %vm2225_vm5 = vcmp.lt.s32.totalorder %v2224_v2, 2  ;;  %v2231_v14 = vsel %vm2229_vm9, %v2230_v28, %v2222_v39  ;;  %v2376_v60 = vmul.f32 %v2375_v55, %v8797_v20  ;;  %v2384_v50 = vxor.u32 2147483648, %v2368_v22 }
 0x2b7   : > { %v2232_v49 = vsel %vm2225_vm5, %v2228_v8, %v2231_v14  ;;  %vm2377_vm6 = vweird.f32 %v8792_v11  ;;  %v2520_v34 = vadd.f32 -0.4999988, %v2519_v54  ;;  %v2527_v26 = vadd.f32 -0.16666654, %v2526_v37  ;;  %v8808_v11 = vld [vmem:[#allocation27_spill] sm:$0xff]  ;;  %v8809_v37 = vld [vmem:[#allocation36_spill] sm:$0xff] }
 0x2b8   : > { %vm2379_vm12 = vcmp.lt.s32.totalorder %v2378_v59, 2  ;;  %vm2380_vm13 = vcmp.eq.s32.totalorder %v2378_v59, 0  ;;  %v2381_v0 = vxor.u32 2147483648, %v2376_v60  ;;  %v2666_v46 = vsub.s32 4, %v8798_v24 }
 0x2b9   : > { %vm2383_vm3 = vcmp.eq.s32.totalorder %v2378_v59, 2  ;;  %vm8800_vm10 = vcmp.lt.s32.totalorder %v8799_v56, 0  ;;  %v2528_v1 = vmul.f32 %v2527_v26, %v8794_v45  ;;  %v2672_v33 = vadd.f32 0.041655596, %v2671_v47 }
 0x2ba   : > { %v2513_v53 = vsel %vm8800_vm10, %v2512_v57, %v8796_v29  ;;  %v2233_v58 = vsel %vm2223_vm4, nan, %v2232_v49  ;;  %v2382_v31 = vsel %vm2380_vm13, %v2368_v22, %v2381_v0  ;;  %v2385_v17 = vsel %vm2383_vm3, %v2384_v50, %v2376_v60 }
 0x2bb   : > { %v2678_v61 = vmul.f32 -0.00019511016, %v7037_v9  ;;  %v2386_v25 = vsel %vm2379_vm12, %v2382_v31, %v2385_v17  ;;  %v2521_v62 = vmul.f32 %v2520_v34, %v8794_v45  ;;  %v2529_v16 = vadd.f32 1.0, %v2528_v1 }
 0x2bc   : > { %v2673_v18 = vmul.f32 %v2672_v33, %v7037_v9  ;;  %v2387_v38 = vsel %vm2377_vm6, nan, %v2386_v25  ;;  %vm8802_vm14 = vnez %v8801_v6  ;;  %v2667_v5 = vsel %vm2544_vm15, %v2666_v46, %v8798_v24  ;;  %v8811_v33 = vld [vmem:[#allocation11_spill] sm:$0xff] }
 0x2bd   : > { %v2515_v30 = vsel %vm8802_vm14, 0, %v2513_v53  ;;  %v2679_v7 = vadd.f32 0.008332121, %v2678_v61  ;;  %v8804_v63 = vand.u32 2147483647, %v8803_v10  ;;  %v3009_v45 = vpack.c.bf16 %v2387_v38, %v2233_v58 }
 0x2be   : > { %v2530_v2 = vmul.f32 %v2529_v16, %v8807_v12  ;;  %v2674_v36 = vadd.f32 -0.4999988, %v2673_v18  ;;  %v2825_v39 = vmul.f32 -0.001358992, %v6614_v42  ;;  %v2832_v48 = vmul.f32 -0.00019511016, %v6614_v42 }
 0x2bf   : > { %vm7072_vm1 = vcmp.le.f32.partialorder %v8804_v63, 0.7853982  ;;  %v2680_v32 = vmul.f32 %v2679_v7, %v7037_v9  ;;  %4641 = vmatmul.msk.bf16.gmra.mxu1 %vm3045_vm0, %v3009_v45  ;;  %v2522_v19 = vadd.f32 1.0, %v2521_v62  ;;  %v2532_v4 = vand.u32 3, %v2515_v30 }
 0x2c0   : > { %v7081_v43 = vsel %vm7072_vm1, %v8803_v10, %v8808_v11  ;;  %v2669_v52 = vsel %vm6971_vm11, 0, %v2667_v5  ;;  %v2675_v28 = vmul.f32 %v2674_v36, %v7037_v9  ;;  %v2826_v40 = vadd.f32 0.041655596, %v2825_v39 }
 0x2c1   : > { %v2681_v27 = vadd.f32 -0.16666654, %v2680_v32  ;;  %v2833_v35 = vadd.f32 0.008332121, %v2832_v48  ;;  %v2978_v54 = vmul.f32 %v7081_v43, %v7081_v43  ;;  %v2535_v13 = vxor.u32 2147483648, %v2530_v2 }
 0x2c2   : > { %v2676_v22 = vadd.f32 1.0, %v2675_v28  ;;  %v2827_v59 = vmul.f32 %v2826_v40, %v6614_v42  ;;  %vm2531_vm15 = vweird.f32 %v8799_v56  ;;  %vm2533_vm8 = vcmp.lt.s32.totalorder %v2532_v4, 2 }
 0x2c3   : > { %v2682_v55 = vmul.f32 %v2681_v27, %v7037_v9  ;;  %v2834_v8 = vmul.f32 %v2833_v35, %v6614_v42  ;;  %v2538_v41 = vxor.u32 2147483648, %v2522_v19  ;;  %v2686_v29 = vand.u32 3, %v2669_v52 }
 0x2c4   : > { %vm2534_vm11 = vcmp.eq.s32.totalorder %v2532_v4, 0  ;;  %v2820_v47 = vsub.s32 4, %v8809_v37  ;;  %vm2537_vm2 = vcmp.eq.s32.totalorder %v2532_v4, 2  ;;  %v2692_v60 = vxor.u32 2147483648, %v2676_v22 }
 0x2c5   : > { %v2683_v57 = vadd.f32 1.0, %v2682_v55  ;;  %v2835_v14 = vadd.f32 -0.16666654, %v2834_v8  ;;  %v2536_v20 = vsel %vm2534_vm11, %v2522_v19, %v2535_v13  ;;  %v2979_v50 = vmul.f32 -0.001358992, %v2978_v54 }
 0x2c6   : > { %v2828_v49 = vadd.f32 -0.4999988, %v2827_v59  ;;  %v2986_v26 = vmul.f32 -0.00019511016, %v2978_v54  ;;  %v2539_v0 = vsel %vm2537_vm2, %v2538_v41, %v2530_v2  ;;  %vm2685_vm4 = vweird.f32 %v8767_v44  ;;  %v7126_v55 = vld [vmem:[%s8540_s7 + $0x3] ss:$0 sm:$0xff] }
 0x2c7   : > { %v2684_v9 = vmul.f32 %v2683_v57, %v7000_v21  ;;  %v2836_v34 = vmul.f32 %v2835_v14, %v6614_v42  ;;  %vm2688_vm7 = vcmp.eq.s32.totalorder %v2686_v29, 0  ;;  %v2980_v24 = vadd.f32 0.041655596, %v2979_v50 }
 0x2c8   : > { %vm8810_vm9 = vcmp.lt.s32.totalorder %v6108_v3, 0  ;;  %v2974_v58 = vsub.s32 4, %v8811_v33  ;;  %v2540_v31 = vsel %vm2533_vm8, %v2536_v20, %v2539_v0  ;;  %vm2691_vm5 = vcmp.eq.s32.totalorder %v2686_v29, 2 }
 0x2c9   : > { %v2689_v46 = vxor.u32 2147483648, %v2684_v9  ;;  %v2821_v53 = vsel %vm8810_vm9, %v2820_v47, %v8809_v37  ;;  %v2837_v1 = vadd.f32 1.0, %v2836_v34  ;;  %v2981_v21 = vmul.f32 %v2980_v24, %v2978_v54 }
 0x2ca   : > { %v2987_v17 = vadd.f32 0.008332121, %v2986_v26  ;;  %vm2687_vm6 = vcmp.lt.s32.totalorder %v2686_v29, 2  ;;  %v2693_v25 = vsel %vm2691_vm5, %v2692_v60, %v2684_v9  ;;  %v2829_v62 = vmul.f32 %v2828_v49, %v6614_v42 }
 0x2cb   : > { %v2690_v61 = vsel %vm2688_vm7, %v2676_v22, %v2689_v46  ;;  %vm8812_vm12 = vnez %v8734_v15  ;;  %v2982_v38 = vadd.f32 -0.4999988, %v2981_v21  ;;  %v2541_v30 = vsel %vm2531_vm15, nan, %v2540_v31 }
 0x2cc   : > { %v2694_v16 = vsel %vm2687_vm6, %v2690_v61, %v2693_v25  ;;  %v2823_v18 = vsel %vm8812_vm12, 0, %v2821_v53  ;;  %v2988_v6 = vmul.f32 %v2987_v17, %v2978_v54  ;;  %v2838_v7 = vmul.f32 %v2837_v1, %v6594_v51 }
 0x2cd   : > { %v2695_v5 = vsel %vm2685_vm4, nan, %v2694_v16  ;;  %vm8813_vm13 = vcmp.lt.s32.totalorder %v8803_v10, 0  ;;  %v2983_v42 = vmul.f32 %v2982_v38, %v2978_v54  ;;  %v2830_v2 = vadd.f32 1.0, %v2829_v62 }
 0x2ce   : > { %v2975_v63 = vsel %vm8813_vm13, %v2974_v58, %v8811_v33  ;;  %v3010_v45 = vpack.c.bf16 %v2695_v5, %v2541_v30  ;;  %v2989_v12 = vadd.f32 -0.16666654, %v2988_v6  ;;  %v2840_v15 = vand.u32 3, %v2823_v18 }
 0x2cf   : > { %v2977_v56 = vsel %vm7072_vm1, 0, %v2975_v63  ;;  %v2843_v11 = vxor.u32 2147483648, %v2838_v7  ;;  %v2984_v44 = vadd.f32 1.0, %v2983_v42  ;;  %v2846_v39 = vxor.u32 2147483648, %v2830_v2 }
 0x2d0   : > { %4642 = vmatmul.msk.bf16.gmra.mxu1 %vm3045_vm0, %v3010_v45  ;;  %v2990_v36 = vmul.f32 %v2989_v12, %v2978_v54  ;;  %v2994_v51 = vand.u32 3, %v2977_v56  ;;  %vm2842_vm3 = vcmp.eq.s32.totalorder %v2840_v15, 0  ;;  %vm2845_vm10 = vcmp.eq.s32.totalorder %v2840_v15, 2 }
 0x2d1   : > { %v2844_v19 = vsel %vm2842_vm3, %v2830_v2, %v2843_v11  ;;  %v3000_v4 = vxor.u32 2147483648, %v2984_v44  ;;  %vm2841_vm14 = vcmp.lt.s32.totalorder %v2840_v15, 2  ;;  %v2847_v28 = vsel %vm2845_vm10, %v2846_v39, %v2838_v7 }
 0x2d2   : > { %v2991_v32 = vadd.f32 1.0, %v2990_v36  ;;  %vm2996_vm15 = vcmp.eq.s32.totalorder %v2994_v51, 0  ;;  %v2848_v27 = vsel %vm2841_vm14, %v2844_v19, %v2847_v28  ;;  %vm2999_vm8 = vcmp.eq.s32.totalorder %v2994_v51, 2 }
 0x2d3   : > { %vm2995_vm1 = vcmp.lt.s32.totalorder %v2994_v51, 2  ;;  %vm2839_vm11 = vweird.f32 %v6108_v3  ;;  %vm2993_vm2 = vweird.f32 %v8803_v10  ;;  %v4726_v3 = vld [vmem:[%s8540_s7] ss:$0 sm:$0xff]  ;;  %vm385_vm4 = vcmask 519168  }
 0x2d4   : > { %v2992_v48 = vmul.f32 %v2991_v32, %v7081_v43  ;;  %v2849_v54 = vsel %vm2839_vm11, nan, %v2848_v27 }
 0x2d6   : > { %v2997_v52 = vxor.u32 2147483648, %v2992_v48  ;;  %v3001_v23 = vsel %vm2999_vm8, %v3000_v4, %v2992_v48 }
 0x2d8   : > { %v2998_v40 = vsel %vm2996_vm15, %v2984_v44, %v2997_v52 }
 0x2d9   : > { %v3002_v35 = vsel %vm2995_vm1, %v2998_v40, %v3001_v23 }
 0x2da   : > { %v3003_v13 = vsel %vm2993_vm2, nan, %v3002_v35 }
 0x2db   : > { %v3011_v43 = vpack.c.bf16 %v3003_v13, %v2849_v54 }
 0x2e0   : > { %4643 = vmatmul.msk.bf16.gmra.mxu1 %vm3045_vm0, %v3011_v43 }
 0x2e6   : > { %v381_v22 = vpop.f32.mrf.mxu0 }
 0x2e7   : > { %v7139_v37 = vadd.f32 %v4726_v3, %v381_v22 }
 0x2e9   : > { %v386_v20 = vsel %vm385_vm4, %v7139_v37, 0.0  ;;  %v397_v50 = vmul.f32 %v7139_v37, %v7139_v37 }
 0x2eb   : > { %v398_v49 = vsel %vm385_vm4, %v397_v50, 0.0 }
 0x2ee   : > { %v383_v8 = vpop.f32.mrf.mxu0 }
 0x2f2   : > { %v3089_v59 = vpop.f32.mrf.mxu1 }
 0x2f3   : > { %v7129_v41 = vadd.f32 %v7126_v55, %v3089_v59 }
 0x2f5   : > { %v3131_v10 = vsel %vm3045_vm0, %v7129_v41, 0.0  ;;  %v3187_v29 = vmul.f32 %v7129_v41, %v7129_v41 }
 0x2f6   : > { %3132 = vadd.xlane.f32.xlu1 %v3131_v10 }
 0x2f7   : > { %v3211_v57 = vsel %vm3045_vm0, %v3187_v29, 0.0 }
 0x2f8   : > { %3212 = vadd.xlane.f32.xlu0 %v3211_v57 }
 0x2fa   : > { %v3091_v47 = vpop.f32.mrf.mxu1 }
 0x2fb   : > { %v7142_v14 = vadd.f32 %v7126_v55, %v3091_v47 }
 0x2fd   : > { %v3134_v60 = vsel %vm3045_vm0, %v7142_v14, 0.0  ;;  %v3188_v9 = vmul.f32 %v7142_v14, %v7142_v14 }
 0x2fe   : > { %3135 = vadd.xlane.f32.xlu2 %v3134_v60  ;;  %387 = vadd.xlane.f32.xlu1 %v386_v20 }
 0x2ff   : > { %v3214_v34 = vsel %vm3045_vm0, %v3188_v9, 0.0 }
 0x306   : > { %v3094_v26 = vpop.f32.mrf.mxu1  ;;  %3215 = vadd.xlane.f32.xlu2 %v3214_v34  ;;  %399 = vadd.xlane.f32.xlu1 %v398_v49 }
 0x307   : > { %v7155_v0 = vadd.f32 %v7126_v55, %v3094_v26 }
 0x309   : > { %v3137_v24 = vsel %vm3045_vm0, %v7155_v0, 0.0  ;;  %v3189_v33 = vmul.f32 %v7155_v0, %v7155_v0 }
 0x30b   : > { %v3217_v58 = vsel %vm3045_vm0, %v3189_v33, 0.0 }
 0x30e   : > { %v3096_v46 = vpop.f32.mrf.mxu1  ;;  %3138 = vadd.xlane.f32.xlu2 %v3137_v24 }
 0x30f   : > { %v7160_v53 = vadd.f32 %v7126_v55, %v3096_v46 }
 0x310   : > { %v3079_v48 = vpop.f32.mrf.mxu0 }
 0x311   : > { %v3140_v1 = vsel %vm3045_vm0, %v7160_v53, 0.0  ;;  %v3190_v31 = vmul.f32 %v7160_v53, %v7160_v53  ;;  %v7237_v47 = vadd.f32 %v7126_v55, %v3079_v48 }
 0x312   : > { %3141 = vadd.xlane.f32.xlu0 %v3140_v1 }
 0x313   : > { %v3220_v21 = vsel %vm3045_vm0, %v3190_v31, 0.0  ;;  %v3183_v9 = vmul.f32 %v7237_v47, %v7237_v47  ;;  %v3119_v34 = vsel %vm3045_vm0, %v7237_v47, 0.0 }
 0x315   : > { %v3199_v46 = vsel %vm3045_vm0, %v3183_v9, 0.0 }
 0x316   : > { %3218 = vadd.xlane.f32.xlu2 %v3217_v58  ;;  %v4889_v58 = vmov 64.0  }
 0x317   : > { %4738 = vrcp.f32 %v4889_v58 }
 0x318   : > { %v3081_v23 = vpop.f32.mrf.mxu0 }
 0x319   : > { %v7227_v3 = vadd.f32 %v7126_v55, %v3081_v23  ;;  %v4729_v23 = vld [vmem:[%s8540_s7 + $0x1] ss:$0 sm:$0xff] }
 0x31a   : > { %3221 = vadd.xlane.f32.xlu0 %v3220_v21 }
 0x31b   : > { %v3122_v20 = vsel %vm3045_vm0, %v7227_v3, 0.0  ;;  %v3184_v1 = vmul.f32 %v7227_v3, %v7227_v3 }
 0x31d   : > { %v3202_v31 = vsel %vm3045_vm0, %v3184_v1, 0.0 }
 0x321   : > { %v3099_v17 = vpop.f32.mrf.mxu1 }
 0x322   : > { %v7171_v61 = vadd.f32 %v7126_v55, %v3099_v17  ;;  %v4739_v17 = vpop.eup %4738 }
 0x323   : > { %vm394_vm7 = vweird.f32 %v4739_v17 }
 0x324   : > { %v3143_v25 = vsel %vm3045_vm0, %v7171_v61, 0.0  ;;  %v3191_v62 = vmul.f32 %v7171_v61, %v7171_v61 }
 0x325   : > { %3144 = vadd.xlane.f32.xlu1 %v3143_v25 }
 0x326   : > { %v3223_v16 = vsel %vm3045_vm0, %v3191_v62, 0.0  ;;  %v390_v62 = vmul.f32 64.0, %v4739_v17 }
 0x327   : > { %3224 = vadd.xlane.f32.xlu0 %v3223_v16 }
 0x329   : > { %v3101_v18 = vpop.f32.mrf.mxu1 }
 0x32a   : > { %v7179_v38 = vadd.f32 %v7126_v55, %v3101_v18 }
 0x32c   : > { %v3146_v6 = vsel %vm3045_vm0, %v7179_v38, 0.0  ;;  %v3192_v30 = vmul.f32 %v7179_v38, %v7179_v38 }
 0x32d   : > { %3147 = vadd.xlane.f32.xlu2 %v3146_v6  ;;  %v391_v6 = vsub.f32 1.0, %v390_v62 }
 0x32e   : > { %v3226_v5 = vsel %vm3045_vm0, %v3192_v30, 0.0 }
 0x32f   : > { %3227 = vadd.xlane.f32.xlu1 %v3226_v5  ;;  %v3084_v59 = vpop.f32.mrf.mxu0  ;;  %v392_v30 = vmul.f32 %v4739_v17, %v391_v6 }
 0x330   : > { %v7243_v50 = vadd.f32 %v7126_v55, %v3084_v59 }
 0x332   : > { %v3125_v24 = vsel %vm3045_vm0, %v7243_v50, 0.0  ;;  %v3185_v25 = vmul.f32 %v7243_v50, %v7243_v50 }
 0x334   : > { %v3205_v18 = vsel %vm3045_vm0, %v3185_v25, 0.0 }
 0x337   : > { %v3086_v49 = vpop.f32.mrf.mxu0 }
 0x338   : > { %v7250_v26 = vadd.f32 %v7126_v55, %v3086_v49 }
 0x33a   : > { %v3186_v33 = vmul.f32 %v7250_v26, %v7250_v26  ;;  %v3128_v21 = vsel %vm3045_vm0, %v7250_v26, 0.0 }
 0x33c   : > { %v3104_v7 = vpop.f32.mrf.mxu1 }
 0x33d   : > { %v7187_v63 = vadd.f32 %v7126_v55, %v3104_v7  ;;  %v393_v7 = vadd.f32 %v4739_v17, %v392_v30 }
 0x33f   : > { %v3149_v45 = vsel %vm3045_vm0, %v7187_v63, 0.0  ;;  %v3193_v42 = vmul.f32 %v7187_v63, %v7187_v63 }
 0x340   : > { %3150 = vadd.xlane.f32.xlu2 %v3149_v45  ;;  %v7266_v45 = vsel %vm394_vm7, %v4739_v17, %v393_v7 }
 0x341   : > { %v3229_v12 = vsel %vm3045_vm0, %v3193_v42, 0.0 }
 0x342   : > { %3230 = vadd.xlane.f32.xlu1 %v3229_v12 }
 0x344   : > { %v3106_v2 = vpop.f32.mrf.mxu1 }
 0x345   : > { %v7195_v15 = vadd.f32 %v7126_v55, %v3106_v2 }
 0x347   : > { %v3152_v56 = vsel %vm3045_vm0, %v7195_v15, 0.0  ;;  %v3194_v36 = vmul.f32 %v7195_v15, %v7195_v15 }
 0x348   : > { %3153 = vadd.xlane.f32.xlu0 %v3152_v56 }
 0x349   : > { %v3232_v11 = vsel %vm3045_vm0, %v3194_v36, 0.0 }
 0x34a   : > { %3233 = vadd.xlane.f32.xlu2 %v3232_v11 }
 0x34d   : > { %v3109_v44 = vpop.f32.mrf.mxu1 }
 0x34e   : > { %v7203_v32 = vadd.f32 %v7126_v55, %v3109_v44 }
 0x350   : > { %v3155_v39 = vsel %vm3045_vm0, %v7203_v32, 0.0  ;;  %v3195_v51 = vmul.f32 %v7203_v32, %v7203_v32 }
 0x351   : > { %3156 = vadd.xlane.f32.xlu0 %v3155_v39 }
 0x352   : > { %v3235_v19 = vsel %vm3045_vm0, %v3195_v51, 0.0 }
 0x353   : > { %3236 = vadd.xlane.f32.xlu2 %v3235_v19 }
 0x355   : > { %v3111_v4 = vpop.f32.mrf.mxu1 }
 0x356   : > { %v7211_v52 = vadd.f32 %v7126_v55, %v3111_v4 }
 0x358   : > { %v3158_v28 = vsel %vm3045_vm0, %v7211_v52, 0.0  ;;  %v3196_v27 = vmul.f32 %v7211_v52, %v7211_v52 }
 0x359   : > { %3159 = vadd.xlane.f32.xlu1 %v3158_v28 }
 0x35a   : > { %v3238_v40 = vsel %vm3045_vm0, %v3196_v27, 0.0 }
 0x35b   : > { %3239 = vadd.xlane.f32.xlu0 %v3238_v40 }
 0x35d   : > { %v3114_v35 = vpop.f32.mrf.mxu1 }
 0x35e   : > { %v7219_v54 = vadd.f32 %v7126_v55, %v3114_v35 }
 0x360   : > { %v3161_v13 = vsel %vm3045_vm0, %v7219_v54, 0.0  ;;  %v3197_v43 = vmul.f32 %v7219_v54, %v7219_v54 }
 0x361   : > { %3162 = vadd.xlane.f32.xlu1 %v3161_v13 }
 0x362   : > { %v3241_v22 = vsel %vm3045_vm0, %v3197_v43, 0.0  ;;  %v4730_v43 = vld [vmem:[%s8540_s7 + $0x2] ss:$0 sm:$0xff] }
 0x363   : > { %3242 = vadd.xlane.f32.xlu0 %v3241_v22 }
 0x365   : > { %v3116_v8 = vpop.f32.mrf.mxu1 }
 0x366   : > { %v7230_v10 = vadd.f32 %v7126_v55, %v3116_v8  ;;  %v3208_v55 = vsel %vm3045_vm0, %v3186_v33, 0.0 }
 0x368   : > { %v3164_v29 = vsel %vm3045_vm0, %v7230_v10, 0.0  ;;  %v3198_v57 = vmul.f32 %v7230_v10, %v7230_v10 }
 0x369   : > { %3165 = vadd.xlane.f32.xlu2 %v3164_v29  ;;  %v3133_v16 = vpop.xlane.xlu1 %3132 }
 0x36a   : > { %v3244_v60 = vsel %vm3045_vm0, %v3198_v57, 0.0  ;;  %v7275_v13 = vmul.f32 %v3133_v16, %v7266_v45 }
 0x36b   : > { %3123 = vadd.xlane.f32.xlu0 %v3122_v20  ;;  %3245 = vadd.xlane.f32.xlu1 %v3244_v60  ;;  %v3213_v59 = vpop.xlane.xlu0 %3212 }
 0x36c   : > { %v3251_v57 = vmul.f32 %v3213_v59, %v7266_v45 }
 0x371   : > { %3120 = vadd.xlane.f32.xlu2 %v3119_v34  ;;  %v388_v5 = vpop.xlane.xlu1 %387  ;;  %v3136_v19 = vpop.xlane.xlu2 %3135 }
 0x372   : > { %v396_v42 = vmul.f32 %v7266_v45, %v388_v5  ;;  %v7284_v20 = vmul.f32 %v3136_v19, %v7266_v45 }
 0x373   : > { %3126 = vadd.xlane.f32.xlu0 %v3125_v24  ;;  %3200 = vadd.xlane.f32.xlu1 %v3199_v46 }
 0x374   : > { %v402_v12 = vmul.f32 %v396_v42, %v396_v42  ;;  %v405_v40 = vsub.f32 %v7139_v37, %v396_v42  ;;  %v3267_v37 = vmul.f32 %v7275_v13, %v7275_v13  ;;  %v3268_v24 = vmul.f32 %v7284_v20, %v7284_v20 }
 0x376   : > { %v3283_v34 = vsub.f32 %v3251_v57, %v3267_v37 }
 0x378   : > { %v3299_v1 = vmax.f32 %v3283_v34, 0.0 }
 0x379   : > { %3203 = vadd.xlane.f32.xlu2 %v3202_v31  ;;  %v400_v2 = vpop.xlane.xlu1 %399  ;;  %v3216_v29 = vpop.xlane.xlu2 %3215 }
 0x37a   : > { %v401_v56 = vmul.f32 %v400_v2, %v7266_v45  ;;  %v3252_v9 = vmul.f32 %v3216_v29, %v7266_v45  ;;  %v3331_v31 = vadd.f32 1e-05, %v3299_v1 }
 0x37b   : > { %3209 = vadd.xlane.f32.xlu0 %v3208_v55  ;;  %3129 = vadd.xlane.f32.xlu1 %v3128_v21 }
 0x37c   : > { %v403_v36 = vsub.f32 %v401_v56, %v402_v12  ;;  %v3284_v46 = vsub.f32 %v3252_v9, %v3268_v24  ;;  %vm3389_vm13 = vweird.f32 %v3331_v31  ;;  %v4696_v9 = vld [vmem:[%s8538_s5 + $0x18] sm:$0xff] }
 0x37d   : > { %4701 = vmatpush.bf16.msra.mxu2 %v4696_v9  ;;  %3950 = vmatpush.bf16.msra.mxu0 %v4696_v9 }
 0x37e   : > { %v404_v11 = vmax.f32 %v403_v36, 0.0  ;;  %v3300_v33 = vmax.f32 %v3284_v46, 0.0 }
 0x380   : > { %v406_v44 = vadd.f32 1e-05, %v404_v11  ;;  %v3332_v21 = vadd.f32 1e-05, %v3300_v33 }
 0x381   : > { %3206 = vadd.xlane.f32.xlu2 %v3205_v18  ;;  %v3139_v58 = vpop.xlane.xlu2 %3138 }
 0x382   : > { %4740 = vrsqrt.f32 %v406_v44  ;;  %vm413_vm9 = vweird.f32 %v406_v44  ;;  %v7291_v62 = vmul.f32 %v3139_v58, %v7266_v45  ;;  %vm3399_vm14 = vweird.f32 %v3332_v21 }
 0x383   : > { %4742 = vrsqrt.f32 %v3331_v31 }
 0x384   : > { %4744 = vrsqrt.f32 %v3332_v21  ;;  %v3269_v42 = vmul.f32 %v7291_v62, %v7291_v62 }
 0x385   : > { %v3142_v55 = vpop.xlane.xlu0 %3141 }
 0x386   : > { %v7294_v18 = vmul.f32 %v3142_v55, %v7266_v45  ;;  %v3315_v55 = vsub.f32 %v7129_v41, %v7275_v13 }
 0x388   : > { %v4741_v39 = vpop.eup %4740  ;;  %v3270_v12 = vmul.f32 %v7294_v18, %v7294_v18 }
 0x389   : > { %v408_v51 = vmul.f32 %v4741_v39, %v406_v44  ;;  %vm414_vm5 = vweird.f32 %v4741_v39  ;;  %v3219_v17 = vpop.xlane.xlu2 %3218  ;;  %v4743_v25 = vpop.eup %4742 }
 0x38a   : > { %vm415_vm6 = vmor %vm413_vm9, %vm414_vm5  ;;  %v3253_v6 = vmul.f32 %v3219_v17, %v7266_v45  ;;  %v4745_v30 = vpop.eup %4744  ;;  %v3384_v5 = vmul.f32 %v4743_v25, %v3331_v31  ;;  %vm3390_vm12 = vweird.f32 %v4743_v25 }
 0x38b   : > { %v409_v48 = vmul.f32 %v4741_v39, %v408_v51  ;;  %v3394_v2 = vmul.f32 %v4745_v30, %v3332_v21  ;;  %vm7317_vm3 = vmor %vm3389_vm13, %vm3390_vm12  ;;  %vm3400_vm10 = vweird.f32 %v4745_v30  ;;  %v7338_v21 = vld [vmem:[%s8540_s7 + $0x4] ss:$0 sm:$0xff] }
 0x38c   : > { %v3285_v56 = vsub.f32 %v3253_v6, %v3269_v42  ;;  %v3385_v36 = vmul.f32 %v4743_v25, %v3384_v5  ;;  %vm3401_vm15 = vmor %vm3399_vm14, %vm3400_vm10  ;;  %v3316_v6 = vsub.f32 %v7142_v14, %v7284_v20  ;;  %v7354_v14 = vld [vmem:[%s8540_s7 + $0x5] ss:$0 sm:$0xff] }
 0x38d   : > { %v410_v4 = vmul.f32 0.5, %v409_v48  ;;  %v3222_v16 = vpop.xlane.xlu0 %3221 }
 0x38e   : > { %v3254_v7 = vmul.f32 %v3222_v16, %v7266_v45  ;;  %v3301_v51 = vmax.f32 %v3285_v56, 0.0  ;;  %v3386_v48 = vmul.f32 0.5, %v3385_v36 }
 0x38f   : > { %v411_v28 = vsub.f32 1.5, %v410_v4 }
 0x390   : > { %v3286_v11 = vsub.f32 %v3254_v7, %v3270_v12 }
 0x391   : > { %v412_v27 = vmul.f32 %v4741_v39, %v411_v28 }
 0x392   : > { %v3302_v19 = vmax.f32 %v3286_v11, 0.0 }
 0x393   : > { %v416_v35 = vsel %vm415_vm6, %v4741_v39, %v412_v27  ;;  %v3395_v39 = vmul.f32 %v4745_v30, %v3394_v2 }
 0x394   : > { %v417_v22 = vmul.f32 %v416_v35, %v405_v40  ;;  %v7302_v40 = vadd.f32 1e-05, %v3301_v51  ;;  %v3387_v35 = vsub.f32 1.5, %v3386_v48 }
 0x395   : > { %v3396_v27 = vmul.f32 0.5, %v3395_v39 }
 0x396   : > { %v419_v8 = vmul.f32 %v4729_v23, %v417_v22  ;;  %4746 = vrsqrt.f32 %v7302_v40  ;;  %v3388_v37 = vmul.f32 %v4743_v25, %v3387_v35  ;;  %vm3409_vm11 = vweird.f32 %v7302_v40 }
 0x398   : > { %v421_v60 = vadd.f32 %v4730_v43, %v419_v8  ;;  %v3145_v44 = vpop.xlane.xlu1 %3144  ;;  %v7307_v43 = vadd.f32 1e-05, %v3302_v19  ;;  %v3397_v8 = vsub.f32 1.5, %v3396_v27  ;;  %v3392_v34 = vsel %vm7317_vm3, %v4743_v25, %v3388_v37 }
 0x399   : > { %v7305_v23 = vmul.f32 %v3145_v44, %v7266_v45  ;;  %v3507_v25 = vmul.f32 %v3392_v34, %v3315_v55 }
 0x39a   : > { %v422_v49 = vmax.f32 %v421_v60, 0.0  ;;  %v3225_v28 = vpop.xlane.xlu0 %3224  ;;  %4748 = vrsqrt.f32 %v7307_v43 }
 0x39b   : > { %v3255_v22 = vmul.f32 %v3225_v28, %v7266_v45  ;;  %v3271_v29 = vmul.f32 %v7305_v23, %v7305_v23  ;;  %v3524_v20 = vmul.f32 %v7338_v21, %v3507_v25 }
 0x39c   : > { %423 = vst.msk [vmem:[#allocation2] sm:$0xf] %vm385_vm4, %v422_v49  ;;  %v3398_v49 = vmul.f32 %v4745_v30, %v3397_v8  ;;  %v7323_v46 = vpop.eup %4746  ;;  %vm3419_vm4 = vweird.f32 %v7307_v43 }
 0x39d   : > { %v3287_v60 = vsub.f32 %v3255_v22, %v3271_v29  ;;  %v3404_v5 = vmul.f32 %v7323_v46, %v7302_v40  ;;  %vm3410_vm8 = vweird.f32 %v7323_v46 }
 0x39e   : > { %v3402_v17 = vsel %vm3401_vm15, %v4745_v30, %v3398_v49  ;;  %vm3411_vm2 = vmor %vm3409_vm11, %vm3410_vm8 }
 0x39f   : > { %v3303_v33 = vmax.f32 %v3287_v60, 0.0  ;;  %v3508_v12 = vmul.f32 %v3402_v17, %v3316_v6  ;;  %v3405_v36 = vmul.f32 %v7323_v46, %v3404_v5 }
 0x3a0   : > { %v3148_v4 = vpop.xlane.xlu2 %3147  ;;  %v7328_v31 = vpop.eup %4748 }
 0x3a1   : > { %v7315_v57 = vmul.f32 %v3148_v4, %v7266_v45  ;;  %v3414_v41 = vmul.f32 %v7328_v31, %v7307_v43  ;;  %v7346_v13 = vadd.f32 1e-05, %v3303_v33  ;;  %v3525_v48 = vmul.f32 %v7338_v21, %v3508_v12 }
 0x3a2   : > { %v3228_v59 = vpop.xlane.xlu1 %3227  ;;  %v3541_v4 = vadd.f32 %v7354_v14, %v3524_v20  ;;  %v3406_v28 = vmul.f32 0.5, %v3405_v36  ;;  %vm3420_vm1 = vweird.f32 %v7328_v31  ;;  %v3317_v20 = vsub.f32 %v7155_v0, %v7291_v62  ;;  %v4695_v62 = vld [vmem:[%s8538_s5 + $0x10] sm:$0xff] }
 0x3a3   : > { %v3272_v1 = vmul.f32 %v7315_v57, %v7315_v57  ;;  %v3256_v58 = vmul.f32 %v3228_v59, %v7266_v45  ;;  %v3415_v39 = vmul.f32 %v7328_v31, %v3414_v41  ;;  %4750 = vrsqrt.f32 %v7346_v13  ;;  %vm3421_vm7 = vmor %vm3419_vm4, %vm3420_vm1  ;;  %4702 = vmatpush.bf16.msra.mxu2 %v4695_v62  ;;  %3951 = vmatpush.bf16.msra.mxu0 %v4695_v62 }
 0x3a4   : > { %v3542_v8 = vadd.f32 %v7354_v14, %v3525_v48  ;;  %v4648_v49 = vmul.f32 -1.442695, %v3541_v4  ;;  %v3407_v34 = vsub.f32 1.5, %v3406_v28  ;;  %vm3429_vm5 = vweird.f32 %v7346_v13 }
 0x3a5   : > { %v3288_v30 = vsub.f32 %v3256_v58, %v3272_v1  ;;  %v3416_v22 = vmul.f32 0.5, %v3415_v39  ;;  %v3318_v39 = vsub.f32 %v7160_v53, %v7294_v18 }
 0x3a6   : > { %v4649_v58 = vmul.f32 -1.442695, %v3542_v8  ;;  %v3408_v6 = vmul.f32 %v7323_v46, %v3407_v34 }
 0x3a7   : > { %v3304_v51 = vmax.f32 %v3288_v30, 0.0  ;;  %v3417_v1 = vsub.f32 1.5, %v3416_v22 }
 0x3a9   : > { %v7368_v59 = vadd.f32 1e-05, %v3304_v51  ;;  %v7371_v29 = vpop.eup %4750 }
 0x3aa   : > { %v3424_v55 = vmul.f32 %v7371_v29, %v7346_v13  ;;  %vm3430_vm9 = vweird.f32 %v7371_v29  ;;  %v3319_v13 = vsub.f32 %v7171_v61, %v7305_v23  ;;  %v3320_v61 = vsub.f32 %v7179_v38, %v7315_v57  ;;  %v4693_v23 = vld [vmem:[%s8538_s5] sm:$0xff] }
 0x3ab   : > { %4752 = vrsqrt.f32 %v7368_v59  ;;  %vm3431_vm6 = vmor %vm3429_vm5, %vm3430_vm9  ;;  %vm3439_vm13 = vweird.f32 %v7368_v59 }
 0x3ac   : > { %4754 = vpow2.f32 %v4648_v49 }
 0x3ad   : > { %4756 = vpow2.f32 %v4649_v58 }
 0x3b1   : > { %v7393_v12 = vpop.eup %4752 }
 0x3b2   : > { %v3434_v43 = vmul.f32 %v7393_v12, %v7368_v59  ;;  %vm3440_vm12 = vweird.f32 %v7393_v12 }
 0x3b3   : > { %v3151_v24 = vpop.xlane.xlu2 %3150  ;;  %vm7475_vm3 = vmor %vm3439_vm13, %vm3440_vm12 }
 0x3b4   : > { %v7333_v16 = vmul.f32 %v3151_v24, %v7266_v45 }
 0x3b5   : > { %v3231_v7 = vpop.xlane.xlu1 %3230 }
 0x3b6   : > { %v3273_v2 = vmul.f32 %v7333_v16, %v7333_v16  ;;  %v3257_v56 = vmul.f32 %v3231_v7, %v7266_v45  ;;  %v3418_v7 = vmul.f32 %v7328_v31, %v3417_v1 }
 0x3b8   : > { %v3289_v19 = vsub.f32 %v3257_v56, %v3273_v2  ;;  %v3412_v2 = vsel %vm3411_vm2, %v7323_v46, %v3408_v6  ;;  %v3422_v36 = vsel %vm3421_vm7, %v7328_v31, %v3418_v7 }
 0x3b9   : > { %v3509_v48 = vmul.f32 %v3412_v2, %v3317_v20  ;;  %v3510_v46 = vmul.f32 %v3422_v36, %v3318_v39 }
 0x3ba   : > { %v3305_v37 = vmax.f32 %v3289_v19, 0.0 }
 0x3bb   : > { %v3154_v42 = vpop.xlane.xlu0 %3153  ;;  %v3527_v9 = vmul.f32 %v7338_v21, %v3510_v46 }
 0x3bc   : > { %v7359_v11 = vmul.f32 %v3154_v42, %v7266_v45  ;;  %v7382_v25 = vadd.f32 1e-05, %v3305_v37  ;;  %v3425_v42 = vmul.f32 %v7371_v29, %v3424_v55  ;;  %v3526_v37 = vmul.f32 %v7338_v21, %v3509_v48 }
 0x3bd   : > { %v3234_v44 = vpop.xlane.xlu2 %3233 }
 0x3be   : > { %v3274_v27 = vmul.f32 %v7359_v11, %v7359_v11  ;;  %v3258_v35 = vmul.f32 %v3234_v44, %v7266_v45  ;;  %4758 = vrsqrt.f32 %v7382_v25  ;;  %v4755_v44 = vpop.eup %4754  ;;  %v3426_v51 = vmul.f32 0.5, %v3425_v42 }
 0x3bf   : > { %v4757_v19 = vpop.eup %4756  ;;  %v7410_v28 = vadd.f32 1.0, %v4755_v44  ;;  %v3543_v6 = vadd.f32 %v7354_v14, %v3526_v37  ;;  %vm3449_vm10 = vweird.f32 %v7382_v25 }
 0x3c0   : > { %v3290_v24 = vsub.f32 %v3258_v35, %v3274_v27  ;;  %v3427_v18 = vsub.f32 1.5, %v3426_v51  ;;  %v3435_v27 = vmul.f32 %v7393_v12, %v3434_v43  ;;  %v7420_v8 = vadd.f32 1.0, %v4757_v19 }
 0x3c1   : > { %vm3682_vm8 = vweird.f32 %v7410_v28 }
 0x3c2   : > { %v3306_v5 = vmax.f32 %v3290_v24, 0.0  ;;  %v3428_v58 = vmul.f32 %v7371_v29, %v3427_v18  ;;  %v3436_v55 = vmul.f32 0.5, %v3435_v27  ;;  %vm3697_vm4 = vweird.f32 %v7420_v8 }
 0x3c4   : > { %v3157_v60 = vpop.xlane.xlu0 %3156  ;;  %v7398_v56 = vadd.f32 1e-05, %v3306_v5  ;;  %v7408_v4 = vpop.eup %4758  ;;  %v3544_v5 = vadd.f32 %v7354_v14, %v3527_v9  ;;  %v3432_v42 = vsel %vm3431_vm6, %v7371_v29, %v3428_v58  ;;  %v3437_v2 = vsub.f32 1.5, %v3436_v55 }
 0x3c5   : > { %v7378_v33 = vmul.f32 %v3157_v60, %v7266_v45  ;;  %v4694_v60 = vld [vmem:[%s8538_s5 + $0x8] sm:$0xff]  ;;  %v3444_v49 = vmul.f32 %v7408_v4, %v7382_v25  ;;  %v3511_v43 = vmul.f32 %v3432_v42, %v3319_v13  ;;  %vm3450_vm14 = vweird.f32 %v7408_v4 }
 0x3c6   : > { %v3237_v17 = vpop.xlane.xlu2 %3236  ;;  %4760 = vrsqrt.f32 %v7398_v56  ;;  %4703 = vmatpush.bf16.msra.mxu2 %v4694_v60  ;;  %3952 = vmatpush.bf16.msra.mxu0 %v4694_v60  ;;  %v4651_v44 = vmul.f32 -1.442695, %v3544_v5  ;;  %v7458_v29 = vmul.f32 %v7393_v12, %v3437_v2  ;;  %v3688_v58 = vand.u32 2147483648, %v7410_v28  ;;  %vm7524_vm5 = vmor %vm3449_vm10, %vm3450_vm14 }
 0x3c7   : > { %v3275_v41 = vmul.f32 %v7378_v33, %v7378_v33  ;;  %v3259_v30 = vmul.f32 %v3237_v17, %v7266_v45  ;;  %4762 = vrcp.f32 %v7410_v28  ;;  %v3445_v7 = vmul.f32 %v7408_v4, %v3444_v49 }
 0x3c8   : > { %4764 = vrcp.f32 %v7420_v8  ;;  %v3442_v59 = vsel %vm7475_vm3, %v7393_v12, %v7458_v29  ;;  %v3703_v42 = vand.u32 2147483648, %v7420_v8  ;;  %v3689_v29 = vor.u32 1.1754944e-38, %v3688_v58 }
 0x3c9   : > { %v3291_v40 = vsub.f32 %v3259_v30, %v3275_v41  ;;  %v3446_v39 = vmul.f32 0.5, %v3445_v7  ;;  %vm3459_vm6 = vweird.f32 %v7398_v56  ;;  %v3321_v25 = vsub.f32 %v7187_v63, %v7333_v16 }
 0x3ca   : > { %4704 = vmatpush.bf16.msra.mxu2 %v4693_v23  ;;  %3953 = vmatpush.bf16.msra.mxu0 %v4693_v23  ;;  %v3704_v18 = vor.u32 1.1754944e-38, %v3703_v42  ;;  %v3322_v63 = vsub.f32 %v7195_v15, %v7359_v11 }
 0x3cb   : > { %v3307_v0 = vmax.f32 %v3291_v40, 0.0  ;;  %v4650_v40 = vmul.f32 -1.442695, %v3543_v6  ;;  %v3447_v62 = vsub.f32 1.5, %v3446_v39  ;;  %v3686_v6 = vand.u32 2147483647, %v7410_v28 }
 0x3cc   : > { %v3160_v31 = vpop.xlane.xlu1 %3159  ;;  %v7434_v1 = vpop.eup %4760 }
 0x3cd   : > { %v7417_v35 = vmul.f32 %v3160_v31, %v7266_v45  ;;  %v7432_v24 = vadd.f32 1e-05, %v3307_v0  ;;  %v3454_v30 = vmul.f32 %v7434_v1, %v7398_v56  ;;  %v7449_v36 = vpop.eup %4762  ;;  %vm3687_vm2 = vcmp.eq.f32.partialorder %v3686_v6, 8.507059e+37 }
 0x3ce   : > { %v3240_v53 = vpop.xlane.xlu0 %3239  ;;  %v7454_v51 = vpop.eup %4764  ;;  %v3678_v0 = vmul.f32 %v7449_v36, %v7410_v28  ;;  %vm3683_vm15 = vweird.f32 %v7449_v36  ;;  %vm3460_vm7 = vweird.f32 %v7434_v1 }
 0x3cf   : > { %v3260_v22 = vmul.f32 %v3240_v53, %v7266_v45  ;;  %v3276_v34 = vmul.f32 %v7417_v35, %v7417_v35  ;;  %4766 = vrsqrt.f32 %v7432_v24  ;;  %v3455_v48 = vmul.f32 %v7434_v1, %v3454_v30  ;;  %vm7503_vm1 = vmor %vm3682_vm8, %vm3683_vm15 }
 0x3d0   : > { %v3528_v53 = vmul.f32 %v7338_v21, %v3511_v43  ;;  %v3693_v37 = vmul.f32 %v7454_v51, %v7420_v8  ;;  %vm3698_vm11 = vweird.f32 %v7454_v51  ;;  %vm3461_vm13 = vmor %vm3459_vm6, %vm3460_vm7  ;;  %vm3469_vm14 = vweird.f32 %v7432_v24 }
 0x3d1   : > { %v3292_v17 = vsub.f32 %v3260_v22, %v3276_v34  ;;  %v3456_v27 = vmul.f32 0.5, %v3455_v48  ;;  %v3679_v22 = vsub.f32 1.0, %v3678_v0  ;;  %vm3699_vm9 = vmor %vm3697_vm4, %vm3698_vm11 }
 0x3d2   : > { %v3694_v5 = vsub.f32 1.0, %v3693_v37 }
 0x3d3   : > { %v3308_v41 = vmax.f32 %v3292_v17, 0.0  ;;  %v3680_v34 = vmul.f32 %v7449_v36, %v3679_v22  ;;  %v3448_v17 = vmul.f32 %v7408_v4, %v3447_v62 }
 0x3d4   : > { %v3163_v46 = vpop.xlane.xlu1 %3162  ;;  %v3695_v13 = vmul.f32 %v7454_v51, %v3694_v5 }
 0x3d5   : > { %v7447_v20 = vadd.f32 1e-05, %v3308_v41  ;;  %v7461_v19 = vpop.eup %4766  ;;  %v7472_v31 = vmul.f32 %v3163_v46, %v7266_v45  ;;  %v3457_v41 = vsub.f32 1.5, %v3456_v27  ;;  %v3681_v30 = vadd.f32 %v7449_v36, %v3680_v34  ;;  %v7530_v27 = vld [vmem:[#allocation2 + $0x1] ss:$0 sm:$0xff] }
 0x3d6   : > { %v3464_v9 = vmul.f32 %v7461_v19, %v7432_v24  ;;  %v3243_v55 = vpop.xlane.xlu0 %3242  ;;  %v3696_v23 = vadd.f32 %v7454_v51, %v3695_v13  ;;  %v3452_v37 = vsel %vm7524_vm5, %v7408_v4, %v3448_v17  ;;  %v3512_v4 = vmul.f32 %v3442_v59, %v3320_v61 }
 0x3d7   : > { %4768 = vrsqrt.f32 %v7447_v20  ;;  %v3277_v12 = vmul.f32 %v7472_v31, %v7472_v31  ;;  %v3261_v39 = vmul.f32 %v3243_v55, %v7266_v45  ;;  %v3685_v28 = vsel %vm7503_vm1, %v7449_v36, %v3681_v30 }
 0x3d8   : > { %4770 = vpow2.f32 %v4650_v40  ;;  %v3465_v43 = vmul.f32 %v7461_v19, %v3464_v9  ;;  %v3458_v0 = vmul.f32 %v7434_v1, %v3457_v41  ;;  %v3690_v62 = vsel %vm3687_vm2, %v3689_v29, %v3685_v28 }
 0x3d9   : > { %4772 = vpow2.f32 %v4651_v44  ;;  %v3701_v44 = vand.u32 2147483647, %v7420_v8  ;;  %v3293_v46 = vsub.f32 %v3261_v39, %v3277_v12  ;;  %v3700_v8 = vsel %vm3699_vm9, %v7454_v51, %v3696_v23 }
 0x3da   : > { %v3466_v9 = vmul.f32 0.5, %v3465_v43  ;;  %v3869_v56 = vmul.f32 %v7530_v27, %v3690_v62  ;;  %v3545_v55 = vadd.f32 %v7354_v14, %v3528_v53  ;;  %v3462_v17 = vsel %vm3461_vm13, %v7434_v1, %v3458_v0 }
 0x3db   : > { %vm3702_vm12 = vcmp.eq.f32.partialorder %v3701_v44, 8.507059e+37  ;;  %v3309_v22 = vmax.f32 %v3293_v46, 0.0  ;;  %v3513_v12 = vmul.f32 %v3452_v37, %v3321_v25  ;;  %v3514_v30 = vmul.f32 %v3462_v17, %v3322_v63 }
 0x3dc   : > { %v3705_v34 = vsel %vm3702_vm12, %v3704_v18, %v3700_v8  ;;  %v3467_v6 = vsub.f32 1.5, %v3466_v9  ;;  %v4652_v38 = vmul.f32 -1.442695, %v3545_v55  ;;  %v3166_v57 = vpop.xlane.xlu2 %3165  ;;  %v3529_v1 = vmul.f32 %v7338_v21, %v3512_v4 }
 0x3dd   : > { %v7481_v60 = vpop.eup %4768  ;;  %v3870_v51 = vmul.f32 %v7530_v27, %v3705_v34  ;;  %v7541_v58 = vadd.f32 1e-05, %v3309_v22  ;;  %v3530_v61 = vmul.f32 %v7338_v21, %v3513_v12  ;;  %vm3470_vm3 = vweird.f32 %v7461_v19 }
 0x3de   : > { %v3474_v49 = vmul.f32 %v7481_v60, %v7447_v20  ;;  %v4771_v7 = vpop.eup %4770  ;;  %v7560_v15 = vmul.f32 %v3166_v57, %v7266_v45  ;;  %v3246_v11 = vpop.xlane.xlu1 %3245  ;;  %v3468_v59 = vmul.f32 %v7461_v19, %v3467_v6  ;;  %vm3480_vm10 = vweird.f32 %v7481_v60  ;;  %vm7574_vm15 = vmor %vm3469_vm14, %vm3470_vm3 }
 0x3df   : > { %v4773_v2 = vpop.eup %4772  ;;  %v3883_v16 = vpack.c.bf16 %v3870_v51, %v3869_v56  ;;  %4774 = vrsqrt.f32 %v7541_v58  ;;  %v7551_v41 = vadd.f32 1.0, %v4771_v7  ;;  %v3262_v42 = vmul.f32 %v3246_v11, %v7266_v45 }
 0x3e0   : > { %v3475_v48 = vmul.f32 %v7481_v60, %v3474_v49  ;;  %v7554_v53 = vadd.f32 1.0, %v4773_v2  ;;  %v3531_v40 = vmul.f32 %v7338_v21, %v3514_v30  ;;  %v3278_v13 = vmul.f32 %v7560_v15, %v7560_v15 }
 0x3e1   : > { %4678 = vmatmul.msk.bf16.vlgmr.msra.gmra.mxu2 %vm3045_vm0, %v3883_v16  ;;  %4776 = vrcp.f32 %v7551_v41  ;;  %vm3479_vm8 = vweird.f32 %v7447_v20  ;;  %v3546_v43 = vadd.f32 %v7354_v14, %v3529_v1  ;;  %v3547_v24 = vadd.f32 %v7354_v14, %v3530_v61 }
 0x3e2   : > { %v3476_v49 = vmul.f32 0.5, %v3475_v48  ;;  %4778 = vrcp.f32 %v7554_v53  ;;  %vm3481_vm1 = vmor %vm3479_vm8, %vm3480_vm10  ;;  %v3294_v48 = vsub.f32 %v3262_v42, %v3278_v13  ;;  %v3323_v28 = vsub.f32 %v7203_v32, %v7378_v33 }
 0x3e3   : > { %4780 = vpow2.f32 %v4652_v38  ;;  %v3472_v29 = vsel %vm7574_vm15, %v7461_v19, %v3468_v59  ;;  %v3548_v20 = vadd.f32 %v7354_v14, %v3531_v40  ;;  %v3324_v46 = vsub.f32 %v7211_v52, %v7417_v35 }
 0x3e4   : > { %v3477_v5 = vsub.f32 1.5, %v3476_v49  ;;  %v3310_v62 = vmax.f32 %v3294_v48, 0.0  ;;  %v4653_v36 = vmul.f32 -1.442695, %v3546_v43  ;;  %v3515_v8 = vmul.f32 %v3472_v29, %v3323_v28  ;;  %v3121_v49 = vpop.xlane.xlu2 %3120 }
 0x3e5   : > { %v7566_v2 = vpop.eup %4774  ;;  %v4654_v33 = vmul.f32 -1.442695, %v3547_v24  ;;  %v4655_v9 = vmul.f32 -1.442695, %v3548_v20  ;;  %v7604_v51 = vmul.f32 %v3121_v49, %v7266_v45  ;;  %v3325_v55 = vsub.f32 %v7219_v54, %v7472_v31 }
 0x3e6   : > { %v3478_v7 = vmul.f32 %v7481_v60, %v3477_v5  ;;  %v3484_v39 = vmul.f32 %v7566_v2, %v7541_v58  ;;  %v7593_v37 = vadd.f32 1e-05, %v3310_v62  ;;  %v3532_v52 = vmul.f32 %v7338_v21, %v3515_v8  ;;  %v3201_v30 = vpop.xlane.xlu1 %3200  ;;  %v3124_v8 = vpop.xlane.xlu0 %3123 }
 0x3e7   : > { %v4777_v18 = vpop.eup %4776  ;;  %v3718_v17 = vand.u32 2147483648, %v7551_v41  ;;  %vm3489_vm11 = vweird.f32 %v7541_v58  ;;  %vm3490_vm2 = vweird.f32 %v7566_v2  ;;  %v3716_v31 = vand.u32 2147483647, %v7551_v41 }
 0x3e8   : > { %v3482_v23 = vsel %vm3481_vm1, %v7481_v60, %v3478_v7  ;;  %v3485_v0 = vmul.f32 %v7566_v2, %v3484_v39  ;;  %v7595_v32 = vpop.eup %4778  ;;  %4782 = vrsqrt.f32 %v7593_v37  ;;  %v3708_v34 = vmul.f32 %v4777_v18, %v7551_v41  ;;  %vm7634_vm6 = vmor %vm3489_vm11, %vm3490_vm2 }
 0x3e9   : > { %v3516_v22 = vmul.f32 %v3482_v23, %v3324_v46  ;;  %v4781_v19 = vpop.eup %4780  ;;  %4784 = vpow2.f32 %v4653_v36  ;;  %v3723_v12 = vmul.f32 %v7595_v32, %v7554_v53  ;;  %v3549_v16 = vadd.f32 %v7354_v14, %v3532_v52 }
 0x3ea   : > { %v3486_v60 = vmul.f32 0.5, %v3485_v0  ;;  %4786 = vpow2.f32 %v4654_v33  ;;  %v7601_v25 = vadd.f32 1.0, %v4781_v19  ;;  %v3709_v4 = vsub.f32 1.0, %v3708_v34 }
 0x3eb   : > { %v3533_v35 = vmul.f32 %v7338_v21, %v3516_v22  ;;  %4788 = vpow2.f32 %v4655_v9  ;;  %vm3713_vm4 = vweird.f32 %v4777_v18  ;;  %v3263_v1 = vmul.f32 %v7604_v51, %v7604_v51 }
 0x3ec   : > { %v3487_v56 = vsub.f32 1.5, %v3486_v60  ;;  %v3710_v54 = vmul.f32 %v4777_v18, %v3709_v4  ;;  %vm3712_vm7 = vweird.f32 %v7551_v41  ;;  %v3724_v61 = vsub.f32 1.0, %v3723_v12  ;;  %v3204_v4 = vpop.xlane.xlu2 %3203 }
 0x3ed   : > { %v3550_v6 = vadd.f32 %v7354_v14, %v3533_v35  ;;  %v3719_v42 = vor.u32 1.1754944e-38, %v3718_v17  ;;  %v3733_v40 = vand.u32 2147483648, %v7554_v53  ;;  %vm3714_vm9 = vmor %vm3712_vm7, %vm3713_vm4  ;;  %vm3728_vm5 = vweird.f32 %v7595_v32 }
 0x3ee   : > { %v7611_v63 = vpop.eup %4782  ;;  %v3488_v57 = vmul.f32 %v7566_v2, %v3487_v56  ;;  %v3711_v7 = vadd.f32 %v4777_v18, %v3710_v54  ;;  %v3725_v44 = vmul.f32 %v7595_v32, %v3724_v61  ;;  %v3731_v39 = vand.u32 2147483647, %v7554_v53  ;;  %v7675_v54 = vpop.xlane.xlu0 %3126 }
 0x3ef   : > { %v3494_v5 = vmul.f32 %v7611_v63, %v7593_v37  ;;  %v4785_v38 = vpop.eup %4784  ;;  %v3247_v43 = vmul.f32 %v3201_v30, %v7266_v45  ;;  %v4656_v48 = vmul.f32 -1.442695, %v3549_v16  ;;  %vm3717_vm12 = vcmp.eq.f32.partialorder %v3716_v31, 8.507059e+37 }
 0x3f0   : > { %v4787_v11 = vpop.eup %4786  ;;  %v3715_v28 = vsel %vm3714_vm9, %v4777_v18, %v3711_v7  ;;  %v3492_v29 = vsel %vm7634_vm6, %v7566_v2, %v3488_v57  ;;  %v3726_v20 = vadd.f32 %v7595_v32, %v3725_v44  ;;  %vm3727_vm13 = vweird.f32 %v7554_v53 }
 0x3f1   : > { %v3495_v59 = vmul.f32 %v7611_v63, %v3494_v5  ;;  %v4789_v13 = vpop.eup %4788  ;;  %v3720_v23 = vsel %vm3717_vm12, %v3719_v42, %v3715_v28  ;;  %v4657_v46 = vmul.f32 -1.442695, %v3550_v6  ;;  %vm3729_vm3 = vmor %vm3727_vm13, %vm3728_vm5  ;;  %v3734_v58 = vor.u32 1.1754944e-38, %v3733_v40 }
 0x3f2   : > { %v3279_v62 = vsub.f32 %v3247_v43, %v3263_v1  ;;  %v7643_v36 = vadd.f32 1.0, %v4785_v38  ;;  %v3730_v18 = vsel %vm3729_vm3, %v7595_v32, %v3726_v20  ;;  %vm3732_vm10 = vcmp.eq.f32.partialorder %v3731_v39, 8.507059e+37 }
 0x3f3   : > { %v3496_v24 = vmul.f32 0.5, %v3495_v59  ;;  %v3871_v22 = vmul.f32 %v7530_v27, %v3720_v23  ;;  %4790 = vrcp.f32 %v7601_v25  ;;  %v3517_v2 = vmul.f32 %v3492_v29, %v3325_v55 }
 0x3f4   : > { %v3735_v33 = vsel %vm3732_vm10, %v3734_v58, %v3730_v18  ;;  %v3295_v19 = vmax.f32 %v3279_v62, 0.0  ;;  %4792 = vpow2.f32 %v4656_v48  ;;  %vm3500_vm14 = vweird.f32 %v7611_v63  ;;  %v3130_v18 = vpop.xlane.xlu1 %3129 }
 0x3f5   : > { %v3497_v0 = vsub.f32 1.5, %v3496_v24  ;;  %v3872_v9 = vmul.f32 %v7530_v27, %v3735_v33  ;;  %4794 = vpow2.f32 %v4657_v46  ;;  %vm3499_vm15 = vweird.f32 %v7593_v37 }
 0x3f6   : > { %v7651_v60 = vadd.f32 1e-05, %v3295_v19  ;;  %4796 = vrcp.f32 %v7643_v36  ;;  %v3534_v52 = vmul.f32 %v7338_v21, %v3517_v2  ;;  %v7657_v35 = vmul.f32 %v3124_v8, %v7266_v45  ;;  %vm3501_vm8 = vmor %vm3499_vm15, %vm3500_vm14  ;;  %v3210_v8 = vpop.xlane.xlu0 %3209 }
 0x3f7   : > { %v3498_v53 = vmul.f32 %v7611_v63, %v3497_v0  ;;  %v3884_v32 = vpack.c.bf16 %v3872_v9, %v3871_v22  ;;  %v7660_v49 = vadd.f32 1.0, %v4787_v11  ;;  %v7664_v56 = vadd.f32 1.0, %v4789_v13 }
 0x3f8   : > { %4798 = vrsqrt.f32 %v7651_v60  ;;  %v3326_v37 = vsub.f32 %v7230_v10, %v7560_v15  ;;  %v3551_v12 = vadd.f32 %v7354_v14, %v3534_v52  ;;  %v3264_v16 = vmul.f32 %v7657_v35, %v7657_v35 }
 0x3f9   : > { %v3502_v27 = vsel %vm3501_vm8, %v7611_v63, %v3498_v53  ;;  %4679 = vmatmul.msk.bf16.gmra.mxu2 %vm3045_vm0, %v3884_v32  ;;  %v4791_v34 = vpop.eup %4790  ;;  %v3248_v5 = vmul.f32 %v3204_v4, %v7266_v45  ;;  %4800 = vrcp.f32 %v7660_v49  ;;  %v3311_v11 = vsub.f32 %v7237_v47, %v7604_v51 }
 0x3fa   : > { %v4793_v55 = vpop.eup %4792  ;;  %v3518_v6 = vmul.f32 %v3502_v27, %v3326_v37  ;;  %4802 = vrcp.f32 %v7664_v56  ;;  %v3738_v57 = vmul.f32 %v4791_v34, %v7601_v25  ;;  %v4658_v1 = vmul.f32 -1.442695, %v3551_v12 }
 0x3fb   : > { %v4795_v17 = vpop.eup %4794  ;;  %v3280_v10 = vsub.f32 %v3248_v5, %v3264_v16  ;;  %v7678_v15 = vadd.f32 1.0, %v4793_v55  ;;  %v3746_v40 = vand.u32 2147483647, %v7601_v25  ;;  %vm3742_vm1 = vweird.f32 %v7601_v25 }
 0x3fc   : > { %v7672_v63 = vpop.eup %4796  ;;  %v7680_v30 = vadd.f32 1.0, %v4795_v17  ;;  %v3535_v61 = vmul.f32 %v7338_v21, %v3518_v6  ;;  %v3739_v42 = vsub.f32 1.0, %v3738_v57  ;;  %v3748_v39 = vand.u32 2147483648, %v7601_v25 }
 0x3fd   : > { %v3296_v59 = vmax.f32 %v3280_v10, 0.0  ;;  %v3753_v13 = vmul.f32 %v7672_v63, %v7643_v36  ;;  %v3761_v43 = vand.u32 2147483647, %v7643_v36  ;;  %vm3743_vm11 = vweird.f32 %v4791_v34 }
 0x3fe   : > { %v4799_v31 = vpop.eup %4798  ;;  %v3740_v47 = vmul.f32 %v4791_v34, %v3739_v42  ;;  %v3552_v28 = vadd.f32 %v7354_v14, %v3535_v61  ;;  %v3763_v29 = vand.u32 2147483648, %v7643_v36  ;;  %vm3758_vm4 = vweird.f32 %v7672_v63  ;;  %vm3744_vm9 = vmor %vm3742_vm1, %vm3743_vm11 }
 0x3ff   : > { %v3344_v38 = vmul.f32 %v4799_v31, %v7651_v60  ;;  %v7690_v44 = vadd.f32 1e-05, %v3296_v59  ;;  %v7695_v48 = vpop.eup %4800  ;;  %v3754_v51 = vsub.f32 1.0, %v3753_v13  ;;  %vm3350_vm2 = vweird.f32 %v4799_v31 }
 0x400   : > { %v7697_v24 = vpop.eup %4802  ;;  %v3741_v20 = vadd.f32 %v4791_v34, %v3740_v47  ;;  %vm3349_vm7 = vweird.f32 %v7651_v60  ;;  %v3749_v0 = vor.u32 1.1754944e-38, %v3748_v39  ;;  %vm3757_vm5 = vweird.f32 %v7643_v36  ;;  %v7721_v60 = vld [vmem:[#allocation2 + $0x2] ss:$0 sm:$0xff] }
 0x401   : > { %v3345_v7 = vmul.f32 %v4799_v31, %v3344_v38  ;;  %4804 = vrsqrt.f32 %v7690_v44  ;;  %v3755_v46 = vmul.f32 %v7672_v63, %v3754_v51  ;;  %vm7708_vm6 = vmor %vm3349_vm7, %vm3350_vm2  ;;  %vm3747_vm12 = vcmp.eq.f32.partialorder %v3746_v40, 8.507059e+37 }
 0x402   : > { %4806 = vpow2.f32 %v4658_v1  ;;  %v3745_v22 = vsel %vm3744_vm9, %v4791_v34, %v3741_v20  ;;  %v7714_v33 = vmul.f32 %v3130_v18, %v7266_v45  ;;  %vm3759_vm13 = vmor %vm3757_vm5, %vm3758_vm4  ;;  %vm3762_vm3 = vcmp.eq.f32.partialorder %v3761_v43, 8.507059e+37 }
 0x403   : > { %v3346_v41 = vmul.f32 0.5, %v3345_v7  ;;  %v3756_v2 = vadd.f32 %v7672_v63, %v3755_v46  ;;  %v3750_v19 = vsel %vm3747_vm12, %v3749_v0, %v3745_v22  ;;  %v3764_v25 = vor.u32 1.1754944e-38, %v3763_v29 }
 0x404   : > { %v4659_v36 = vmul.f32 -1.442695, %v3552_v28  ;;  %v3768_v32 = vmul.f32 %v7695_v48, %v7660_v49  ;;  %v3250_v34 = vmul.f32 %v3210_v8, %v7266_v45  ;;  %v3266_v37 = vmul.f32 %v7714_v33, %v7714_v33 }
 0x405   : > { %v3347_v23 = vsub.f32 1.5, %v3346_v41  ;;  %v3760_v9 = vsel %vm3759_vm13, %v7672_v63, %v3756_v2  ;;  %v3873_v17 = vmul.f32 %v7721_v60, %v3750_v19  ;;  %4808 = vrcp.f32 %v7678_v15 }
 0x406   : > { %v3765_v55 = vsel %vm3762_vm3, %v3764_v25, %v3760_v9  ;;  %v3769_v16 = vsub.f32 1.0, %v3768_v32  ;;  %v3282_v63 = vsub.f32 %v3250_v34, %v3266_v37  ;;  %4810 = vrcp.f32 %v7680_v30 }
 0x407   : > { %v3348_v58 = vmul.f32 %v4799_v31, %v3347_v23  ;;  %v4805_v52 = vpop.eup %4804  ;;  %v3874_v12 = vmul.f32 %v7721_v60, %v3765_v55  ;;  %4812 = vpow2.f32 %v4659_v36  ;;  %vm3773_vm10 = vweird.f32 %v7695_v48  ;;  %v3207_v23 = vpop.xlane.xlu2 %3206 }
 0x408   : > { %v3354_v4 = vmul.f32 %v4805_v52, %v7690_v44  ;;  %v4807_v6 = vpop.eup %4806  ;;  %v3770_v57 = vmul.f32 %v7695_v48, %v3769_v16  ;;  %v3298_v61 = vmax.f32 %v3282_v63, 0.0  ;;  %vm3360_vm14 = vweird.f32 %v4805_v52 }
 0x409   : > { %v3352_v53 = vsel %vm7708_vm6, %v4799_v31, %v3348_v58  ;;  %v7735_v31 = vmul.f32 %v7675_v54, %v7266_v45  ;;  %v3885_v38 = vpack.c.bf16 %v3874_v12, %v3873_v17  ;;  %v7743_v7 = vadd.f32 1.0, %v4807_v6 }
 0x40a   : > { %v3503_v27 = vmul.f32 %v3352_v53, %v3311_v11  ;;  %v3355_v10 = vmul.f32 %v4805_v52, %v3354_v4  ;;  %v3312_v11 = vsub.f32 %v7227_v3, %v7657_v35  ;;  %v7745_v54 = vadd.f32 1e-05, %v3298_v61 }
 0x40b   : > { %4680 = vmatmul.msk.bf16.gmra.mxu2 %vm3045_vm0, %v3885_v38  ;;  %v3771_v42 = vadd.f32 %v7695_v48, %v3770_v57  ;;  %v3265_v40 = vmul.f32 %v7735_v31, %v7735_v31  ;;  %v3783_v3 = vmul.f32 %v7697_v24, %v7664_v56  ;;  %v7753_v35 = vpop.eup %4808  ;;  %vm3772_vm15 = vweird.f32 %v7660_v49 }
 0x40c   : > { %v3520_v5 = vmul.f32 %v7338_v21, %v3503_v27  ;;  %v3356_v59 = vmul.f32 0.5, %v3355_v10  ;;  %v3776_v43 = vand.u32 2147483647, %v7660_v49  ;;  %v3778_v41 = vand.u32 2147483648, %v7660_v49  ;;  %vm7760_vm1 = vmor %vm3772_vm15, %vm3773_vm10  ;;  %v7764_v29 = vpop.eup %4810 }
 0x40d   : > { %vm3359_vm8 = vweird.f32 %v7690_v44  ;;  %4814 = vrsqrt.f32 %v7745_v54  ;;  %v3784_v28 = vsub.f32 1.0, %v3783_v3  ;;  %v3775_v49 = vsel %vm7760_vm1, %v7695_v48, %v3771_v42  ;;  %v4813_v46 = vpop.eup %4812 }
 0x40e   : > { %v3537_v1 = vadd.f32 %v7354_v14, %v3520_v5  ;;  %v3357_v13 = vsub.f32 1.5, %v3356_v59  ;;  %4816 = vrcp.f32 %v7743_v7  ;;  %vm3361_vm11 = vmor %vm3359_vm8, %vm3360_vm14  ;;  %v3791_v20 = vand.u32 2147483647, %v7664_v56 }
 0x40f   : > { %v3793_v44 = vand.u32 2147483648, %v7664_v56  ;;  %v3249_v58 = vmul.f32 %v3207_v23, %v7266_v45  ;;  %v3785_v62 = vmul.f32 %v7697_v24, %v3784_v28  ;;  %vm3788_vm2 = vweird.f32 %v7697_v24 }
 0x410   : > { %v4644_v39 = vmul.f32 -1.442695, %v3537_v1  ;;  %v3358_v47 = vmul.f32 %v4805_v52, %v3357_v13  ;;  %v3779_v18 = vor.u32 1.1754944e-38, %v3778_v41  ;;  %vm3777_vm4 = vcmp.eq.f32.partialorder %v3776_v43, 8.507059e+37 }
 0x411   : > { %v3281_v22 = vsub.f32 %v3249_v58, %v3265_v40  ;;  %v3786_v2 = vadd.f32 %v7697_v24, %v3785_v62  ;;  %vm3787_vm7 = vweird.f32 %v7664_v56  ;;  %v7777_v48 = vadd.f32 1.0, %v4813_v46  ;;  %v4872_v62 = vld [vmem:[%s8540_s7 + $0x4] ss:$0 sm:$0xff] }
 0x412   : > { %v3362_v0 = vsel %vm3361_vm11, %v4805_v52, %v3358_v47  ;;  %4818 = vpow2.f32 %v4644_v39  ;;  %v3780_v25 = vsel %vm3777_vm4, %v3779_v18, %v3775_v49  ;;  %vm3789_vm9 = vmor %vm3787_vm7, %vm3788_vm2  ;;  %v3794_v36 = vor.u32 1.1754944e-38, %v3793_v44 }
 0x413   : > { %v3504_v8 = vmul.f32 %v3362_v0, %v3312_v11  ;;  %v4815_v53 = vpop.eup %4814  ;;  %v3297_v9 = vmax.f32 %v3281_v22, 0.0  ;;  %v3790_v32 = vsel %vm3789_vm9, %v7697_v24, %v3786_v2  ;;  %vm3792_vm5 = vcmp.eq.f32.partialorder %v3791_v20, 8.507059e+37 }
 0x414   : > { %v3798_v52 = vmul.f32 %v7753_v35, %v7678_v15  ;;  %v7783_v27 = vpop.eup %4816  ;;  %v3374_v56 = vmul.f32 %v4815_v53, %v7745_v54  ;;  %v3795_v37 = vsel %vm3792_vm5, %v3794_v36, %v3790_v32  ;;  %4820 = vrcp.f32 %v7777_v48 }
 0x415   : > { %v3521_v19 = vmul.f32 %v7338_v21, %v3504_v8  ;;  %v7787_v55 = vadd.f32 1e-05, %v3297_v9  ;;  %v3875_v21 = vmul.f32 %v7721_v60, %v3780_v25  ;;  %v3876_v4 = vmul.f32 %v7721_v60, %v3795_v37 }
 0x416   : > { %v3799_v17 = vsub.f32 1.0, %v3798_v52  ;;  %v3375_v16 = vmul.f32 %v4815_v53, %v3374_v56  ;;  %v3806_v63 = vand.u32 2147483647, %v7678_v15  ;;  %v3313_v10 = vsub.f32 %v7243_v50, %v7735_v31 }
 0x417   : > { %v3538_v34 = vadd.f32 %v7354_v14, %v3521_v19  ;;  %4822 = vrsqrt.f32 %v7787_v55  ;;  %v3886_v6 = vpack.c.bf16 %v3876_v4, %v3875_v21  ;;  %v3314_v60 = vsub.f32 %v7250_v26, %v7714_v33  ;;  %v7852_v19 = vld [vmem:[#allocation2 + $0x3] ss:$0 sm:$0xff] }
 0x418   : > { %v4819_v12 = vpop.eup %4818  ;;  %v3800_v14 = vmul.f32 %v7753_v35, %v3799_v17  ;;  %v3376_v5 = vmul.f32 0.5, %v3375_v16  ;;  %v3808_v57 = vand.u32 2147483648, %v7678_v15  ;;  %vm3379_vm6 = vweird.f32 %v7745_v54 }
 0x419   : > { %v4645_v24 = vmul.f32 -1.442695, %v3538_v34  ;;  %v7797_v38 = vadd.f32 1.0, %v4819_v12  ;;  %vm3380_vm12 = vweird.f32 %v4815_v53  ;;  %v3813_v61 = vmul.f32 %v7764_v29, %v7680_v30 }
 0x41a   : > { %v3377_v1 = vsub.f32 1.5, %v3376_v5  ;;  %v3801_v11 = vadd.f32 %v7753_v35, %v3800_v14  ;;  %vm3802_vm13 = vweird.f32 %v7678_v15  ;;  %vm3803_vm3 = vweird.f32 %v7753_v35  ;;  %v7811_v33 = vpop.eup %4820  ;;  %vm3381_vm14 = vmor %vm3379_vm6, %vm3380_vm12 }
 0x41b   : > { %4824 = vpow2.f32 %v4645_v24  ;;  %4681 = vmatmul.msk.bf16.gmra.mxu2 %vm3045_vm0, %v3886_v6  ;;  %v3828_v26 = vmul.f32 %v7783_v27, %v7743_v7  ;;  %vm7813_vm10 = vcmp.eq.f32.partialorder %v3806_v63, 8.507059e+37  ;;  %v3814_v54 = vsub.f32 1.0, %v3813_v61  ;;  %vm7825_vm15 = vmor %vm3802_vm13, %vm3803_vm3 }
 0x41c   : > { %v3378_v59 = vmul.f32 %v4815_v53, %v3377_v1  ;;  %v3821_v40 = vand.u32 2147483647, %v7680_v30  ;;  %4826 = vrcp.f32 %v7797_v38  ;;  %v3809_v3 = vor.u32 1.1754944e-38, %v3808_v57 }
 0x41d   : > { %v4823_v13 = vpop.eup %4822  ;;  %v3823_v39 = vand.u32 2147483648, %v7680_v30  ;;  %v3829_v43 = vsub.f32 1.0, %v3828_v26  ;;  %v3815_v23 = vmul.f32 %v7764_v29, %v3814_v54  ;;  %vm3818_vm8 = vweird.f32 %v7764_v29 }
 0x41e   : > { %v3382_v47 = vsel %vm3381_vm14, %v4815_v53, %v3378_v59  ;;  %v3364_v51 = vmul.f32 %v4823_v13, %v7787_v55  ;;  %v3805_v44 = vsel %vm7825_vm15, %v7753_v35, %v3801_v11  ;;  %vm3817_vm1 = vweird.f32 %v7680_v30  ;;  %v4873_v53 = vld [vmem:[%s8540_s7 + $0x5] ss:$0 sm:$0xff] }
 0x41f   : > { %v3506_v20 = vmul.f32 %v3382_v47, %v3314_v60  ;;  %v3816_v15 = vadd.f32 %v7764_v29, %v3815_v23  ;;  %vm7838_vm11 = vcmp.eq.f32.partialorder %v3821_v40, 8.507059e+37  ;;  %v3843_v58 = vmul.f32 %v7811_v33, %v7777_v48  ;;  %vm3819_vm2 = vmor %vm3817_vm1, %vm3818_vm8 }
 0x420   : > { %v3365_v46 = vmul.f32 %v4823_v13, %v3364_v51  ;;  %v3824_v35 = vor.u32 1.1754944e-38, %v3823_v39  ;;  %v3830_v30 = vmul.f32 %v7783_v27, %v3829_v43  ;;  %v3810_v22 = vsel %vm7813_vm10, %v3809_v3, %v3805_v44 }
 0x421   : > { %v4825_v41 = vpop.eup %4824  ;;  %v3523_v8 = vmul.f32 %v4872_v62, %v3506_v20  ;;  %v3820_v2 = vsel %vm3819_vm2, %v7764_v29, %v3816_v15  ;;  %v3844_v25 = vsub.f32 1.0, %v3843_v58  ;;  %vm3369_vm4 = vweird.f32 %v7787_v55  ;;  %v4734_v15 = vld [vmem:[#allocation2] ss:$0 sm:$0xff] }
 0x422   : > { %v7831_v49 = vadd.f32 1.0, %v4825_v41  ;;  %v3366_v18 = vmul.f32 0.5, %v3365_v46  ;;  %v7854_v36 = vpop.eup %4826  ;;  %v3825_v32 = vsel %vm7838_vm11, %v3824_v35, %v3820_v2  ;;  %v3838_v52 = vand.u32 2147483648, %v7743_v7 }
 0x423   : > { %v3540_v9 = vadd.f32 %v4873_v53, %v3523_v8  ;;  %vm3370_vm7 = vweird.f32 %v4823_v13  ;;  %v3878_v29 = vmul.f32 %v7852_v19, %v3825_v32  ;;  %v3845_v56 = vmul.f32 %v7811_v33, %v3844_v25 }
 0x424   : > { %4828 = vrcp.f32 %v7831_v49  ;;  %v3367_v34 = vsub.f32 1.5, %v3366_v18  ;;  %v3877_v21 = vmul.f32 %v7852_v19, %v3810_v22  ;;  %v3831_v4 = vadd.f32 %v7783_v27, %v3830_v30  ;;  %vm3371_vm6 = vmor %vm3369_vm4, %vm3370_vm7 }
 0x425   : > { %v4647_v37 = vmul.f32 -1.442695, %v3540_v9  ;;  %vm3833_vm9 = vweird.f32 %v7783_v27  ;;  %vm3832_vm5 = vweird.f32 %v7743_v7  ;;  %v3836_v12 = vand.u32 2147483647, %v7743_v7 }
 0x426   : > { %v3368_v17 = vmul.f32 %v4823_v13, %v3367_v34  ;;  %v3618_v24 = vmul.f32 %v7854_v36, %v7797_v38  ;;  %v3887_v6 = vpack.c.bf16 %v3878_v29, %v3877_v21  ;;  %v3839_v14 = vor.u32 1.1754944e-38, %v3838_v52  ;;  %vm7875_vm12 = vmor %vm3832_vm5, %vm3833_vm9 }
 0x427   : > { %4830 = vpow2.f32 %v4647_v37  ;;  %v3851_v5 = vand.u32 2147483647, %v7777_v48  ;;  %v3846_v57 = vadd.f32 %v7811_v33, %v3845_v56  ;;  %vm3848_vm13 = vweird.f32 %v7811_v33 }
 0x428   : > { %v3372_v63 = vsel %vm3371_vm6, %v4823_v13, %v3368_v17  ;;  %v3619_v7 = vsub.f32 1.0, %v3618_v24  ;;  %v3835_v55 = vsel %vm7875_vm12, %v7783_v27, %v3831_v4  ;;  %vm3847_vm3 = vweird.f32 %v7777_v48 }
 0x429   : > { %v3505_v1 = vmul.f32 %v3372_v63, %v3313_v10  ;;  %v3853_v11 = vand.u32 2147483648, %v7777_v48  ;;  %vm3623_vm10 = vweird.f32 %v7854_v36  ;;  %v3628_v59 = vand.u32 2147483648, %v7797_v38  ;;  %vm7894_vm14 = vmor %vm3847_vm3, %vm3848_vm13 }
 0x42a   : > { %v4829_v16 = vpop.eup %4828  ;;  %v3620_v26 = vmul.f32 %v7854_v36, %v3619_v7  ;;  %vm7898_vm15 = vcmp.eq.f32.partialorder %v3851_v5, 8.507059e+37  ;;  %v3626_v27 = vand.u32 2147483647, %v7797_v38  ;;  %v3850_v48 = vsel %vm7894_vm14, %v7811_v33, %v3846_v57 }
 0x42b   : > { %4682 = vmatmul.msk.bf16.gmra.mxu2 %vm3045_vm0, %v3887_v6  ;;  %v3633_v61 = vmul.f32 %v4829_v16, %v7831_v49  ;;  %v3522_v50 = vmul.f32 %v4872_v62, %v3505_v1  ;;  %vm3622_vm8 = vweird.f32 %v7797_v38  ;;  %v3643_v40 = vand.u32 2147483648, %v7831_v49 }
 0x42c   : > { %v3621_v54 = vadd.f32 %v7854_v36, %v3620_v26  ;;  %vm3624_vm1 = vmor %vm3622_vm8, %vm3623_vm10  ;;  %vm3638_vm11 = vweird.f32 %v4829_v16  ;;  %v3641_v43 = vand.u32 2147483647, %v7831_v49  ;;  %v3854_v47 = vor.u32 1.1754944e-38, %v3853_v11 }
 0x42d   : > { %v3634_v42 = vsub.f32 1.0, %v3633_v61  ;;  %v4831_v13 = vpop.eup %4830  ;;  %v3539_v3 = vadd.f32 %v4873_v53, %v3522_v50  ;;  %v3629_v28 = vor.u32 1.1754944e-38, %v3628_v59  ;;  %vm3627_vm2 = vcmp.eq.f32.partialorder %v3626_v27, 8.507059e+37  ;;  %v7926_v59 = vld [vmem:[%s8541_s8] ss:$0 sm:$0xff] }
 0x42e   : > { %v3604_v41 = vadd.f32 1.0, %v4831_v13  ;;  %v3625_v51 = vsel %vm3624_vm1, %v7854_v36, %v3621_v54  ;;  %vm3637_vm4 = vweird.f32 %v7831_v49  ;;  %v3855_v38 = vsel %vm7898_vm15, %v3854_v47, %v3850_v48 }
 0x42f   : > { %v3635_v39 = vmul.f32 %v4829_v16, %v3634_v42  ;;  %v4646_v23 = vmul.f32 -1.442695, %v3539_v3  ;;  %v3630_v20 = vsel %vm3627_vm2, %v3629_v28, %v3625_v51  ;;  %vm3639_vm7 = vmor %vm3637_vm4, %vm3638_vm11  ;;  %v3644_v44 = vor.u32 1.1754944e-38, %v3643_v40 }
 0x430   : > { %4832 = vrcp.f32 %v3604_v41  ;;  %vm3837_vm9 = vcmp.eq.f32.partialorder %v3836_v12, 8.507059e+37  ;;  %vm3642_vm5 = vcmp.eq.f32.partialorder %v3641_v43, 8.507059e+37  ;;  %v3880_v62 = vmul.f32 %v7852_v19, %v3855_v38 }
 0x431   : > { %v3636_v33 = vadd.f32 %v4829_v16, %v3635_v39  ;;  %4834 = vpow2.f32 %v4646_v23  ;;  %v3840_v0 = vsel %vm3837_vm9, %v3839_v14, %v3835_v55  ;;  %v3865_v8 = vmul.f32 %v4734_v15, %v3630_v20 }
 0x432   : > { %v3879_v49 = vmul.f32 %v7852_v19, %v3840_v0  ;;  %v3673_v29 = vand.u32 2147483648, %v3604_v41  ;;  %vm3667_vm12 = vweird.f32 %v3604_v41  ;;  %v3671_v19 = vand.u32 2147483647, %v3604_v41 }
 0x433   : > { %v3640_v46 = vsel %vm3639_vm7, %v4829_v16, %v3636_v33 }
 0x434   : > { %v3645_v58 = vsel %vm3642_vm5, %v3644_v44, %v3640_v46  ;;  %v3888_v2 = vpack.c.bf16 %v3880_v62, %v3879_v49  ;;  %v3674_v12 = vor.u32 1.1754944e-38, %v3673_v29  ;;  %vm3672_vm14 = vcmp.eq.f32.partialorder %v3671_v19, 8.507059e+37 }
 0x435   : > { %v3866_v35 = vmul.f32 %v4734_v15, %v3645_v58 }
 0x436   : > { %v4833_v18 = vpop.eup %4832 }
 0x437   : > { %v3881_v30 = vpack.c.bf16 %v3866_v35, %v3865_v8  ;;  %v4835_v22 = vpop.eup %4834  ;;  %v3663_v25 = vmul.f32 %v4833_v18, %v3604_v41  ;;  %vm3668_vm6 = vweird.f32 %v4833_v18 }
 0x438   : > { %v3603_v36 = vadd.f32 1.0, %v4835_v22  ;;  %vm3669_vm13 = vmor %vm3667_vm12, %vm3668_vm6 }
 0x439   : > { %4676 = vmatmul.msk.bf16.vlgmr.msra.gmra.mxu0 %vm3045_vm0, %v3881_v30  ;;  %v3664_v53 = vsub.f32 1.0, %v3663_v25 }
 0x43a   : > { %4836 = vrcp.f32 %v3603_v36  ;;  %v3658_v37 = vand.u32 2147483648, %v3603_v36  ;;  %v3656_v4 = vand.u32 2147483647, %v3603_v36  ;;  %vm3652_vm10 = vweird.f32 %v3603_v36 }
 0x43b   : > { %4683 = vmatmul.msk.bf16.gmra.mxu2 %vm3045_vm0, %v3888_v2  ;;  %v3665_v9 = vmul.f32 %v4833_v18, %v3664_v53 }
 0x43c   : > { %v3659_v16 = vor.u32 1.1754944e-38, %v3658_v37  ;;  %vm3657_vm8 = vcmp.eq.f32.partialorder %v3656_v4, 8.507059e+37 }
 0x43d   : > { %v3666_v34 = vadd.f32 %v4833_v18, %v3665_v9 }
 0x43f   : > { %v3670_v17 = vsel %vm3669_vm13, %v4833_v18, %v3666_v34 }
 0x440   : > { %v4837_v32 = vpop.eup %4836  ;;  %v3675_v6 = vsel %vm3672_vm14, %v3674_v12, %v3670_v17 }
 0x441   : > { %v3648_v52 = vmul.f32 %v4837_v32, %v3603_v36  ;;  %vm3653_vm3 = vweird.f32 %v4837_v32  ;;  %v3868_v60 = vmul.f32 %v4734_v15, %v3675_v6 }
 0x442   : > { %vm3654_vm15 = vmor %vm3652_vm10, %vm3653_vm3 }
 0x443   : > { %v3649_v56 = vsub.f32 1.0, %v3648_v52 }
 0x445   : > { %v3650_v21 = vmul.f32 %v4837_v32, %v3649_v56 }
 0x447   : > { %v3651_v24 = vadd.f32 %v4837_v32, %v3650_v21 }
 0x449   : > { %v3655_v14 = vsel %vm3654_vm15, %v4837_v32, %v3651_v24 }
 0x44a   : > { %v3660_v5 = vsel %vm3657_vm8, %v3659_v16, %v3655_v14 }
 0x44b   : > { %v3867_v63 = vmul.f32 %v4734_v15, %v3660_v5 }
 0x44d   : > { %v3882_v57 = vpack.c.bf16 %v3868_v60, %v3867_v63 }
 0x44f   : > { %4677 = vmatmul.msk.bf16.gmra.mxu0 %vm3045_vm0, %v3882_v57 }
 0x464   : > { %v7919_v7 = vpop.f32.mrf.mxu2 }
 0x465   : > { %v8002_v37 = vadd.f32 %v7926_v59, %v7919_v7 }
 0x467   : > { %v4007_v12 = vsel %vm3045_vm0, %v8002_v37, 0.0  ;;  %v4063_v7 = vmul.f32 %v8002_v37, %v8002_v37 }
 0x46c   : > { %v7921_v1 = vpop.f32.mrf.mxu2 }
 0x46d   : > { %v8010_v17 = vadd.f32 %v7926_v59, %v7921_v1 }
 0x46f   : > { %v4064_v14 = vmul.f32 %v8010_v17, %v8010_v17  ;;  %v4010_v57 = vsel %vm3045_vm0, %v8010_v17, 0.0 }
 0x471   : > { %v4090_v60 = vsel %vm3045_vm0, %v4064_v14, 0.0 }
 0x47c   : > { %v3970_v55 = vpop.f32.mrf.mxu2 }
 0x47d   : > { %v7995_v34 = vadd.f32 %v7926_v59, %v3970_v55 }
 0x47f   : > { %v4065_v21 = vmul.f32 %v7995_v34, %v7995_v34  ;;  %v4013_v4 = vsel %vm3045_vm0, %v7995_v34, 0.0 }
 0x481   : > { %v4093_v24 = vsel %vm3045_vm0, %v4065_v21, 0.0 }
 0x484   : > { %v3972_v61 = vpop.f32.mrf.mxu2 }
 0x485   : > { %v7988_v9 = vadd.f32 %v7926_v59, %v3972_v61  ;;  %v4087_v61 = vsel %vm3045_vm0, %v4063_v7, 0.0 }
 0x487   : > { %v4016_v29 = vsel %vm3045_vm0, %v7988_v9, 0.0  ;;  %v4066_v16 = vmul.f32 %v7988_v9, %v7988_v9 }
 0x489   : > { %v4096_v5 = vsel %vm3045_vm0, %v4066_v16, 0.0 }
 0x48e   : > { %v3975_v11 = vpop.f32.mrf.mxu2 }
 0x48f   : > { %v7972_v8 = vadd.f32 %v7926_v59, %v3975_v11 }
 0x491   : > { %v4067_v18 = vmul.f32 %v7972_v8, %v7972_v8  ;;  %v4019_v53 = vsel %vm3045_vm0, %v7972_v8, 0.0 }
 0x493   : > { %v4099_v36 = vsel %vm3045_vm0, %v4067_v18, 0.0 }
 0x496   : > { %v3977_v26 = vpop.f32.mrf.mxu2 }
 0x497   : > { %v7982_v25 = vadd.f32 %v7926_v59, %v3977_v26 }
 0x499   : > { %v4068_v32 = vmul.f32 %v7982_v25, %v7982_v25  ;;  %v4022_v52 = vsel %vm3045_vm0, %v7982_v25, 0.0 }
 0x49b   : > { %v4102_v56 = vsel %vm3045_vm0, %v4068_v32, 0.0 }
 0x49e   : > { %v3980_v50 = vpop.f32.mrf.mxu2 }
 0x49f   : > { %v7929_v31 = vadd.f32 %v7926_v59, %v3980_v50 }
 0x4a1   : > { %v4025_v10 = vsel %vm3045_vm0, %v7929_v31, 0.0  ;;  %v4069_v30 = vmul.f32 %v7929_v31, %v7929_v31 }
 0x4a2   : > { %4026 = vadd.xlane.f32.xlu0 %v4025_v10 }
 0x4a3   : > { %v4105_v22 = vsel %vm3045_vm0, %v4069_v30, 0.0 }
 0x4a6   : > { %v3982_v27 = vpop.f32.mrf.mxu2 }
 0x4a7   : > { %v7934_v42 = vadd.f32 %v7926_v59, %v3982_v27 }
 0x4a9   : > { %v4028_v48 = vsel %vm3045_vm0, %v7934_v42, 0.0  ;;  %v4070_v0 = vmul.f32 %v7934_v42, %v7934_v42 }
 0x4aa   : > { %4029 = vadd.xlane.f32.xlu1 %v4028_v48 }
 0x4ab   : > { %v4108_v35 = vsel %vm3045_vm0, %v4070_v0, 0.0 }
 0x4ae   : > { %v3985_v54 = vpop.f32.mrf.mxu2 }
 0x4af   : > { %v7939_v40 = vadd.f32 %v7926_v59, %v3985_v54 }
 0x4b1   : > { %v4031_v13 = vsel %vm3045_vm0, %v7939_v40, 0.0  ;;  %v4071_v3 = vmul.f32 %v7939_v40, %v7939_v40 }
 0x4b2   : > { %4032 = vadd.xlane.f32.xlu2 %v4031_v13 }
 0x4b3   : > { %v4111_v39 = vsel %vm3045_vm0, %v4071_v3, 0.0 }
 0x4b4   : > { %4112 = vadd.xlane.f32.xlu1 %v4111_v39 }
 0x4b6   : > { %v3987_v43 = vpop.f32.mrf.mxu2  ;;  %v3955_v2 = vpop.f32.mrf.mxu0 }
 0x4b7   : > { %v7947_v41 = vadd.f32 %v7926_v59, %v3987_v43  ;;  %v8045_v54 = vadd.f32 %v7926_v59, %v3955_v2 }
 0x4b9   : > { %v4034_v47 = vsel %vm3045_vm0, %v7947_v41, 0.0  ;;  %v4072_v51 = vmul.f32 %v7947_v41, %v7947_v41  ;;  %v4059_v39 = vmul.f32 %v8045_v54, %v8045_v54  ;;  %v3995_v43 = vsel %vm3045_vm0, %v8045_v54, 0.0 }
 0x4ba   : > { %4035 = vadd.xlane.f32.xlu0 %v4034_v47 }
 0x4bb   : > { %v4114_v28 = vsel %vm3045_vm0, %v4072_v51, 0.0  ;;  %v4075_v47 = vsel %vm3045_vm0, %v4059_v39, 0.0 }
 0x4bc   : > { %4115 = vadd.xlane.f32.xlu2 %v4114_v28  ;;  %v356_v28 = vld [vmem:[%s8541_s8 + $0x3] sm:$0x1] }
 0x4be   : > { %v3990_v23 = vpop.f32.mrf.mxu2  ;;  %v3957_v19 = vpop.f32.mrf.mxu0 }
 0x4bf   : > { %v7955_v33 = vadd.f32 %v7926_v59, %v3990_v23  ;;  %v8038_v10 = vadd.f32 %v7926_v59, %v3957_v19 }
 0x4c1   : > { %v4037_v38 = vsel %vm3045_vm0, %v7955_v33, 0.0  ;;  %v4073_v20 = vmul.f32 %v7955_v33, %v7955_v33  ;;  %v3998_v13 = vsel %vm3045_vm0, %v8038_v10, 0.0 }
 0x4c2   : > { %4038 = vadd.xlane.f32.xlu1 %v4037_v38 }
 0x4c3   : > { %v4117_v44 = vsel %vm3045_vm0, %v4073_v20, 0.0 }
 0x4c4   : > { %4118 = vadd.xlane.f32.xlu0 %v4117_v44 }
 0x4c6   : > { %v3992_v46 = vpop.f32.mrf.mxu2 }
 0x4c7   : > { %v7963_v15 = vadd.f32 %v7926_v59, %v3992_v46 }
 0x4c9   : > { %v4040_v58 = vsel %vm3045_vm0, %v7963_v15, 0.0  ;;  %v4074_v62 = vmul.f32 %v7963_v15, %v7963_v15 }
 0x4ca   : > { %4041 = vadd.xlane.f32.xlu2 %v4040_v58 }
 0x4cb   : > { %v4120_v49 = vsel %vm3045_vm0, %v4074_v62, 0.0 }
 0x4cc   : > { %4109 = vadd.xlane.f32.xlu0 %v4108_v35  ;;  %4121 = vadd.xlane.f32.xlu1 %v4120_v49  ;;  %v3960_v6 = vpop.f32.mrf.mxu0 }
 0x4cd   : > { %v8021_v63 = vadd.f32 %v7926_v59, %v3960_v6 }
 0x4cf   : > { %v4061_v1 = vmul.f32 %v8021_v63, %v8021_v63  ;;  %v4001_v50 = vsel %vm3045_vm0, %v8021_v63, 0.0 }
 0x4d1   : > { %v4081_v26 = vsel %vm3045_vm0, %v4061_v1, 0.0 }
 0x4d2   : > { %4106 = vadd.xlane.f32.xlu2 %v4105_v22 }
 0x4d4   : > { %4100 = vadd.xlane.f32.xlu0 %v4099_v36  ;;  %4020 = vadd.xlane.f32.xlu1 %v4019_v53  ;;  %v3962_v55 = vpop.f32.mrf.mxu0 }
 0x4d5   : > { %v8032_v11 = vadd.f32 %v7926_v59, %v3962_v55  ;;  %v4060_v59 = vmul.f32 %v8038_v10, %v8038_v10 }
 0x4d7   : > { %v4062_v27 = vmul.f32 %v8032_v11, %v8032_v11  ;;  %v4004_v48 = vsel %vm3045_vm0, %v8032_v11, 0.0  ;;  %v4078_v51 = vsel %vm3045_vm0, %v4060_v59, 0.0 }
 0x4d9   : > { %v4084_v3 = vsel %vm3045_vm0, %v4062_v27, 0.0 }
 0x4da   : > { %4023 = vadd.xlane.f32.xlu2 %v4022_v52 }
 0x4dc   : > { %4017 = vadd.xlane.f32.xlu0 %v4016_v29  ;;  %4103 = vadd.xlane.f32.xlu1 %v4102_v56 }
 0x4e2   : > { %4014 = vadd.xlane.f32.xlu2 %v4013_v4 }
 0x4e4   : > { %4008 = vadd.xlane.f32.xlu0 %v4007_v12  ;;  %4094 = vadd.xlane.f32.xlu1 %v4093_v24 }
 0x4ea   : > { %4097 = vadd.xlane.f32.xlu2 %v4096_v5 }
 0x4ec   : > { %4091 = vadd.xlane.f32.xlu0 %v4090_v60  ;;  %4011 = vadd.xlane.f32.xlu1 %v4010_v57 }
 0x4f2   : > { %4088 = vadd.xlane.f32.xlu2 %v4087_v61 }
 0x4f4   : > { %4082 = vadd.xlane.f32.xlu0 %v4081_v26  ;;  %4002 = vadd.xlane.f32.xlu1 %v4001_v50 }
 0x4fa   : > { %4005 = vadd.xlane.f32.xlu2 %v4004_v48 }
 0x4fc   : > { %3999 = vadd.xlane.f32.xlu0 %v3998_v13  ;;  %4085 = vadd.xlane.f32.xlu1 %v4084_v3 }
 0x502   : > { %3996 = vadd.xlane.f32.xlu2 %v3995_v43 }
 0x504   : > { %4076 = vadd.xlane.f32.xlu1 %v4075_v47 }
 0x50a   : > { %4079 = vadd.xlane.f32.xlu2 %v4078_v51 }
 0x510   : > { %4456 = vperm.xlu0 %4721, %v356_v28  }
 0x515   : > { %v4027_v38 = vpop.xlane.xlu0 %4026 }
 0x516   : > { %v8110_v3 = vmul.f32 %v4027_v38, %v7266_v45 }
 0x51d   : > { %v4030_v23 = vpop.xlane.xlu1 %4029 }
 0x51e   : > { %v8088_v16 = vmul.f32 %v4030_v23, %v7266_v45 }
 0x520   : > { %v4150_v61 = vmul.f32 %v8088_v16, %v8088_v16 }
 0x525   : > { %v4033_v20 = vpop.xlane.xlu2 %4032 }
 0x526   : > { %v8062_v44 = vmul.f32 %v4033_v20, %v7266_v45 }
 0x527   : > { %v4113_v46 = vpop.xlane.xlu1 %4112 }
 0x528   : > { %v4151_v0 = vmul.f32 %v8062_v44, %v8062_v44  ;;  %v4135_v58 = vmul.f32 %v4113_v46, %v7266_v45  ;;  %v4149_v46 = vmul.f32 %v8110_v3, %v8110_v3 }
 0x52a   : > { %v4167_v62 = vsub.f32 %v4135_v58, %v4151_v0 }
 0x52c   : > { %v4183_v35 = vmax.f32 %v4167_v62, 0.0 }
 0x52d   : > { %v4036_v49 = vpop.xlane.xlu0 %4035 }
 0x52e   : > { %v8068_v30 = vmul.f32 %v4036_v49, %v7266_v45  ;;  %v8070_v22 = vadd.f32 1e-05, %v4183_v35 }
 0x52f   : > { %v4116_v18 = vpop.xlane.xlu2 %4115 }
 0x530   : > { %v4152_v2 = vmul.f32 %v8068_v30, %v8068_v30  ;;  %v4136_v36 = vmul.f32 %v4116_v18, %v7266_v45  ;;  %4838 = vrsqrt.f32 %v8070_v22  ;;  %vm4345_vm11 = vweird.f32 %v8070_v22 }
 0x532   : > { %v4168_v53 = vsub.f32 %v4136_v36, %v4152_v2 }
 0x534   : > { %v4184_v32 = vmax.f32 %v4168_v53, 0.0 }
 0x535   : > { %v4039_v52 = vpop.xlane.xlu1 %4038 }
 0x536   : > { %v8077_v29 = vmul.f32 %v4039_v52, %v7266_v45  ;;  %v8079_v56 = vadd.f32 1e-05, %v4184_v32  ;;  %v8085_v12 = vpop.eup %4838 }
 0x537   : > { %v4119_v19 = vpop.xlane.xlu0 %4118  ;;  %v4340_v14 = vmul.f32 %v8085_v12, %v8070_v22  ;;  %vm4346_vm1 = vweird.f32 %v8085_v12  ;;  %v4197_v22 = vsub.f32 %v7929_v31, %v8110_v3 }
 0x538   : > { %v4153_v21 = vmul.f32 %v8077_v29, %v8077_v29  ;;  %v4137_v4 = vmul.f32 %v4119_v19, %v7266_v45  ;;  %4840 = vrsqrt.f32 %v8079_v56  ;;  %vm8162_vm4 = vmor %vm4345_vm11, %vm4346_vm1  ;;  %vm4355_vm7 = vweird.f32 %v8079_v56 }
 0x539   : > { %v4341_v50 = vmul.f32 %v8085_v12, %v4340_v14 }
 0x53a   : > { %v4169_v24 = vsub.f32 %v4137_v4, %v4153_v21 }
 0x53b   : > { %v4342_v59 = vmul.f32 0.5, %v4341_v50 }
 0x53c   : > { %v4185_v6 = vmax.f32 %v4169_v24, 0.0 }
 0x53d   : > { %v4042_v5 = vpop.xlane.xlu2 %4041  ;;  %v4343_v53 = vsub.f32 1.5, %v4342_v59 }
 0x53e   : > { %v8092_v60 = vadd.f32 1e-05, %v4185_v6  ;;  %v8095_v57 = vmul.f32 %v4042_v5, %v7266_v45  ;;  %v8097_v7 = vpop.eup %4840 }
 0x53f   : > { %v4110_v1 = vpop.xlane.xlu0 %4109  ;;  %v4122_v55 = vpop.xlane.xlu1 %4121  ;;  %v4350_v26 = vmul.f32 %v8097_v7, %v8079_v56  ;;  %vm4356_vm2 = vweird.f32 %v8097_v7  ;;  %v4201_v56 = vsub.f32 %v7955_v33, %v8077_v29  ;;  %v8199_v29 = vld [vmem:[%s8541_s8 + $0x1] ss:$0 sm:$0xff] }
 0x540   : > { %4842 = vrsqrt.f32 %v8092_v60  ;;  %v4154_v27 = vmul.f32 %v8095_v57, %v8095_v57  ;;  %v4134_v48 = vmul.f32 %v4110_v1, %v7266_v45  ;;  %v4138_v13 = vmul.f32 %v4122_v55, %v7266_v45  ;;  %vm8178_vm9 = vmor %vm4355_vm7, %vm4356_vm2 }
 0x541   : > { %v4351_v39 = vmul.f32 %v8097_v7, %v4350_v26  ;;  %v4344_v1 = vmul.f32 %v8085_v12, %v4343_v53  ;;  %vm4365_vm6 = vweird.f32 %v8092_v60 }
 0x542   : > { %v4166_v43 = vsub.f32 %v4134_v48, %v4150_v61  ;;  %v4170_v47 = vsub.f32 %v4138_v13, %v4154_v27 }
 0x543   : > { %v4352_v58 = vmul.f32 0.5, %v4351_v39 }
 0x544   : > { %v4182_v51 = vmax.f32 %v4166_v43, 0.0  ;;  %v4186_v28 = vmax.f32 %v4170_v47, 0.0 }
 0x545   : > { %v4107_v23 = vpop.xlane.xlu2 %4106  ;;  %v4353_v4 = vsub.f32 1.5, %v4352_v58  ;;  %v4348_v58 = vsel %vm8162_vm4, %v8085_v12, %v4344_v1 }
 0x546   : > { %v8113_v20 = vpop.eup %4842  ;;  %v4133_v0 = vmul.f32 %v4107_v23, %v7266_v45  ;;  %v8120_v62 = vadd.f32 1e-05, %v4182_v51  ;;  %v8122_v35 = vadd.f32 1e-05, %v4186_v28  ;;  %v4198_v51 = vsub.f32 %v7934_v42, %v8088_v16 }
 0x547   : > { %v4360_v38 = vmul.f32 %v8113_v20, %v8092_v60  ;;  %v4101_v49 = vpop.xlane.xlu0 %4100  ;;  %v4021_v18 = vpop.xlane.xlu1 %4020  ;;  %v4354_v50 = vmul.f32 %v8097_v7, %v4353_v4  ;;  %v4199_v28 = vsub.f32 %v7939_v40, %v8062_v44  ;;  %v4200_v40 = vsub.f32 %v7947_v41, %v8068_v30 }
 0x548   : > { %v4165_v2 = vsub.f32 %v4133_v0, %v4149_v46  ;;  %v8125_v36 = vmul.f32 %v4021_v18, %v7266_v45  ;;  %4844 = vrsqrt.f32 %v8120_v62  ;;  %v4131_v19 = vmul.f32 %v4101_v49, %v7266_v45 }
 0x549   : > { %v4361_v32 = vmul.f32 %v8113_v20, %v4360_v38  ;;  %4846 = vrsqrt.f32 %v8122_v35  ;;  %vm4366_vm5 = vweird.f32 %v8113_v20  ;;  %v4358_v30 = vsel %vm8178_vm9, %v8097_v7, %v4354_v50 }
 0x54a   : > { %v4181_v52 = vmax.f32 %v4165_v2, 0.0  ;;  %v4147_v21 = vmul.f32 %v8125_v36, %v8125_v36  ;;  %vm4375_vm12 = vweird.f32 %v8122_v35  ;;  %vm8207_vm13 = vmor %vm4365_vm6, %vm4366_vm5  ;;  %v4392_v1 = vmul.f32 %v4358_v30, %v4200_v40 }
 0x54b   : > { %v4362_v24 = vmul.f32 0.5, %v4361_v32  ;;  %v4391_v32 = vmul.f32 %v4348_v58, %v4199_v28  ;;  %vm4335_vm3 = vweird.f32 %v8120_v62 }
 0x54c   : > { %v8133_v6 = vadd.f32 1e-05, %v4181_v52  ;;  %v4163_v14 = vsub.f32 %v4131_v19, %v4147_v21  ;;  %v4202_v52 = vsub.f32 %v7963_v15, %v8095_v57  ;;  %v4195_v15 = vsub.f32 %v7972_v8, %v8125_v36 }
 0x54d   : > { %v4024_v5 = vpop.xlane.xlu2 %4023  ;;  %v4363_v39 = vsub.f32 1.5, %v4362_v24  ;;  %v4408_v28 = vmul.f32 %v8199_v29, %v4391_v32  ;;  %v4409_v40 = vmul.f32 %v8199_v29, %v4392_v1 }
 0x54e   : > { %4848 = vrsqrt.f32 %v8133_v6  ;;  %v4179_v55 = vmax.f32 %v4163_v14, 0.0  ;;  %v8139_v61 = vmul.f32 %v4024_v5, %v7266_v45  ;;  %v8141_v26 = vpop.eup %4844  ;;  %vm4325_vm15 = vweird.f32 %v8133_v6 }
 0x54f   : > { %v4018_v27 = vpop.xlane.xlu0 %4017  ;;  %v4104_v48 = vpop.xlane.xlu1 %4103  ;;  %v4330_v43 = vmul.f32 %v8141_v26, %v8120_v62  ;;  %v4364_v12 = vmul.f32 %v8113_v20, %v4363_v39  ;;  %vm4336_vm14 = vweird.f32 %v8141_v26 }
 0x550   : > { %v8146_v13 = vpop.eup %4846  ;;  %v8150_v47 = vadd.f32 1e-05, %v4179_v55  ;;  %v4148_v59 = vmul.f32 %v8139_v61, %v8139_v61  ;;  %v4132_v0 = vmul.f32 %v4104_v48, %v7266_v45  ;;  %v4196_v44 = vsub.f32 %v7982_v25, %v8139_v61  ;;  %vm8277_vm2 = vmor %vm4335_vm3, %vm4336_vm14 }
 0x551   : > { %v4370_v46 = vmul.f32 %v8146_v13, %v8122_v35  ;;  %v4331_v38 = vmul.f32 %v8141_v26, %v4330_v43  ;;  %v4368_v48 = vsel %vm8207_vm13, %v8113_v20, %v4364_v12  ;;  %vm4376_vm10 = vweird.f32 %v8146_v13  ;;  %v8237_v20 = vld [vmem:[%s8541_s8 + $0x2] ss:$0 sm:$0xff] }
 0x552   : > { %4850 = vrsqrt.f32 %v8150_v47  ;;  %v4164_v41 = vsub.f32 %v4132_v0, %v4148_v59  ;;  %v8226_v59 = vmul.f32 %v4018_v27, %v7266_v45  ;;  %v4393_v58 = vmul.f32 %v4368_v48, %v4201_v56  ;;  %vm4377_vm8 = vmor %vm4375_vm12, %vm4376_vm10 }
 0x553   : > { %v4371_v49 = vmul.f32 %v8146_v13, %v4370_v46  ;;  %v4332_v21 = vmul.f32 0.5, %v4331_v38  ;;  %v4425_v32 = vadd.f32 %v8237_v20, %v4408_v28  ;;  %vm4305_vm11 = vweird.f32 %v8150_v47 }
 0x554   : > { %v8186_v18 = vpop.eup %4848  ;;  %v4180_v19 = vmax.f32 %v4164_v41, 0.0  ;;  %v4146_v41 = vmul.f32 %v8226_v59, %v8226_v59  ;;  %v4410_v56 = vmul.f32 %v8199_v29, %v4393_v58 }
 0x555   : > { %v4372_v2 = vmul.f32 0.5, %v4371_v49  ;;  %v4320_v33 = vmul.f32 %v8186_v18, %v8133_v6  ;;  %v4015_v53 = vpop.xlane.xlu2 %4014  ;;  %v4333_v0 = vsub.f32 1.5, %v4332_v21  ;;  %vm4326_vm1 = vweird.f32 %v8186_v18 }
 0x556   : > { %v8205_v7 = vmul.f32 %v4015_v53, %v7266_v45  ;;  %v8216_v57 = vadd.f32 1e-05, %v4180_v19  ;;  %vm8290_vm7 = vmor %vm4325_vm15, %vm4326_vm1 }
 0x557   : > { %v4373_v4 = vsub.f32 1.5, %v4372_v2  ;;  %v4321_v24 = vmul.f32 %v8186_v18, %v4320_v33  ;;  %v4009_v14 = vpop.xlane.xlu0 %4008  ;;  %v4095_v5 = vpop.xlane.xlu1 %4094  ;;  %v4334_v19 = vmul.f32 %v8141_v26, %v4333_v0 }
 0x558   : > { %v8212_v55 = vpop.eup %4850  ;;  %v4145_v50 = vmul.f32 %v8205_v7, %v8205_v7  ;;  %4852 = vrsqrt.f32 %v8216_v57  ;;  %v4129_v46 = vmul.f32 %v4095_v5, %v7266_v45  ;;  %v4193_v42 = vsub.f32 %v7995_v34, %v8205_v7 }
 0x559   : > { %v4322_v39 = vmul.f32 0.5, %v4321_v24  ;;  %v4300_v43 = vmul.f32 %v8212_v55, %v8150_v47  ;;  %v4374_v23 = vmul.f32 %v8146_v13, %v4373_v4  ;;  %v4426_v4 = vadd.f32 %v8237_v20, %v4409_v40 }
 0x55a   : > { %v4161_v38 = vsub.f32 %v4129_v46, %v4145_v50  ;;  %vm4306_vm4 = vweird.f32 %v8212_v55  ;;  %v4338_v6 = vsel %vm8277_vm2, %v8141_v26, %v4334_v19  ;;  %vm4315_vm5 = vweird.f32 %v8216_v57 }
 0x55b   : > { %v4301_v27 = vmul.f32 %v8212_v55, %v4300_v43  ;;  %v4323_v49 = vsub.f32 1.5, %v4322_v39  ;;  %v4378_v53 = vsel %vm4377_vm8, %v8146_v13, %v4374_v23  ;;  %v4442_v40 = vmax.f32 %v4426_v4, 0.0  ;;  %vm8319_vm9 = vmor %vm4305_vm11, %vm4306_vm4 }
 0x55c   : > { %v4177_v2 = vmax.f32 %v4161_v38, 0.0  ;;  %v4394_v21 = vmul.f32 %v4378_v53, %v4202_v52  ;;  %v4427_v52 = vadd.f32 %v8237_v20, %v4410_v56  ;;  %v4390_v31 = vmul.f32 %v4338_v6, %v4198_v51 }
 0x55d   : > { %v4302_v12 = vmul.f32 0.5, %v4301_v27  ;;  %v4098_v30 = vpop.xlane.xlu2 %4097  ;;  %v4324_v48 = vmul.f32 %v8186_v18, %v4323_v49  ;;  %v8283_v27 = vmul.f32 %v4009_v14, %v7266_v45 }
 0x55e   : > { %v4130_v33 = vmul.f32 %v4098_v30, %v7266_v45  ;;  %v8257_v24 = vpop.eup %4852  ;;  %v8259_v1 = vadd.f32 1e-05, %v4177_v2  ;;  %v4411_v43 = vmul.f32 %v8199_v29, %v4394_v21  ;;  %v4443_v30 = vmax.f32 %v4427_v52, 0.0 }
 0x55f   : > { %v4092_v35 = vpop.xlane.xlu0 %4091  ;;  %v4012_v60 = vpop.xlane.xlu1 %4011  ;;  %v4303_v5 = vsub.f32 1.5, %v4302_v12  ;;  %v4310_v39 = vmul.f32 %v8257_v24, %v8216_v57  ;;  %v4328_v2 = vsel %vm8290_vm7, %v8186_v18, %v4324_v48  ;;  %vm4316_vm6 = vweird.f32 %v8257_v24 }
 0x560   : > { %v4162_v50 = vsub.f32 %v4130_v33, %v4146_v41  ;;  %v8262_v13 = vmul.f32 %v4012_v60, %v7266_v45  ;;  %4854 = vrsqrt.f32 %v8259_v1  ;;  %v4128_v23 = vmul.f32 %v4092_v35, %v7266_v45  ;;  %vm4317_vm10 = vmor %vm4315_vm5, %vm4316_vm6 }
 0x561   : > { %v4428_v58 = vadd.f32 %v8237_v20, %v4411_v43  ;;  %v4304_v62 = vmul.f32 %v8212_v55, %v4303_v5  ;;  %v4311_v49 = vmul.f32 %v8257_v24, %v4310_v39  ;;  %v4194_v33 = vsub.f32 %v7988_v9, %v8226_v59 }
 0x562   : > { %v4178_v28 = vmax.f32 %v4162_v50, 0.0  ;;  %v4144_v46 = vmul.f32 %v8262_v13, %v8262_v13  ;;  %v4441_v35 = vmax.f32 %v4425_v32, 0.0  ;;  %v4143_v60 = vmul.f32 %v8283_v27, %v8283_v27 }
 0x563   : > { %v4444_v56 = vmax.f32 %v4428_v58, 0.0  ;;  %v4389_v18 = vmul.f32 %v4328_v2, %v4197_v22  ;;  %v4312_v19 = vmul.f32 0.5, %v4311_v49  ;;  %v4308_v3 = vsel %vm8319_vm9, %v8212_v55, %v4304_v62 }
 0x564   : > { %v8296_v12 = vadd.f32 1e-05, %v4178_v28  ;;  %v4160_v41 = vsub.f32 %v4128_v23, %v4144_v46  ;;  %v4452_v43 = vpack.c.bf16 %v4442_v40, %v4441_v35  ;;  %v4407_v40 = vmul.f32 %v8199_v29, %v4390_v31 }
 0x565   : > { %v4089_v14 = vpop.xlane.xlu2 %4088  ;;  %v4453_v4 = vpack.c.bf16 %v4444_v56, %v4443_v30  ;;  %v4406_v55 = vmul.f32 %v8199_v29, %v4389_v18  ;;  %v4313_v0 = vsub.f32 1.5, %v4312_v19  ;;  %v4387_v38 = vmul.f32 %v4308_v3, %v4195_v15 }
 0x566   : > { %4856 = vrsqrt.f32 %v8296_v12  ;;  %v4176_v53 = vmax.f32 %v4160_v41, 0.0  ;;  %v4127_v21 = vmul.f32 %v4089_v14, %v7266_v45  ;;  %v8313_v26 = vpop.eup %4854  ;;  %v4191_v62 = vsub.f32 %v8002_v37, %v8283_v27 }
 0x567   : > { %v4083_v5 = vpop.xlane.xlu0 %4082  ;;  %v4003_v50 = vpop.xlane.xlu1 %4002  ;;  %v4280_v47 = vmul.f32 %v8313_v26, %v8259_v1  ;;  %v4484_v52 = vsel %vm3045_vm0, %v4453_v4, 0  ;;  %v4481_v6 = vsel %vm3045_vm0, %v4452_v43, 0  ;;  %v4423_v15 = vadd.f32 %v8237_v20, %v4406_v55 }
 0x568   : > { %v8323_v48 = vadd.f32 1e-05, %v4176_v53  ;;  %v8326_v39 = vmul.f32 %v4003_v50, %v7266_v45  ;;  %v4159_v22 = vsub.f32 %v4127_v21, %v4143_v60  ;;  %v4125_v28 = vmul.f32 %v4083_v5, %v7266_v45  ;;  %4486 = vmatpush.bf16.xpose.msra.mxu3 %v4484_v52 }
 0x569   : > { %v4281_v16 = vmul.f32 %v8313_v26, %v4280_v47  ;;  %v4314_v35 = vmul.f32 %v8257_v24, %v4313_v0  ;;  %vm4285_vm12 = vweird.f32 %v8259_v1  ;;  %v4192_v60 = vsub.f32 %v8010_v17, %v8262_v13 }
 0x56a   : > { %4858 = vrsqrt.f32 %v8323_v48  ;;  %v4141_v23 = vmul.f32 %v8326_v39, %v8326_v39  ;;  %v4175_v51 = vmax.f32 %v4159_v22, 0.0  ;;  %v4424_v4 = vadd.f32 %v8237_v20, %v4407_v40 }
 0x56b   : > { %v4282_v30 = vmul.f32 0.5, %v4281_v16  ;;  %v4404_v5 = vmul.f32 %v8199_v29, %v4387_v38  ;;  %vm4286_vm13 = vweird.f32 %v8313_v26  ;;  %vm4295_vm3 = vweird.f32 %v8296_v12 }
 0x56c   : > { %v8345_v46 = vpop.eup %4856  ;;  %v4157_v58 = vsub.f32 %v4125_v28, %v4141_v23  ;;  %v8356_v41 = vadd.f32 1e-05, %v4175_v51  ;;  %vm4275_vm14 = vweird.f32 %v8323_v48  ;;  %v4439_v22 = vmax.f32 %v4423_v15, 0.0  ;;  %vm8419_vm1 = vmor %vm4285_vm12, %vm4286_vm13 }
 0x56d   : > { %v4290_v49 = vmul.f32 %v8345_v46, %v8296_v12  ;;  %v4006_v14 = vpop.xlane.xlu2 %4005  ;;  %v4283_v19 = vsub.f32 1.5, %v4282_v30  ;;  %vm4296_vm15 = vweird.f32 %v8345_v46  ;;  %v4440_v52 = vmax.f32 %v4424_v4, 0.0 }
 0x56e   : > { %v4173_v56 = vmax.f32 %v4157_v58, 0.0  ;;  %v8359_v2 = vmul.f32 %v4006_v14, %v7266_v45  ;;  %4860 = vrsqrt.f32 %v8356_v41  ;;  %v4318_v28 = vsel %vm4317_vm10, %v8257_v24, %v4314_v35  ;;  %vm8438_vm11 = vmor %vm4295_vm3, %vm4296_vm15 }
 0x56f   : > { %v4291_v8 = vmul.f32 %v8345_v46, %v4290_v49  ;;  %v4086_v36 = vpop.xlane.xlu1 %4085  ;;  %v4000_v31 = vpop.xlane.xlu0 %3999  ;;  %v4388_v0 = vmul.f32 %v4318_v28, %v4196_v44  ;;  %v4284_v58 = vmul.f32 %v8313_v26, %v4283_v19  ;;  %v4451_v24 = vpack.c.bf16 %v4440_v52, %v4439_v22 }
 0x570   : > { %v8366_v53 = vpop.eup %4858  ;;  %v8372_v21 = vadd.f32 1e-05, %v4173_v56  ;;  %v4142_v32 = vmul.f32 %v8359_v2, %v8359_v2  ;;  %4487 = vmatpush.bf16.xpose.msra.mxu3 %v4481_v6  ;;  %v4126_v47 = vmul.f32 %v4086_v36, %v7266_v45  ;;  %v8395_v57 = vmul.f32 %v4000_v31, %v7266_v45 }
 0x571   : > { %v4292_v50 = vmul.f32 0.5, %v4291_v8  ;;  %v4270_v18 = vmul.f32 %v8366_v53, %v8323_v48  ;;  %vm4276_vm8 = vweird.f32 %v8366_v53  ;;  %v4405_v56 = vmul.f32 %v8199_v29, %v4388_v0 }
 0x572   : > { %4862 = vrsqrt.f32 %v8372_v21  ;;  %v4158_v51 = vsub.f32 %v4126_v47, %v4142_v32  ;;  %v4421_v8 = vadd.f32 %v8237_v20, %v4404_v5  ;;  %v4288_v1 = vsel %vm8419_vm1, %v8313_v26, %v4284_v58  ;;  %vm8450_vm7 = vmor %vm4275_vm14, %vm4276_vm8 }
 0x573   : > { %v4271_v3 = vmul.f32 %v8366_v53, %v4270_v18  ;;  %v4293_v43 = vsub.f32 1.5, %v4292_v50  ;;  %v4478_v50 = vsel %vm3045_vm0, %v4451_v24, 0  ;;  %v4422_v32 = vadd.f32 %v8237_v20, %v4405_v56 }
 0x574   : > { %v8392_v23 = vpop.eup %4860  ;;  %v4174_v14 = vmax.f32 %v4158_v51, 0.0  ;;  %vm4265_vm2 = vweird.f32 %v8356_v41  ;;  %v4437_v47 = vmax.f32 %v4421_v8, 0.0  ;;  %v4385_v48 = vmul.f32 %v4288_v1, %v4193_v42 }
 0x575   : > { %v4272_v16 = vmul.f32 0.5, %v4271_v3  ;;  %v3997_v55 = vpop.xlane.xlu2 %3996  ;;  %v4260_v40 = vmul.f32 %v8392_v23, %v8356_v41  ;;  %v4294_v25 = vmul.f32 %v8345_v46, %v4293_v43  ;;  %vm4266_vm4 = vweird.f32 %v8392_v23 }
 0x576   : > { %v8404_v38 = vmul.f32 %v3997_v55, %v7266_v45  ;;  %v8426_v4 = vadd.f32 1e-05, %v4174_v14  ;;  %v4438_v22 = vmax.f32 %v4422_v32, 0.0  ;;  %v4140_v55 = vmul.f32 %v8395_v57, %v8395_v57  ;;  %vm8478_vm9 = vmor %vm4265_vm2, %vm4266_vm4 }
 0x577   : > { %v4273_v49 = vsub.f32 1.5, %v4272_v16  ;;  %v4077_v30 = vpop.xlane.xlu1 %4076  ;;  %v4261_v61 = vmul.f32 %v8392_v23, %v4260_v40  ;;  %v4298_v16 = vsel %vm8438_vm11, %v8345_v46, %v4294_v25  ;;  %v4402_v46 = vmul.f32 %v8199_v29, %v4385_v48 }
 0x578   : > { %v8408_v6 = vpop.eup %4862  ;;  %v4139_v44 = vmul.f32 %v8404_v38, %v8404_v38  ;;  %v4123_v5 = vmul.f32 %v4077_v30, %v7266_v45  ;;  %4864 = vrsqrt.f32 %v8426_v4  ;;  %4488 = vmatpush.bf16.xpose.msra.mxu3 %v4478_v50  ;;  %v4386_v24 = vmul.f32 %v4298_v16, %v4194_v33 }
 0x579   : > { %v4274_v15 = vmul.f32 %v8366_v53, %v4273_v49  ;;  %v4240_v35 = vmul.f32 %v8408_v6, %v8372_v21  ;;  %v4262_v18 = vmul.f32 0.5, %v4261_v61  ;;  %vm4246_vm5 = vweird.f32 %v8408_v6 }
 0x57a   : > { %v4155_v3 = vsub.f32 %v4123_v5, %v4139_v44  ;;  %v4403_v33 = vmul.f32 %v8199_v29, %v4386_v24  ;;  %v4419_v17 = vadd.f32 %v8237_v20, %v4402_v46  ;;  %vm4245_vm6 = vweird.f32 %v8372_v21 }
 0x57b   : > { %v4241_v31 = vmul.f32 %v8408_v6, %v4240_v35  ;;  %v4263_v12 = vsub.f32 1.5, %v4262_v18  ;;  %v4278_v43 = vsel %vm8450_vm7, %v8366_v53, %v4274_v15  ;;  %v4450_v53 = vpack.c.bf16 %v4438_v22, %v4437_v47  ;;  %vm4247_vm12 = vmor %vm4245_vm6, %vm4246_vm5 }
 0x57c   : > { %v4171_v0 = vmax.f32 %v4155_v3, 0.0  ;;  %v4384_v34 = vmul.f32 %v4278_v43, %v4192_v60  ;;  %v4420_v14 = vadd.f32 %v8237_v20, %v4403_v33  ;;  %v4189_v21 = vsub.f32 %v8021_v63, %v8326_v39 }
 0x57d   : > { %v4242_v52 = vmul.f32 0.5, %v4241_v31  ;;  %v4080_v28 = vpop.xlane.xlu2 %4079  ;;  %v4264_v51 = vmul.f32 %v8392_v23, %v4263_v12  ;;  %v4475_v60 = vsel %vm3045_vm0, %v4450_v53, 0  ;;  %v4435_v44 = vmax.f32 %v4419_v17, 0.0 }
 0x57e   : > { %v4124_v58 = vmul.f32 %v4080_v28, %v7266_v45  ;;  %v4203_v45 = vadd.f32 1e-05, %v4171_v0  ;;  %v4865_v9 = vpop.eup %4864  ;;  %v4401_v30 = vmul.f32 %v8199_v29, %v4384_v34  ;;  %v4436_v8 = vmax.f32 %v4420_v14, 0.0 }
 0x57f   : > { %v4243_v40 = vsub.f32 1.5, %v4242_v52  ;;  %v4268_v13 = vsel %vm8478_vm9, %v8392_v23, %v4264_v51  ;;  %v4250_v41 = vmul.f32 %v4865_v9, %v8426_v4  ;;  %vm4256_vm13 = vweird.f32 %v4865_v9 }
 0x580   : > { %v4156_v42 = vsub.f32 %v4124_v58, %v4140_v55  ;;  %4866 = vrsqrt.f32 %v4203_v45  ;;  %4489 = vmatpush.bf16.xpose.msra.mxu3 %v4475_v60  ;;  %v4383_v23 = vmul.f32 %v4268_v13, %v4191_v62  ;;  %v4449_v50 = vpack.c.bf16 %v4436_v8, %v4435_v44 }
 0x581   : > { %v4244_v59 = vmul.f32 %v8408_v6, %v4243_v40  ;;  %v4251_v25 = vmul.f32 %v4865_v9, %v4250_v41  ;;  %v4418_v37 = vadd.f32 %v8237_v20, %v4401_v30  ;;  %vm4255_vm3 = vweird.f32 %v8426_v4 }
 0x582   : > { %v4172_v49 = vmax.f32 %v4156_v42, 0.0  ;;  %v4400_v15 = vmul.f32 %v8199_v29, %v4383_v23  ;;  %v4472_v63 = vsel %vm3045_vm0, %v4449_v50, 0  ;;  %v4190_v1 = vsub.f32 %v8032_v11, %v8359_v2  ;;  %vm4257_vm10 = vmor %vm4255_vm3, %vm4256_vm13  ;;  %v4457_v60 = vpop.permute.xlu0 %4456 }
 0x583   : > { %v4248_v56 = vsel %vm4247_vm12, %v8408_v6, %v4244_v59  ;;  %v4252_v36 = vmul.f32 0.5, %v4251_v25  ;;  %v4434_v31 = vmax.f32 %v4418_v37, 0.0  ;;  %vm4225_vm15 = vweird.f32 %v4203_v45 }
 0x584   : > { %v4204_v61 = vadd.f32 1e-05, %v4172_v49  ;;  %v4381_v35 = vmul.f32 %v4248_v56, %v4189_v21  ;;  %v4417_v6 = vadd.f32 %v8237_v20, %v4400_v15  ;;  %v4187_v2 = vsub.f32 %v8045_v54, %v8404_v38 }
 0x585   : > { %v4253_v5 = vsub.f32 1.5, %v4252_v36  ;;  %v4188_v7 = vsub.f32 %v8038_v10, %v8395_v57  ;;  %v4445_v57 = vld [vmem:[%s8539_s6] sm:$0x1] }
 0x586   : > { %4868 = vrsqrt.f32 %v4204_v61  ;;  %v4867_v18 = vpop.eup %4866  ;;  %v4433_v39 = vmax.f32 %v4417_v6, 0.0  ;;  %v4398_v32 = vmul.f32 %v8199_v29, %v4381_v35  ;;  %vm4235_vm11 = vweird.f32 %v4204_v61 }
 0x587   : > { %v4220_v27 = vmul.f32 %v4867_v18, %v4203_v45  ;;  %v4254_v62 = vmul.f32 %v4865_v9, %v4253_v5  ;;  %vm4226_vm14 = vweird.f32 %v4867_v18 }
 0x588   : > { %4490 = vmatpush.bf16.xpose.msra.mxu3 %v4472_v63  ;;  %v4448_v43 = vpack.c.bf16 %v4434_v31, %v4433_v39  ;;  %v4415_v28 = vadd.f32 %v8237_v20, %v4398_v32  ;;  %vm4227_vm8 = vmor %vm4225_vm15, %vm4226_vm14 }
 0x589   : > { %v4221_v19 = vmul.f32 %v4867_v18, %v4220_v27  ;;  %v4258_v26 = vsel %vm4257_vm10, %v4865_v9, %v4254_v62 }
 0x58a   : > { %v4382_v47 = vmul.f32 %v4258_v26, %v4190_v1  ;;  %v4469_v55 = vsel %vm3045_vm0, %v4448_v43, 0  ;;  %v4431_v0 = vmax.f32 %v4415_v28, 0.0 }
 0x58b   : > { %v4222_v3 = vmul.f32 0.5, %v4221_v19 }
 0x58c   : > { %v4869_v12 = vpop.eup %4868  ;;  %v4399_v4 = vmul.f32 %v8199_v29, %v4382_v47 }
 0x58d   : > { %v4230_v22 = vmul.f32 %v4869_v12, %v4204_v61  ;;  %v4223_v52 = vsub.f32 1.5, %v4222_v3  ;;  %vm4236_vm1 = vweird.f32 %v4869_v12 }
 0x58e   : > { %v4416_v11 = vadd.f32 %v8237_v20, %v4399_v4  ;;  %vm4237_vm2 = vmor %vm4235_vm11, %vm4236_vm1 }
 0x58f   : > { %v4231_v16 = vmul.f32 %v4869_v12, %v4230_v22  ;;  %v4224_v48 = vmul.f32 %v4867_v18, %v4223_v52 }
 0x590   : > { %4491 = vmatpush.bf16.xpose.msra.mxu3 %v4469_v55  ;;  %v4432_v58 = vmax.f32 %v4416_v11, 0.0 }
 0x591   : > { %v4232_v51 = vmul.f32 0.5, %v4231_v16  ;;  %v4228_v40 = vsel %vm4227_vm8, %v4867_v18, %v4224_v48 }
 0x592   : > { %v4379_v24 = vmul.f32 %v4228_v40, %v4187_v2  ;;  %v4447_v46 = vpack.c.bf16 %v4432_v58, %v4431_v0 }
 0x593   : > { %v4233_v53 = vsub.f32 1.5, %v4232_v51 }
 0x594   : > { %v4396_v54 = vmul.f32 %v8199_v29, %v4379_v24  ;;  %v4466_v38 = vsel %vm3045_vm0, %v4447_v46, 0 }
 0x595   : > { %v4234_v34 = vmul.f32 %v4869_v12, %v4233_v53 }
 0x596   : > { %v4413_v59 = vadd.f32 %v8237_v20, %v4396_v54 }
 0x597   : > { %v4238_v45 = vsel %vm4237_vm2, %v4869_v12, %v4234_v34 }
 0x598   : > { %v4380_v42 = vmul.f32 %v4238_v45, %v4188_v7  ;;  %4492 = vmatpush.bf16.xpose.msra.mxu3 %v4466_v38  ;;  %v4429_v17 = vmax.f32 %v4413_v59, 0.0 }
 0x59a   : > { %v4397_v9 = vmul.f32 %v8199_v29, %v4380_v42 }
 0x59c   : > { %v4414_v33 = vadd.f32 %v8237_v20, %v4397_v9 }
 0x59e   : > { %v4430_v13 = vmax.f32 %v4414_v33, 0.0 }
 0x5a0   : > { %v4446_v41 = vpack.c.bf16 %v4430_v13, %v4429_v17 }
 0x5a2   : > { %v4463_v10 = vsel %vm3045_vm0, %v4446_v41, 0 }
 0x5a3   : > { %4493 = vmatpush.bf16.xpose.msra.mxu3 %v4463_v10 }
 0x5aa   : > { %4684 = vmatmul.msk.bf16.vlgmr.msra.gmra.mxu3 %vm3045_vm0, %v4445_v57 }
 0x62d   : > { %v4495_v29 = vpop.f32.mrf.mxu3 }
 0x62e   : > { %v4496_v49 = vadd.f32 %v4495_v29, %v4457_v60 }
 0x630   : > { %4499 = vst [vmem:[%s345_s14] sm:$0x1] %v4496_v49 }
 0x635   : > { %v4497_v20 = vpop.f32.mrf.mxu3 }
 0x636 PF: > { %s19_s30 = sadd.s32 1, %s4880_s30  }
 0x637   : > { %p16_p4 = scmp.ge.s32.totalorder %s19_s30, 4  }
 0x639   :  { %18 = sbr.rel (!%p16_p4) target bundleno = 1 (0x1), region = 89 }

</bundles_post_ra>
